<compile_context>
chip_gen: v7x
topology: tpu7x:2x2x1
jax: 0.10.0
libtpu: 0.0.40
codegen_flags: <defaults>
</compile_context>

<pallas_src>
import jax
import jax.numpy as jnp
from jax import lax
from jax.experimental import pallas as pl
from jax.experimental.pallas import tpu as pltpu


# ----------------------------------------------------------------------------
# Fused GraphGRU kernel.
# ----------------------------------------------------------------------------
def _graph_gru_kernel(edge_src_ref,                                   # SMEM (E,)
                      node_x_ref, edge_x_ref, graph_x_ref,            # VMEM inputs
                      wih_n_ref, whh_n_ref, bi_n_ref, bhn_n_ref,      # node GRU params
                      wih_e_raw_ref, wih_e_hid_ref, whh_e_ref,        # edge GRU params
                      bi_e_ref, bhn_e_ref,
                      wih_g_raw_ref, wih_g_hid_ref, whh_g_ref,        # graph GRU params
                      bi_g_ref, bhn_g_ref,
                      node_hn_ref, graph_hn_ref,                      # outputs
                      gi_node_s, node_out_s, gathered_s,              # scratch
                      gi_edge_s, edge_out_s, gi_graph_s):
    f32 = jnp.float32

    def run_gru(gi_ref, whh_t, bhn, T, H, out_ref=None):
        """Serial GRU recurrence over T rows of the (T, 3H) pre-activations.

        whh_t (H, 3H) and bhn (1, H) are plain values hoisted out of the loop.
        h is carried as a value (never stored back to scratch per step).
        The Python loop fully unrolls (T is static and small)."""
        h = jnp.zeros((1, H), f32)
        for t in range(T):
            gh = jnp.dot(h, whh_t, preferred_element_type=f32)        # (1, 3H)
            gi_t = gi_ref[pl.ds(t, 1), :]                             # (1, 3H)
            rz = jax.nn.sigmoid(gi_t[:, :2 * H] + gh[:, :2 * H])
            r = rz[:, :H]
            z = rz[:, H:]
            n = jnp.tanh(gi_t[:, 2 * H:] + r * (gh[:, 2 * H:] + bhn))
            h = (1.0 - z) * n + z * h
            if out_ref is not None:
                out_ref[pl.ds(t, 1), :] = h
        return h

    # -------- node GRU --------------------------------------------------
    N, H1 = node_out_s.shape
    gi_node_s[...] = (jnp.dot(node_x_ref[...], wih_n_ref[...],
                              preferred_element_type=f32) + bi_n_ref[...])
    h_node = run_gru(gi_node_s, whh_n_ref[...], bhn_n_ref[...], N, H1, node_out_s)
    node_hn_ref[...] = h_node

    # -------- gather node hidden rows for edge sources ------------------
    # Edge source indices live in SMEM; dynamic-row loads from VMEM scratch.
    E = gathered_s.shape[0]
    for e in range(E):
        idx = edge_src_ref[e]
        gathered_s[pl.ds(e, 1), :] = node_out_s[pl.ds(idx, 1), :]

    # -------- edge GRU ---------------------------------------------------
    # cat([edge_raw, gathered]) @ W_ih^T  ==  two matmuls summed.
    H2 = edge_out_s.shape[1]
    gi_edge_s[...] = (
        jnp.dot(edge_x_ref[...], wih_e_raw_ref[...], preferred_element_type=f32)
        + jnp.dot(gathered_s[...], wih_e_hid_ref[...], preferred_element_type=f32)
        + bi_e_ref[...])
    run_gru(gi_edge_s, whh_e_ref[...], bhn_e_ref[...], E, H2, edge_out_s)

    # -------- graph GRU --------------------------------------------------
    H3 = graph_hn_ref.shape[1]
    gi_graph_s[...] = (
        jnp.dot(graph_x_ref[...], wih_g_raw_ref[...], preferred_element_type=f32)
        + jnp.dot(edge_out_s[...], wih_g_hid_ref[...], preferred_element_type=f32)
        + bi_g_ref[...])
    h_graph = run_gru(gi_graph_s, whh_g_ref[...], bhn_g_ref[...], E, H3, None)
    graph_hn_ref[...] = h_graph


# ----------------------------------------------------------------------------
# Parameter preparation (pre-transpose, fuse gates, fold biases).
# ----------------------------------------------------------------------------
def _prep_gru(params):
    """PyTorch (w_ih, w_hh, b_ih, b_hh) -> (W_ih^T, W_hh^T, fused b_i, b_hn).

    Gate order stays r | z | n along the 3H axis.  b_hr is folded into b_ir
    and b_hz into b_iz (exact); b_hn must stay separate (it is scaled by r)."""
    w_ih, w_hh, b_ih, b_hh = params
    H = w_hh.shape[1]
    w_ih_t = jnp.transpose(w_ih)                      # (I, 3H)
    w_hh_t = jnp.transpose(w_hh)                      # (H, 3H)
    b_i = (b_ih.at[:2 * H].add(b_hh[:2 * H])).reshape(1, 3 * H)
    b_hn = b_hh[2 * H:].reshape(1, H)
    return w_ih_t, w_hh_t, b_i, b_hn


def _prep_gru_split(params, raw_dim):
    """Same as _prep_gru, but split W_ih^T rows into [raw | hidden] blocks."""
    w_ih_t, w_hh_t, b_i, b_hn = _prep_gru(params)
    return w_ih_t[:raw_dim], w_ih_t[raw_dim:], w_hh_t, b_i, b_hn


# ----------------------------------------------------------------------------
# GraphGRU forward (matches the PyTorch module's forward semantics).
# ----------------------------------------------------------------------------
@jax.jit
def graph_gru_forward(edges, node_fts, edge_fts, graph_ft, params):
    N, _ = node_fts.shape
    E, e_raw = edge_fts.shape
    _, g_raw = graph_ft.shape

    wih_n_t, whh_n_t, bi_n, bhn_n = _prep_gru(params["node"])
    H1 = whh_n_t.shape[0]
    wih_e_raw_t, wih_e_hid_t, whh_e_t, bi_e, bhn_e = _prep_gru_split(params["edge"], e_raw)
    H2 = whh_e_t.shape[0]
    wih_g_raw_t, wih_g_hid_t, whh_g_t, bi_g, bhn_g = _prep_gru_split(params["graph"], g_raw)
    H3 = whh_g_t.shape[0]

    edge_src = edges[:, 0].astype(jnp.int32)          # (E,) gather indices -> SMEM

    vmem = pl.BlockSpec(memory_space=pltpu.MemorySpace.VMEM)
    smem = pl.BlockSpec(memory_space=pltpu.MemorySpace.SMEM)

    node_hn, graph_hn = pl.pallas_call(
        _graph_gru_kernel,
        out_shape=(jax.ShapeDtypeStruct((1, H1), jnp.float32),
                   jax.ShapeDtypeStruct((1, H3), jnp.float32)),
        in_specs=[smem] + [vmem] * 17,
        out_specs=(vmem, vmem),
        scratch_shapes=[
            pltpu.VMEM((N, 3 * H1), jnp.float32),     # gi_node  (fused r|z|n)
            pltpu.VMEM((N, H1), jnp.float32),         # node_out
            pltpu.VMEM((E, H1), jnp.float32),         # gathered node hidden rows
            pltpu.VMEM((E, 3 * H2), jnp.float32),     # gi_edge
            pltpu.VMEM((E, H2), jnp.float32),         # edge_out
            pltpu.VMEM((E, 3 * H3), jnp.float32),     # gi_graph
        ],
    )(edge_src, node_fts, edge_fts, graph_ft,
      wih_n_t, whh_n_t, bi_n, bhn_n,
      wih_e_raw_t, wih_e_hid_t, whh_e_t, bi_e, bhn_e,
      wih_g_raw_t, wih_g_hid_t, whh_g_t, bi_g, bhn_g)
    return node_hn, graph_hn


# ----------------------------------------------------------------------------
# Parameter init (deterministic, mimics PyTorch nn.GRU uniform(-k, k), k=1/sqrt(H)).
# ----------------------------------------------------------------------------
def init_gru_params(key, input_size, hidden_size):
    k = 1.0 / jnp.sqrt(jnp.float32(hidden_size))
    k1, k2, k3, k4 = jax.random.split(key, 4)
    w_ih = jax.random.uniform(k1, (3 * hidden_size, input_size), jnp.float32, -k, k)
    w_hh = jax.random.uniform(k2, (3 * hidden_size, hidden_size), jnp.float32, -k, k)
    b_ih = jax.random.uniform(k3, (3 * hidden_size,), jnp.float32, -k, k)
    b_hh = jax.random.uniform(k4, (3 * hidden_size,), jnp.float32, -k, k)
    return (w_ih, w_hh, b_ih, b_hh)


# ----------------------------------------------------------------------------
# Pure-JAX reference (for correctness check of the fused Pallas kernel).
# ----------------------------------------------------------------------------
def gru_reference(x, params):
    w_ih, w_hh, b_ih, b_hh = params
    H = w_hh.shape[1]

    def step(h, x_t):
        gi = x_t @ w_ih.T + b_ih
        gh = h @ w_hh.T + b_hh
        r = jax.nn.sigmoid(gi[0:H] + gh[0:H])
        z = jax.nn.sigmoid(gi[H:2 * H] + gh[H:2 * H])
        n = jnp.tanh(gi[2 * H:3 * H] + r * gh[2 * H:3 * H])
        h_new = (1.0 - z) * n + z * h
        return h_new, h_new

    h0 = jnp.zeros((H,), jnp.float32)
    hT, ys = lax.scan(step, h0, x)
    return ys, hT.reshape(1, H)


def graph_gru_reference(edges, node_fts, edge_fts, graph_ft, params):
    node_out, node_hn = gru_reference(node_fts, params["node"])
    gathered = jnp.take(node_out, edges[:, 0], axis=0)
    edge_in = jnp.concatenate([edge_fts, gathered], axis=1)
    edge_out, _ = gru_reference(edge_in, params["edge"])
    graph_in = jnp.concatenate([graph_ft, edge_out], axis=1)
    _, graph_hn = gru_reference(graph_in, params["graph"])
    return node_hn, graph_hn


if __name__ == "__main__":
    # Small deterministic problem sizes.
    N = 16            # number of nodes
    E = 8             # number of edges
    IN1 = 8           # node feature dim  (input_size_1)
    H1 = 16           # hidden_size_1
    EDGE_RAW = 8      # raw edge feature dim
    IN2 = EDGE_RAW + H1   # input_size_2 (edge features ++ gathered node hidden)
    H2 = 16           # hidden_size_2
    GRAPH_RAW = 8     # raw graph feature dim (per edge row, as the PyTorch cat implies)
    IN3 = GRAPH_RAW + H2  # input_size_3
    H3 = 32           # hidden_size_3

    root = jax.random.PRNGKey(0)
    k_node, k_edge, k_graph, k_x1, k_x2, k_x3, k_e = jax.random.split(root, 7)

    params = {
        "node": init_gru_params(k_node, IN1, H1),
        "edge": init_gru_params(k_edge, IN2, H2),
        "graph": init_gru_params(k_graph, IN3, H3),
    }

    node_fts = jax.random.normal(k_x1, (N, IN1), jnp.float32)
    edge_fts = jax.random.normal(k_x2, (E, EDGE_RAW), jnp.float32)
    graph_ft = jax.random.normal(k_x3, (E, GRAPH_RAW), jnp.float32)
    edges = jax.random.randint(k_e, (E, 2), 0, N, jnp.int32)

    node_hn, graph_hn = graph_gru_forward(edges, node_fts, edge_fts, graph_ft, params)
    jax.block_until_ready((node_hn, graph_hn))

    ref_node_hn, ref_graph_hn = graph_gru_reference(edges, node_fts, edge_fts,
                                                    graph_ft, params)

    assert node_hn.shape == (1, H1) and graph_hn.shape == (1, H3)
    assert jnp.allclose(node_hn, ref_node_hn, rtol=2e-4, atol=2e-4)
    assert jnp.allclose(graph_hn, ref_graph_hn, rtol=2e-4, atol=2e-4)

    print("KERNEL_OK")
</pallas_src>

<mosaic_0001>
module attributes {stable_mosaic.version = 11 : i64} {
  func.func @_graph_gru_kernel(%arg0: memref<8xi32, #tpu.memory_space<smem>>, %arg1: memref<16x8xf32, #tpu.memory_space<vmem>>, %arg2: memref<8x8xf32, #tpu.memory_space<vmem>>, %arg3: memref<8x8xf32, #tpu.memory_space<vmem>>, %arg4: memref<8x48xf32, #tpu.memory_space<vmem>>, %arg5: memref<16x48xf32, #tpu.memory_space<vmem>>, %arg6: memref<1x48xf32, #tpu.memory_space<vmem>>, %arg7: memref<1x16xf32, #tpu.memory_space<vmem>>, %arg8: memref<8x48xf32, #tpu.memory_space<vmem>>, %arg9: memref<16x48xf32, #tpu.memory_space<vmem>>, %arg10: memref<16x48xf32, #tpu.memory_space<vmem>>, %arg11: memref<1x48xf32, #tpu.memory_space<vmem>>, %arg12: memref<1x16xf32, #tpu.memory_space<vmem>>, %arg13: memref<8x96xf32, #tpu.memory_space<vmem>>, %arg14: memref<16x96xf32, #tpu.memory_space<vmem>>, %arg15: memref<32x96xf32, #tpu.memory_space<vmem>>, %arg16: memref<1x96xf32, #tpu.memory_space<vmem>>, %arg17: memref<1x32xf32, #tpu.memory_space<vmem>>, %arg18: memref<1x16xf32, #tpu.memory_space<vmem>>, %arg19: memref<1x32xf32, #tpu.memory_space<vmem>>, %arg20: memref<16x48xf32, #tpu.memory_space<vmem>>, %arg21: memref<16x16xf32, #tpu.memory_space<vmem>>, %arg22: memref<8x16xf32, #tpu.memory_space<vmem>>, %arg23: memref<8x48xf32, #tpu.memory_space<vmem>>, %arg24: memref<8x16xf32, #tpu.memory_space<vmem>>, %arg25: memref<8x96xf32, #tpu.memory_space<vmem>>) attributes {dimension_semantics = [], scalar_prefetch = 0 : i64, scratch_operands = 6 : i64, tpu.core_type = #tpu.core_type<tc>} {
    %c0 = arith.constant 0 : index
    %c0_0 = arith.constant 0 : index
    %0 = vector.load %arg1[%c0, %c0_0] : memref<16x8xf32, #tpu.memory_space<vmem>>, vector<16x8xf32>
    %c0_1 = arith.constant 0 : index
    %c0_2 = arith.constant 0 : index
    %1 = vector.load %arg4[%c0_1, %c0_2] : memref<8x48xf32, #tpu.memory_space<vmem>>, vector<8x48xf32>
    %cst = arith.constant dense<0.000000e+00> : vector<16x48xf32>
    %2 = tpu.matmul %0, %1, %cst {dimension_numbers = #tpu.dot_dimension_numbers<[1], [0], [0], [1], [0, 0, 1, 1], [], []>} : vector<16x8xf32>, vector<8x48xf32>, vector<16x48xf32> -> vector<16x48xf32>
    %c0_3 = arith.constant 0 : index
    %c0_4 = arith.constant 0 : index
    %3 = vector.load %arg6[%c0_3, %c0_4] : memref<1x48xf32, #tpu.memory_space<vmem>>, vector<1x48xf32>
    %4 = vector.broadcast %3 : vector<1x48xf32> to vector<16x48xf32>
    %5 = arith.addf %2, %4 : vector<16x48xf32>
    %c0_5 = arith.constant 0 : index
    %c0_6 = arith.constant 0 : index
    %6 = vector.load %arg20[%c0_5, %c0_6] : memref<16x48xf32, #tpu.memory_space<vmem>>, vector<16x48xf32>
    tpu.vector_store %arg20[%c0_5, %c0_6], %5 {strides = array<i32>} : memref<16x48xf32, #tpu.memory_space<vmem>>, vector<16x48xf32>,
    %c0_7 = arith.constant 0 : index
    %c0_8 = arith.constant 0 : index
    %7 = vector.load %arg5[%c0_7, %c0_8] : memref<16x48xf32, #tpu.memory_space<vmem>>, vector<16x48xf32>
    %c0_9 = arith.constant 0 : index
    %c0_10 = arith.constant 0 : index
    %8 = vector.load %arg7[%c0_9, %c0_10] : memref<1x16xf32, #tpu.memory_space<vmem>>, vector<1x16xf32>
    %cst_11 = arith.constant 0.000000e+00 : f32
    %9 = vector.broadcast %cst_11 : f32 to vector<1x16xf32>
    %cst_12 = arith.constant dense<0.000000e+00> : vector<1x48xf32>
    %10 = tpu.matmul %9, %7, %cst_12 {dimension_numbers = #tpu.dot_dimension_numbers<[1], [0], [0], [1], [0, 0, 1, 1], [], []>} : vector<1x16xf32>, vector<16x48xf32>, vector<1x48xf32> -> vector<1x48xf32>
    %c0_13 = arith.constant 0 : index
    %c0_14 = arith.constant 0 : index
    %11 = vector.load %arg20[%c0_13, %c0_14] : memref<16x48xf32, #tpu.memory_space<vmem>>, vector<1x48xf32>
    %12 = vector.extract_strided_slice %11 {offsets = [0, 0], sizes = [1, 32], strides = [1, 1]} : vector<1x48xf32> to vector<1x32xf32>
    %13 = vector.extract_strided_slice %10 {offsets = [0, 0], sizes = [1, 32], strides = [1, 1]} : vector<1x48xf32> to vector<1x32xf32>
    %14 = arith.addf %12, %13 : vector<1x32xf32>
    %15 = arith.negf %14 : vector<1x32xf32>
    %16 = math.exp %15 : vector<1x32xf32>
    %cst_15 = arith.constant 1.000000e+00 : f32
    %17 = vector.broadcast %cst_15 : f32 to vector<1x32xf32>
    %18 = arith.addf %17, %16 : vector<1x32xf32>
    %19 = arith.divf %17, %18 : vector<1x32xf32>
    %20 = vector.extract_strided_slice %19 {offsets = [0, 0], sizes = [1, 16], strides = [1, 1]} : vector<1x32xf32> to vector<1x16xf32>
    %21 = vector.extract_strided_slice %19 {offsets = [0, 16], sizes = [1, 16], strides = [1, 1]} : vector<1x32xf32> to vector<1x16xf32>
    %22 = vector.extract_strided_slice %11 {offsets = [0, 32], sizes = [1, 16], strides = [1, 1]} : vector<1x48xf32> to vector<1x16xf32>
    %23 = vector.extract_strided_slice %10 {offsets = [0, 32], sizes = [1, 16], strides = [1, 1]} : vector<1x48xf32> to vector<1x16xf32>
    %24 = arith.addf %23, %8 : vector<1x16xf32>
    %25 = arith.mulf %20, %24 : vector<1x16xf32>
    %26 = arith.addf %22, %25 : vector<1x16xf32>
    %27 = math.tanh %26 : vector<1x16xf32>
    %cst_16 = arith.constant 1.000000e+00 : f32
    %28 = vector.broadcast %cst_16 : f32 to vector<1x16xf32>
    %29 = arith.subf %28, %21 : vector<1x16xf32>
    %30 = arith.mulf %29, %27 : vector<1x16xf32>
    %31 = arith.mulf %21, %9 : vector<1x16xf32>
    %32 = arith.addf %30, %31 : vector<1x16xf32>
    %c0_17 = arith.constant 0 : index
    %c0_18 = arith.constant 0 : index
    %33 = vector.load %arg21[%c0_17, %c0_18] : memref<16x16xf32, #tpu.memory_space<vmem>>, vector<1x16xf32>
    tpu.vector_store %arg21[%c0_17, %c0_18], %32 {strides = array<i32>} : memref<16x16xf32, #tpu.memory_space<vmem>>, vector<1x16xf32>,
    %cst_19 = arith.constant dense<0.000000e+00> : vector<1x48xf32>
    %34 = tpu.matmul %32, %7, %cst_19 {dimension_numbers = #tpu.dot_dimension_numbers<[1], [0], [0], [1], [0, 0, 1, 1], [], []>} : vector<1x16xf32>, vector<16x48xf32>, vector<1x48xf32> -> vector<1x48xf32>
    %c1 = arith.constant 1 : index
    %c0_20 = arith.constant 0 : index
    %35 = vector.load %arg20[%c1, %c0_20] : memref<16x48xf32, #tpu.memory_space<vmem>>, vector<1x48xf32>
    %36 = vector.extract_strided_slice %35 {offsets = [0, 0], sizes = [1, 32], strides = [1, 1]} : vector<1x48xf32> to vector<1x32xf32>
    %37 = vector.extract_strided_slice %34 {offsets = [0, 0], sizes = [1, 32], strides = [1, 1]} : vector<1x48xf32> to vector<1x32xf32>
    %38 = arith.addf %36, %37 : vector<1x32xf32>
    %39 = arith.negf %38 : vector<1x32xf32>
    %40 = math.exp %39 : vector<1x32xf32>
    %cst_21 = arith.constant 1.000000e+00 : f32
    %41 = vector.broadcast %cst_21 : f32 to vector<1x32xf32>
    %42 = arith.addf %41, %40 : vector<1x32xf32>
    %43 = arith.divf %41, %42 : vector<1x32xf32>
    %44 = vector.extract_strided_slice %43 {offsets = [0, 0], sizes = [1, 16], strides = [1, 1]} : vector<1x32xf32> to vector<1x16xf32>
    %45 = vector.extract_strided_slice %43 {offsets = [0, 16], sizes = [1, 16], strides = [1, 1]} : vector<1x32xf32> to vector<1x16xf32>
    %46 = vector.extract_strided_slice %35 {offsets = [0, 32], sizes = [1, 16], strides = [1, 1]} : vector<1x48xf32> to vector<1x16xf32>
    %47 = vector.extract_strided_slice %34 {offsets = [0, 32], sizes = [1, 16], strides = [1, 1]} : vector<1x48xf32> to vector<1x16xf32>
    %48 = arith.addf %47, %8 : vector<1x16xf32>
    %49 = arith.mulf %44, %48 : vector<1x16xf32>
    %50 = arith.addf %46, %49 : vector<1x16xf32>
    %51 = math.tanh %50 : vector<1x16xf32>
    %cst_22 = arith.constant 1.000000e+00 : f32
    %52 = vector.broadcast %cst_22 : f32 to vector<1x16xf32>
    %53 = arith.subf %52, %45 : vector<1x16xf32>
    %54 = arith.mulf %53, %51 : vector<1x16xf32>
    %55 = arith.mulf %45, %32 : vector<1x16xf32>
    %56 = arith.addf %54, %55 : vector<1x16xf32>
    %c1_23 = arith.constant 1 : index
    %c0_24 = arith.constant 0 : index
    %57 = vector.load %arg21[%c1_23, %c0_24] : memref<16x16xf32, #tpu.memory_space<vmem>>, vector<1x16xf32>
    tpu.vector_store %arg21[%c1_23, %c0_24], %56 {strides = array<i32>} : memref<16x16xf32, #tpu.memory_space<vmem>>, vector<1x16xf32>,
    %cst_25 = arith.constant dense<0.000000e+00> : vector<1x48xf32>
    %58 = tpu.matmul %56, %7, %cst_25 {dimension_numbers = #tpu.dot_dimension_numbers<[1], [0], [0], [1], [0, 0, 1, 1], [], []>} : vector<1x16xf32>, vector<16x48xf32>, vector<1x48xf32> -> vector<1x48xf32>
    %c2 = arith.constant 2 : index
    %c0_26 = arith.constant 0 : index
    %59 = vector.load %arg20[%c2, %c0_26] : memref<16x48xf32, #tpu.memory_space<vmem>>, vector<1x48xf32>
    %60 = vector.extract_strided_slice %59 {offsets = [0, 0], sizes = [1, 32], strides = [1, 1]} : vector<1x48xf32> to vector<1x32xf32>
    %61 = vector.extract_strided_slice %58 {offsets = [0, 0], sizes = [1, 32], strides = [1, 1]} : vector<1x48xf32> to vector<1x32xf32>
    %62 = arith.addf %60, %61 : vector<1x32xf32>
    %63 = arith.negf %62 : vector<1x32xf32>
    %64 = math.exp %63 : vector<1x32xf32>
    %cst_27 = arith.constant 1.000000e+00 : f32
    %65 = vector.broadcast %cst_27 : f32 to vector<1x32xf32>
    %66 = arith.addf %65, %64 : vector<1x32xf32>
    %67 = arith.divf %65, %66 : vector<1x32xf32>
    %68 = vector.extract_strided_slice %67 {offsets = [0, 0], sizes = [1, 16], strides = [1, 1]} : vector<1x32xf32> to vector<1x16xf32>
    %69 = vector.extract_strided_slice %67 {offsets = [0, 16], sizes = [1, 16], strides = [1, 1]} : vector<1x32xf32> to vector<1x16xf32>
    %70 = vector.extract_strided_slice %59 {offsets = [0, 32], sizes = [1, 16], strides = [1, 1]} : vector<1x48xf32> to vector<1x16xf32>
    %71 = vector.extract_strided_slice %58 {offsets = [0, 32], sizes = [1, 16], strides = [1, 1]} : vector<1x48xf32> to vector<1x16xf32>
    %72 = arith.addf %71, %8 : vector<1x16xf32>
    %73 = arith.mulf %68, %72 : vector<1x16xf32>
    %74 = arith.addf %70, %73 : vector<1x16xf32>
    %75 = math.tanh %74 : vector<1x16xf32>
    %cst_28 = arith.constant 1.000000e+00 : f32
    %76 = vector.broadcast %cst_28 : f32 to vector<1x16xf32>
    %77 = arith.subf %76, %69 : vector<1x16xf32>
    %78 = arith.mulf %77, %75 : vector<1x16xf32>
    %79 = arith.mulf %69, %56 : vector<1x16xf32>
    %80 = arith.addf %78, %79 : vector<1x16xf32>
    %c2_29 = arith.constant 2 : index
    %c0_30 = arith.constant 0 : index
    %81 = vector.load %arg21[%c2_29, %c0_30] : memref<16x16xf32, #tpu.memory_space<vmem>>, vector<1x16xf32>
    tpu.vector_store %arg21[%c2_29, %c0_30], %80 {strides = array<i32>} : memref<16x16xf32, #tpu.memory_space<vmem>>, vector<1x16xf32>,
    %cst_31 = arith.constant dense<0.000000e+00> : vector<1x48xf32>
    %82 = tpu.matmul %80, %7, %cst_31 {dimension_numbers = #tpu.dot_dimension_numbers<[1], [0], [0], [1], [0, 0, 1, 1], [], []>} : vector<1x16xf32>, vector<16x48xf32>, vector<1x48xf32> -> vector<1x48xf32>
    %c3 = arith.constant 3 : index
    %c0_32 = arith.constant 0 : index
    %83 = vector.load %arg20[%c3, %c0_32] : memref<16x48xf32, #tpu.memory_space<vmem>>, vector<1x48xf32>
    %84 = vector.extract_strided_slice %83 {offsets = [0, 0], sizes = [1, 32], strides = [1, 1]} : vector<1x48xf32> to vector<1x32xf32>
    %85 = vector.extract_strided_slice %82 {offsets = [0, 0], sizes = [1, 32], strides = [1, 1]} : vector<1x48xf32> to vector<1x32xf32>
    %86 = arith.addf %84, %85 : vector<1x32xf32>
    %87 = arith.negf %86 : vector<1x32xf32>
    %88 = math.exp %87 : vector<1x32xf32>
    %cst_33 = arith.constant 1.000000e+00 : f32
    %89 = vector.broadcast %cst_33 : f32 to vector<1x32xf32>
    %90 = arith.addf %89, %88 : vector<1x32xf32>
    %91 = arith.divf %89, %90 : vector<1x32xf32>
    %92 = vector.extract_strided_slice %91 {offsets = [0, 0], sizes = [1, 16], strides = [1, 1]} : vector<1x32xf32> to vector<1x16xf32>
    %93 = vector.extract_strided_slice %91 {offsets = [0, 16], sizes = [1, 16], strides = [1, 1]} : vector<1x32xf32> to vector<1x16xf32>
    %94 = vector.extract_strided_slice %83 {offsets = [0, 32], sizes = [1, 16], strides = [1, 1]} : vector<1x48xf32> to vector<1x16xf32>
    %95 = vector.extract_strided_slice %82 {offsets = [0, 32], sizes = [1, 16], strides = [1, 1]} : vector<1x48xf32> to vector<1x16xf32>
    %96 = arith.addf %95, %8 : vector<1x16xf32>
    %97 = arith.mulf %92, %96 : vector<1x16xf32>
    %98 = arith.addf %94, %97 : vector<1x16xf32>
    %99 = math.tanh %98 : vector<1x16xf32>
    %cst_34 = arith.constant 1.000000e+00 : f32
    %100 = vector.broadcast %cst_34 : f32 to vector<1x16xf32>
    %101 = arith.subf %100, %93 : vector<1x16xf32>
    %102 = arith.mulf %101, %99 : vector<1x16xf32>
    %103 = arith.mulf %93, %80 : vector<1x16xf32>
    %104 = arith.addf %102, %103 : vector<1x16xf32>
    %c3_35 = arith.constant 3 : index
    %c0_36 = arith.constant 0 : index
    %105 = vector.load %arg21[%c3_35, %c0_36] : memref<16x16xf32, #tpu.memory_space<vmem>>, vector<1x16xf32>
    tpu.vector_store %arg21[%c3_35, %c0_36], %104 {strides = array<i32>} : memref<16x16xf32, #tpu.memory_space<vmem>>, vector<1x16xf32>,
    %cst_37 = arith.constant dense<0.000000e+00> : vector<1x48xf32>
    %106 = tpu.matmul %104, %7, %cst_37 {dimension_numbers = #tpu.dot_dimension_numbers<[1], [0], [0], [1], [0, 0, 1, 1], [], []>} : vector<1x16xf32>, vector<16x48xf32>, vector<1x48xf32> -> vector<1x48xf32>
    %c4 = arith.constant 4 : index
    %c0_38 = arith.constant 0 : index
    %107 = vector.load %arg20[%c4, %c0_38] : memref<16x48xf32, #tpu.memory_space<vmem>>, vector<1x48xf32>
    %108 = vector.extract_strided_slice %107 {offsets = [0, 0], sizes = [1, 32], strides = [1, 1]} : vector<1x48xf32> to vector<1x32xf32>
    %109 = vector.extract_strided_slice %106 {offsets = [0, 0], sizes = [1, 32], strides = [1, 1]} : vector<1x48xf32> to vector<1x32xf32>
    %110 = arith.addf %108, %109 : vector<1x32xf32>
    %111 = arith.negf %110 : vector<1x32xf32>
    %112 = math.exp %111 : vector<1x32xf32>
    %cst_39 = arith.constant 1.000000e+00 : f32
    %113 = vector.broadcast %cst_39 : f32 to vector<1x32xf32>
    %114 = arith.addf %113, %112 : vector<1x32xf32>
    %115 = arith.divf %113, %114 : vector<1x32xf32>
    %116 = vector.extract_strided_slice %115 {offsets = [0, 0], sizes = [1, 16], strides = [1, 1]} : vector<1x32xf32> to vector<1x16xf32>
    %117 = vector.extract_strided_slice %115 {offsets = [0, 16], sizes = [1, 16], strides = [1, 1]} : vector<1x32xf32> to vector<1x16xf32>
    %118 = vector.extract_strided_slice %107 {offsets = [0, 32], sizes = [1, 16], strides = [1, 1]} : vector<1x48xf32> to vector<1x16xf32>
    %119 = vector.extract_strided_slice %106 {offsets = [0, 32], sizes = [1, 16], strides = [1, 1]} : vector<1x48xf32> to vector<1x16xf32>
    %120 = arith.addf %119, %8 : vector<1x16xf32>
    %121 = arith.mulf %116, %120 : vector<1x16xf32>
    %122 = arith.addf %118, %121 : vector<1x16xf32>
    %123 = math.tanh %122 : vector<1x16xf32>
    %cst_40 = arith.constant 1.000000e+00 : f32
    %124 = vector.broadcast %cst_40 : f32 to vector<1x16xf32>
    %125 = arith.subf %124, %117 : vector<1x16xf32>
    %126 = arith.mulf %125, %123 : vector<1x16xf32>
    %127 = arith.mulf %117, %104 : vector<1x16xf32>
    %128 = arith.addf %126, %127 : vector<1x16xf32>
    %c4_41 = arith.constant 4 : index
    %c0_42 = arith.constant 0 : index
    %129 = vector.load %arg21[%c4_41, %c0_42] : memref<16x16xf32, #tpu.memory_space<vmem>>, vector<1x16xf32>
    tpu.vector_store %arg21[%c4_41, %c0_42], %128 {strides = array<i32>} : memref<16x16xf32, #tpu.memory_space<vmem>>, vector<1x16xf32>,
    %cst_43 = arith.constant dense<0.000000e+00> : vector<1x48xf32>
    %130 = tpu.matmul %128, %7, %cst_43 {dimension_numbers = #tpu.dot_dimension_numbers<[1], [0], [0], [1], [0, 0, 1, 1], [], []>} : vector<1x16xf32>, vector<16x48xf32>, vector<1x48xf32> -> vector<1x48xf32>
    %c5 = arith.constant 5 : index
    %c0_44 = arith.constant 0 : index
    %131 = vector.load %arg20[%c5, %c0_44] : memref<16x48xf32, #tpu.memory_space<vmem>>, vector<1x48xf32>
    %132 = vector.extract_strided_slice %131 {offsets = [0, 0], sizes = [1, 32], strides = [1, 1]} : vector<1x48xf32> to vector<1x32xf32>
    %133 = vector.extract_strided_slice %130 {offsets = [0, 0], sizes = [1, 32], strides = [1, 1]} : vector<1x48xf32> to vector<1x32xf32>
    %134 = arith.addf %132, %133 : vector<1x32xf32>
    %135 = arith.negf %134 : vector<1x32xf32>
    %136 = math.exp %135 : vector<1x32xf32>
    %cst_45 = arith.constant 1.000000e+00 : f32
    %137 = vector.broadcast %cst_45 : f32 to vector<1x32xf32>
    %138 = arith.addf %137, %136 : vector<1x32xf32>
    %139 = arith.divf %137, %138 : vector<1x32xf32>
    %140 = vector.extract_strided_slice %139 {offsets = [0, 0], sizes = [1, 16], strides = [1, 1]} : vector<1x32xf32> to vector<1x16xf32>
    %141 = vector.extract_strided_slice %139 {offsets = [0, 16], sizes = [1, 16], strides = [1, 1]} : vector<1x32xf32> to vector<1x16xf32>
    %142 = vector.extract_strided_slice %131 {offsets = [0, 32], sizes = [1, 16], strides = [1, 1]} : vector<1x48xf32> to vector<1x16xf32>
    %143 = vector.extract_strided_slice %130 {offsets = [0, 32], sizes = [1, 16], strides = [1, 1]} : vector<1x48xf32> to vector<1x16xf32>
    %144 = arith.addf %143, %8 : vector<1x16xf32>
    %145 = arith.mulf %140, %144 : vector<1x16xf32>
    %146 = arith.addf %142, %145 : vector<1x16xf32>
    %147 = math.tanh %146 : vector<1x16xf32>
    %cst_46 = arith.constant 1.000000e+00 : f32
    %148 = vector.broadcast %cst_46 : f32 to vector<1x16xf32>
    %149 = arith.subf %148, %141 : vector<1x16xf32>
    %150 = arith.mulf %149, %147 : vector<1x16xf32>
    %151 = arith.mulf %141, %128 : vector<1x16xf32>
    %152 = arith.addf %150, %151 : vector<1x16xf32>
    %c5_47 = arith.constant 5 : index
    %c0_48 = arith.constant 0 : index
    %153 = vector.load %arg21[%c5_47, %c0_48] : memref<16x16xf32, #tpu.memory_space<vmem>>, vector<1x16xf32>
    tpu.vector_store %arg21[%c5_47, %c0_48], %152 {strides = array<i32>} : memref<16x16xf32, #tpu.memory_space<vmem>>, vector<1x16xf32>,
    %cst_49 = arith.constant dense<0.000000e+00> : vector<1x48xf32>
    %154 = tpu.matmul %152, %7, %cst_49 {dimension_numbers = #tpu.dot_dimension_numbers<[1], [0], [0], [1], [0, 0, 1, 1], [], []>} : vector<1x16xf32>, vector<16x48xf32>, vector<1x48xf32> -> vector<1x48xf32>
    %c6 = arith.constant 6 : index
    %c0_50 = arith.constant 0 : index
    %155 = vector.load %arg20[%c6, %c0_50] : memref<16x48xf32, #tpu.memory_space<vmem>>, vector<1x48xf32>
    %156 = vector.extract_strided_slice %155 {offsets = [0, 0], sizes = [1, 32], strides = [1, 1]} : vector<1x48xf32> to vector<1x32xf32>
    %157 = vector.extract_strided_slice %154 {offsets = [0, 0], sizes = [1, 32], strides = [1, 1]} : vector<1x48xf32> to vector<1x32xf32>
    %158 = arith.addf %156, %157 : vector<1x32xf32>
    %159 = arith.negf %158 : vector<1x32xf32>
    %160 = math.exp %159 : vector<1x32xf32>
    %cst_51 = arith.constant 1.000000e+00 : f32
    %161 = vector.broadcast %cst_51 : f32 to vector<1x32xf32>
    %162 = arith.addf %161, %160 : vector<1x32xf32>
    %163 = arith.divf %161, %162 : vector<1x32xf32>
    %164 = vector.extract_strided_slice %163 {offsets = [0, 0], sizes = [1, 16], strides = [1, 1]} : vector<1x32xf32> to vector<1x16xf32>
    %165 = vector.extract_strided_slice %163 {offsets = [0, 16], sizes = [1, 16], strides = [1, 1]} : vector<1x32xf32> to vector<1x16xf32>
    %166 = vector.extract_strided_slice %155 {offsets = [0, 32], sizes = [1, 16], strides = [1, 1]} : vector<1x48xf32> to vector<1x16xf32>
    %167 = vector.extract_strided_slice %154 {offsets = [0, 32], sizes = [1, 16], strides = [1, 1]} : vector<1x48xf32> to vector<1x16xf32>
    %168 = arith.addf %167, %8 : vector<1x16xf32>
    %169 = arith.mulf %164, %168 : vector<1x16xf32>
    %170 = arith.addf %166, %169 : vector<1x16xf32>
    %171 = math.tanh %170 : vector<1x16xf32>
    %cst_52 = arith.constant 1.000000e+00 : f32
    %172 = vector.broadcast %cst_52 : f32 to vector<1x16xf32>
    %173 = arith.subf %172, %165 : vector<1x16xf32>
    %174 = arith.mulf %173, %171 : vector<1x16xf32>
    %175 = arith.mulf %165, %152 : vector<1x16xf32>
    %176 = arith.addf %174, %175 : vector<1x16xf32>
    %c6_53 = arith.constant 6 : index
    %c0_54 = arith.constant 0 : index
    %177 = vector.load %arg21[%c6_53, %c0_54] : memref<16x16xf32, #tpu.memory_space<vmem>>, vector<1x16xf32>
    tpu.vector_store %arg21[%c6_53, %c0_54], %176 {strides = array<i32>} : memref<16x16xf32, #tpu.memory_space<vmem>>, vector<1x16xf32>,
    %cst_55 = arith.constant dense<0.000000e+00> : vector<1x48xf32>
    %178 = tpu.matmul %176, %7, %cst_55 {dimension_numbers = #tpu.dot_dimension_numbers<[1], [0], [0], [1], [0, 0, 1, 1], [], []>} : vector<1x16xf32>, vector<16x48xf32>, vector<1x48xf32> -> vector<1x48xf32>
    %c7 = arith.constant 7 : index
    %c0_56 = arith.constant 0 : index
    %179 = vector.load %arg20[%c7, %c0_56] : memref<16x48xf32, #tpu.memory_space<vmem>>, vector<1x48xf32>
    %180 = vector.extract_strided_slice %179 {offsets = [0, 0], sizes = [1, 32], strides = [1, 1]} : vector<1x48xf32> to vector<1x32xf32>
    %181 = vector.extract_strided_slice %178 {offsets = [0, 0], sizes = [1, 32], strides = [1, 1]} : vector<1x48xf32> to vector<1x32xf32>
    %182 = arith.addf %180, %181 : vector<1x32xf32>
    %183 = arith.negf %182 : vector<1x32xf32>
    %184 = math.exp %183 : vector<1x32xf32>
    %cst_57 = arith.constant 1.000000e+00 : f32
    %185 = vector.broadcast %cst_57 : f32 to vector<1x32xf32>
    %186 = arith.addf %185, %184 : vector<1x32xf32>
    %187 = arith.divf %185, %186 : vector<1x32xf32>
    %188 = vector.extract_strided_slice %187 {offsets = [0, 0], sizes = [1, 16], strides = [1, 1]} : vector<1x32xf32> to vector<1x16xf32>
    %189 = vector.extract_strided_slice %187 {offsets = [0, 16], sizes = [1, 16], strides = [1, 1]} : vector<1x32xf32> to vector<1x16xf32>
    %190 = vector.extract_strided_slice %179 {offsets = [0, 32], sizes = [1, 16], strides = [1, 1]} : vector<1x48xf32> to vector<1x16xf32>
    %191 = vector.extract_strided_slice %178 {offsets = [0, 32], sizes = [1, 16], strides = [1, 1]} : vector<1x48xf32> to vector<1x16xf32>
    %192 = arith.addf %191, %8 : vector<1x16xf32>
    %193 = arith.mulf %188, %192 : vector<1x16xf32>
    %194 = arith.addf %190, %193 : vector<1x16xf32>
    %195 = math.tanh %194 : vector<1x16xf32>
    %cst_58 = arith.constant 1.000000e+00 : f32
    %196 = vector.broadcast %cst_58 : f32 to vector<1x16xf32>
    %197 = arith.subf %196, %189 : vector<1x16xf32>
    %198 = arith.mulf %197, %195 : vector<1x16xf32>
    %199 = arith.mulf %189, %176 : vector<1x16xf32>
    %200 = arith.addf %198, %199 : vector<1x16xf32>
    %c7_59 = arith.constant 7 : index
    %c0_60 = arith.constant 0 : index
    %201 = vector.load %arg21[%c7_59, %c0_60] : memref<16x16xf32, #tpu.memory_space<vmem>>, vector<1x16xf32>
    tpu.vector_store %arg21[%c7_59, %c0_60], %200 {strides = array<i32>} : memref<16x16xf32, #tpu.memory_space<vmem>>, vector<1x16xf32>,
    %cst_61 = arith.constant dense<0.000000e+00> : vector<1x48xf32>
    %202 = tpu.matmul %200, %7, %cst_61 {dimension_numbers = #tpu.dot_dimension_numbers<[1], [0], [0], [1], [0, 0, 1, 1], [], []>} : vector<1x16xf32>, vector<16x48xf32>, vector<1x48xf32> -> vector<1x48xf32>
    %c8 = arith.constant 8 : index
    %c0_62 = arith.constant 0 : index
    %203 = vector.load %arg20[%c8, %c0_62] : memref<16x48xf32, #tpu.memory_space<vmem>>, vector<1x48xf32>
    %204 = vector.extract_strided_slice %203 {offsets = [0, 0], sizes = [1, 32], strides = [1, 1]} : vector<1x48xf32> to vector<1x32xf32>
    %205 = vector.extract_strided_slice %202 {offsets = [0, 0], sizes = [1, 32], strides = [1, 1]} : vector<1x48xf32> to vector<1x32xf32>
    %206 = arith.addf %204, %205 : vector<1x32xf32>
    %207 = arith.negf %206 : vector<1x32xf32>
    %208 = math.exp %207 : vector<1x32xf32>
    %cst_63 = arith.constant 1.000000e+00 : f32
    %209 = vector.broadcast %cst_63 : f32 to vector<1x32xf32>
    %210 = arith.addf %209, %208 : vector<1x32xf32>
    %211 = arith.divf %209, %210 : vector<1x32xf32>
    %212 = vector.extract_strided_slice %211 {offsets = [0, 0], sizes = [1, 16], strides = [1, 1]} : vector<1x32xf32> to vector<1x16xf32>
    %213 = vector.extract_strided_slice %211 {offsets = [0, 16], sizes = [1, 16], strides = [1, 1]} : vector<1x32xf32> to vector<1x16xf32>
    %214 = vector.extract_strided_slice %203 {offsets = [0, 32], sizes = [1, 16], strides = [1, 1]} : vector<1x48xf32> to vector<1x16xf32>
    %215 = vector.extract_strided_slice %202 {offsets = [0, 32], sizes = [1, 16], strides = [1, 1]} : vector<1x48xf32> to vector<1x16xf32>
    %216 = arith.addf %215, %8 : vector<1x16xf32>
    %217 = arith.mulf %212, %216 : vector<1x16xf32>
    %218 = arith.addf %214, %217 : vector<1x16xf32>
    %219 = math.tanh %218 : vector<1x16xf32>
    %cst_64 = arith.constant 1.000000e+00 : f32
    %220 = vector.broadcast %cst_64 : f32 to vector<1x16xf32>
    %221 = arith.subf %220, %213 : vector<1x16xf32>
    %222 = arith.mulf %221, %219 : vector<1x16xf32>
    %223 = arith.mulf %213, %200 : vector<1x16xf32>
    %224 = arith.addf %222, %223 : vector<1x16xf32>
    %c8_65 = arith.constant 8 : index
    %c0_66 = arith.constant 0 : index
    %225 = vector.load %arg21[%c8_65, %c0_66] : memref<16x16xf32, #tpu.memory_space<vmem>>, vector<1x16xf32>
    tpu.vector_store %arg21[%c8_65, %c0_66], %224 {strides = array<i32>} : memref<16x16xf32, #tpu.memory_space<vmem>>, vector<1x16xf32>,
    %cst_67 = arith.constant dense<0.000000e+00> : vector<1x48xf32>
    %226 = tpu.matmul %224, %7, %cst_67 {dimension_numbers = #tpu.dot_dimension_numbers<[1], [0], [0], [1], [0, 0, 1, 1], [], []>} : vector<1x16xf32>, vector<16x48xf32>, vector<1x48xf32> -> vector<1x48xf32>
    %c9 = arith.constant 9 : index
    %c0_68 = arith.constant 0 : index
    %227 = vector.load %arg20[%c9, %c0_68] : memref<16x48xf32, #tpu.memory_space<vmem>>, vector<1x48xf32>
    %228 = vector.extract_strided_slice %227 {offsets = [0, 0], sizes = [1, 32], strides = [1, 1]} : vector<1x48xf32> to vector<1x32xf32>
    %229 = vector.extract_strided_slice %226 {offsets = [0, 0], sizes = [1, 32], strides = [1, 1]} : vector<1x48xf32> to vector<1x32xf32>
    %230 = arith.addf %228, %229 : vector<1x32xf32>
    %231 = arith.negf %230 : vector<1x32xf32>
    %232 = math.exp %231 : vector<1x32xf32>
    %cst_69 = arith.constant 1.000000e+00 : f32
    %233 = vector.broadcast %cst_69 : f32 to vector<1x32xf32>
    %234 = arith.addf %233, %232 : vector<1x32xf32>
    %235 = arith.divf %233, %234 : vector<1x32xf32>
    %236 = vector.extract_strided_slice %235 {offsets = [0, 0], sizes = [1, 16], strides = [1, 1]} : vector<1x32xf32> to vector<1x16xf32>
    %237 = vector.extract_strided_slice %235 {offsets = [0, 16], sizes = [1, 16], strides = [1, 1]} : vector<1x32xf32> to vector<1x16xf32>
    %238 = vector.extract_strided_slice %227 {offsets = [0, 32], sizes = [1, 16], strides = [1, 1]} : vector<1x48xf32> to vector<1x16xf32>
    %239 = vector.extract_strided_slice %226 {offsets = [0, 32], sizes = [1, 16], strides = [1, 1]} : vector<1x48xf32> to vector<1x16xf32>
    %240 = arith.addf %239, %8 : vector<1x16xf32>
    %241 = arith.mulf %236, %240 : vector<1x16xf32>
    %242 = arith.addf %238, %241 : vector<1x16xf32>
    %243 = math.tanh %242 : vector<1x16xf32>
    %cst_70 = arith.constant 1.000000e+00 : f32
    %244 = vector.broadcast %cst_70 : f32 to vector<1x16xf32>
    %245 = arith.subf %244, %237 : vector<1x16xf32>
    %246 = arith.mulf %245, %243 : vector<1x16xf32>
    %247 = arith.mulf %237, %224 : vector<1x16xf32>
    %248 = arith.addf %246, %247 : vector<1x16xf32>
    %c9_71 = arith.constant 9 : index
    %c0_72 = arith.constant 0 : index
    %249 = vector.load %arg21[%c9_71, %c0_72] : memref<16x16xf32, #tpu.memory_space<vmem>>, vector<1x16xf32>
    tpu.vector_store %arg21[%c9_71, %c0_72], %248 {strides = array<i32>} : memref<16x16xf32, #tpu.memory_space<vmem>>, vector<1x16xf32>,
    %cst_73 = arith.constant dense<0.000000e+00> : vector<1x48xf32>
    %250 = tpu.matmul %248, %7, %cst_73 {dimension_numbers = #tpu.dot_dimension_numbers<[1], [0], [0], [1], [0, 0, 1, 1], [], []>} : vector<1x16xf32>, vector<16x48xf32>, vector<1x48xf32> -> vector<1x48xf32>
    %c10 = arith.constant 10 : index
    %c0_74 = arith.constant 0 : index
    %251 = vector.load %arg20[%c10, %c0_74] : memref<16x48xf32, #tpu.memory_space<vmem>>, vector<1x48xf32>
    %252 = vector.extract_strided_slice %251 {offsets = [0, 0], sizes = [1, 32], strides = [1, 1]} : vector<1x48xf32> to vector<1x32xf32>
    %253 = vector.extract_strided_slice %250 {offsets = [0, 0], sizes = [1, 32], strides = [1, 1]} : vector<1x48xf32> to vector<1x32xf32>
    %254 = arith.addf %252, %253 : vector<1x32xf32>
    %255 = arith.negf %254 : vector<1x32xf32>
    %256 = math.exp %255 : vector<1x32xf32>
    %cst_75 = arith.constant 1.000000e+00 : f32
    %257 = vector.broadcast %cst_75 : f32 to vector<1x32xf32>
    %258 = arith.addf %257, %256 : vector<1x32xf32>
    %259 = arith.divf %257, %258 : vector<1x32xf32>
    %260 = vector.extract_strided_slice %259 {offsets = [0, 0], sizes = [1, 16], strides = [1, 1]} : vector<1x32xf32> to vector<1x16xf32>
    %261 = vector.extract_strided_slice %259 {offsets = [0, 16], sizes = [1, 16], strides = [1, 1]} : vector<1x32xf32> to vector<1x16xf32>
    %262 = vector.extract_strided_slice %251 {offsets = [0, 32], sizes = [1, 16], strides = [1, 1]} : vector<1x48xf32> to vector<1x16xf32>
    %263 = vector.extract_strided_slice %250 {offsets = [0, 32], sizes = [1, 16], strides = [1, 1]} : vector<1x48xf32> to vector<1x16xf32>
    %264 = arith.addf %263, %8 : vector<1x16xf32>
    %265 = arith.mulf %260, %264 : vector<1x16xf32>
    %266 = arith.addf %262, %265 : vector<1x16xf32>
    %267 = math.tanh %266 : vector<1x16xf32>
    %cst_76 = arith.constant 1.000000e+00 : f32
    %268 = vector.broadcast %cst_76 : f32 to vector<1x16xf32>
    %269 = arith.subf %268, %261 : vector<1x16xf32>
    %270 = arith.mulf %269, %267 : vector<1x16xf32>
    %271 = arith.mulf %261, %248 : vector<1x16xf32>
    %272 = arith.addf %270, %271 : vector<1x16xf32>
    %c10_77 = arith.constant 10 : index
    %c0_78 = arith.constant 0 : index
    %273 = vector.load %arg21[%c10_77, %c0_78] : memref<16x16xf32, #tpu.memory_space<vmem>>, vector<1x16xf32>
    tpu.vector_store %arg21[%c10_77, %c0_78], %272 {strides = array<i32>} : memref<16x16xf32, #tpu.memory_space<vmem>>, vector<1x16xf32>,
    %cst_79 = arith.constant dense<0.000000e+00> : vector<1x48xf32>
    %274 = tpu.matmul %272, %7, %cst_79 {dimension_numbers = #tpu.dot_dimension_numbers<[1], [0], [0], [1], [0, 0, 1, 1], [], []>} : vector<1x16xf32>, vector<16x48xf32>, vector<1x48xf32> -> vector<1x48xf32>
    %c11 = arith.constant 11 : index
    %c0_80 = arith.constant 0 : index
    %275 = vector.load %arg20[%c11, %c0_80] : memref<16x48xf32, #tpu.memory_space<vmem>>, vector<1x48xf32>
    %276 = vector.extract_strided_slice %275 {offsets = [0, 0], sizes = [1, 32], strides = [1, 1]} : vector<1x48xf32> to vector<1x32xf32>
    %277 = vector.extract_strided_slice %274 {offsets = [0, 0], sizes = [1, 32], strides = [1, 1]} : vector<1x48xf32> to vector<1x32xf32>
    %278 = arith.addf %276, %277 : vector<1x32xf32>
    %279 = arith.negf %278 : vector<1x32xf32>
    %280 = math.exp %279 : vector<1x32xf32>
    %cst_81 = arith.constant 1.000000e+00 : f32
    %281 = vector.broadcast %cst_81 : f32 to vector<1x32xf32>
    %282 = arith.addf %281, %280 : vector<1x32xf32>
    %283 = arith.divf %281, %282 : vector<1x32xf32>
    %284 = vector.extract_strided_slice %283 {offsets = [0, 0], sizes = [1, 16], strides = [1, 1]} : vector<1x32xf32> to vector<1x16xf32>
    %285 = vector.extract_strided_slice %283 {offsets = [0, 16], sizes = [1, 16], strides = [1, 1]} : vector<1x32xf32> to vector<1x16xf32>
    %286 = vector.extract_strided_slice %275 {offsets = [0, 32], sizes = [1, 16], strides = [1, 1]} : vector<1x48xf32> to vector<1x16xf32>
    %287 = vector.extract_strided_slice %274 {offsets = [0, 32], sizes = [1, 16], strides = [1, 1]} : vector<1x48xf32> to vector<1x16xf32>
    %288 = arith.addf %287, %8 : vector<1x16xf32>
    %289 = arith.mulf %284, %288 : vector<1x16xf32>
    %290 = arith.addf %286, %289 : vector<1x16xf32>
    %291 = math.tanh %290 : vector<1x16xf32>
    %cst_82 = arith.constant 1.000000e+00 : f32
    %292 = vector.broadcast %cst_82 : f32 to vector<1x16xf32>
    %293 = arith.subf %292, %285 : vector<1x16xf32>
    %294 = arith.mulf %293, %291 : vector<1x16xf32>
    %295 = arith.mulf %285, %272 : vector<1x16xf32>
    %296 = arith.addf %294, %295 : vector<1x16xf32>
    %c11_83 = arith.constant 11 : index
    %c0_84 = arith.constant 0 : index
    %297 = vector.load %arg21[%c11_83, %c0_84] : memref<16x16xf32, #tpu.memory_space<vmem>>, vector<1x16xf32>
    tpu.vector_store %arg21[%c11_83, %c0_84], %296 {strides = array<i32>} : memref<16x16xf32, #tpu.memory_space<vmem>>, vector<1x16xf32>,
    %cst_85 = arith.constant dense<0.000000e+00> : vector<1x48xf32>
    %298 = tpu.matmul %296, %7, %cst_85 {dimension_numbers = #tpu.dot_dimension_numbers<[1], [0], [0], [1], [0, 0, 1, 1], [], []>} : vector<1x16xf32>, vector<16x48xf32>, vector<1x48xf32> -> vector<1x48xf32>
    %c12 = arith.constant 12 : index
    %c0_86 = arith.constant 0 : index
    %299 = vector.load %arg20[%c12, %c0_86] : memref<16x48xf32, #tpu.memory_space<vmem>>, vector<1x48xf32>
    %300 = vector.extract_strided_slice %299 {offsets = [0, 0], sizes = [1, 32], strides = [1, 1]} : vector<1x48xf32> to vector<1x32xf32>
    %301 = vector.extract_strided_slice %298 {offsets = [0, 0], sizes = [1, 32], strides = [1, 1]} : vector<1x48xf32> to vector<1x32xf32>
    %302 = arith.addf %300, %301 : vector<1x32xf32>
    %303 = arith.negf %302 : vector<1x32xf32>
    %304 = math.exp %303 : vector<1x32xf32>
    %cst_87 = arith.constant 1.000000e+00 : f32
    %305 = vector.broadcast %cst_87 : f32 to vector<1x32xf32>
    %306 = arith.addf %305, %304 : vector<1x32xf32>
    %307 = arith.divf %305, %306 : vector<1x32xf32>
    %308 = vector.extract_strided_slice %307 {offsets = [0, 0], sizes = [1, 16], strides = [1, 1]} : vector<1x32xf32> to vector<1x16xf32>
    %309 = vector.extract_strided_slice %307 {offsets = [0, 16], sizes = [1, 16], strides = [1, 1]} : vector<1x32xf32> to vector<1x16xf32>
    %310 = vector.extract_strided_slice %299 {offsets = [0, 32], sizes = [1, 16], strides = [1, 1]} : vector<1x48xf32> to vector<1x16xf32>
    %311 = vector.extract_strided_slice %298 {offsets = [0, 32], sizes = [1, 16], strides = [1, 1]} : vector<1x48xf32> to vector<1x16xf32>
    %312 = arith.addf %311, %8 : vector<1x16xf32>
    %313 = arith.mulf %308, %312 : vector<1x16xf32>
    %314 = arith.addf %310, %313 : vector<1x16xf32>
    %315 = math.tanh %314 : vector<1x16xf32>
    %cst_88 = arith.constant 1.000000e+00 : f32
    %316 = vector.broadcast %cst_88 : f32 to vector<1x16xf32>
    %317 = arith.subf %316, %309 : vector<1x16xf32>
    %318 = arith.mulf %317, %315 : vector<1x16xf32>
    %319 = arith.mulf %309, %296 : vector<1x16xf32>
    %320 = arith.addf %318, %319 : vector<1x16xf32>
    %c12_89 = arith.constant 12 : index
    %c0_90 = arith.constant 0 : index
    %321 = vector.load %arg21[%c12_89, %c0_90] : memref<16x16xf32, #tpu.memory_space<vmem>>, vector<1x16xf32>
    tpu.vector_store %arg21[%c12_89, %c0_90], %320 {strides = array<i32>} : memref<16x16xf32, #tpu.memory_space<vmem>>, vector<1x16xf32>,
    %cst_91 = arith.constant dense<0.000000e+00> : vector<1x48xf32>
    %322 = tpu.matmul %320, %7, %cst_91 {dimension_numbers = #tpu.dot_dimension_numbers<[1], [0], [0], [1], [0, 0, 1, 1], [], []>} : vector<1x16xf32>, vector<16x48xf32>, vector<1x48xf32> -> vector<1x48xf32>
    %c13 = arith.constant 13 : index
    %c0_92 = arith.constant 0 : index
    %323 = vector.load %arg20[%c13, %c0_92] : memref<16x48xf32, #tpu.memory_space<vmem>>, vector<1x48xf32>
    %324 = vector.extract_strided_slice %323 {offsets = [0, 0], sizes = [1, 32], strides = [1, 1]} : vector<1x48xf32> to vector<1x32xf32>
    %325 = vector.extract_strided_slice %322 {offsets = [0, 0], sizes = [1, 32], strides = [1, 1]} : vector<1x48xf32> to vector<1x32xf32>
    %326 = arith.addf %324, %325 : vector<1x32xf32>
    %327 = arith.negf %326 : vector<1x32xf32>
    %328 = math.exp %327 : vector<1x32xf32>
    %cst_93 = arith.constant 1.000000e+00 : f32
    %329 = vector.broadcast %cst_93 : f32 to vector<1x32xf32>
    %330 = arith.addf %329, %328 : vector<1x32xf32>
    %331 = arith.divf %329, %330 : vector<1x32xf32>
    %332 = vector.extract_strided_slice %331 {offsets = [0, 0], sizes = [1, 16], strides = [1, 1]} : vector<1x32xf32> to vector<1x16xf32>
    %333 = vector.extract_strided_slice %331 {offsets = [0, 16], sizes = [1, 16], strides = [1, 1]} : vector<1x32xf32> to vector<1x16xf32>
    %334 = vector.extract_strided_slice %323 {offsets = [0, 32], sizes = [1, 16], strides = [1, 1]} : vector<1x48xf32> to vector<1x16xf32>
    %335 = vector.extract_strided_slice %322 {offsets = [0, 32], sizes = [1, 16], strides = [1, 1]} : vector<1x48xf32> to vector<1x16xf32>
    %336 = arith.addf %335, %8 : vector<1x16xf32>
    %337 = arith.mulf %332, %336 : vector<1x16xf32>
    %338 = arith.addf %334, %337 : vector<1x16xf32>
    %339 = math.tanh %338 : vector<1x16xf32>
    %cst_94 = arith.constant 1.000000e+00 : f32
    %340 = vector.broadcast %cst_94 : f32 to vector<1x16xf32>
    %341 = arith.subf %340, %333 : vector<1x16xf32>
    %342 = arith.mulf %341, %339 : vector<1x16xf32>
    %343 = arith.mulf %333, %320 : vector<1x16xf32>
    %344 = arith.addf %342, %343 : vector<1x16xf32>
    %c13_95 = arith.constant 13 : index
    %c0_96 = arith.constant 0 : index
    %345 = vector.load %arg21[%c13_95, %c0_96] : memref<16x16xf32, #tpu.memory_space<vmem>>, vector<1x16xf32>
    tpu.vector_store %arg21[%c13_95, %c0_96], %344 {strides = array<i32>} : memref<16x16xf32, #tpu.memory_space<vmem>>, vector<1x16xf32>,
    %cst_97 = arith.constant dense<0.000000e+00> : vector<1x48xf32>
    %346 = tpu.matmul %344, %7, %cst_97 {dimension_numbers = #tpu.dot_dimension_numbers<[1], [0], [0], [1], [0, 0, 1, 1], [], []>} : vector<1x16xf32>, vector<16x48xf32>, vector<1x48xf32> -> vector<1x48xf32>
    %c14 = arith.constant 14 : index
    %c0_98 = arith.constant 0 : index
    %347 = vector.load %arg20[%c14, %c0_98] : memref<16x48xf32, #tpu.memory_space<vmem>>, vector<1x48xf32>
    %348 = vector.extract_strided_slice %347 {offsets = [0, 0], sizes = [1, 32], strides = [1, 1]} : vector<1x48xf32> to vector<1x32xf32>
    %349 = vector.extract_strided_slice %346 {offsets = [0, 0], sizes = [1, 32], strides = [1, 1]} : vector<1x48xf32> to vector<1x32xf32>
    %350 = arith.addf %348, %349 : vector<1x32xf32>
    %351 = arith.negf %350 : vector<1x32xf32>
    %352 = math.exp %351 : vector<1x32xf32>
    %cst_99 = arith.constant 1.000000e+00 : f32
    %353 = vector.broadcast %cst_99 : f32 to vector<1x32xf32>
    %354 = arith.addf %353, %352 : vector<1x32xf32>
    %355 = arith.divf %353, %354 : vector<1x32xf32>
    %356 = vector.extract_strided_slice %355 {offsets = [0, 0], sizes = [1, 16], strides = [1, 1]} : vector<1x32xf32> to vector<1x16xf32>
    %357 = vector.extract_strided_slice %355 {offsets = [0, 16], sizes = [1, 16], strides = [1, 1]} : vector<1x32xf32> to vector<1x16xf32>
    %358 = vector.extract_strided_slice %347 {offsets = [0, 32], sizes = [1, 16], strides = [1, 1]} : vector<1x48xf32> to vector<1x16xf32>
    %359 = vector.extract_strided_slice %346 {offsets = [0, 32], sizes = [1, 16], strides = [1, 1]} : vector<1x48xf32> to vector<1x16xf32>
    %360 = arith.addf %359, %8 : vector<1x16xf32>
    %361 = arith.mulf %356, %360 : vector<1x16xf32>
    %362 = arith.addf %358, %361 : vector<1x16xf32>
    %363 = math.tanh %362 : vector<1x16xf32>
    %cst_100 = arith.constant 1.000000e+00 : f32
    %364 = vector.broadcast %cst_100 : f32 to vector<1x16xf32>
    %365 = arith.subf %364, %357 : vector<1x16xf32>
    %366 = arith.mulf %365, %363 : vector<1x16xf32>
    %367 = arith.mulf %357, %344 : vector<1x16xf32>
    %368 = arith.addf %366, %367 : vector<1x16xf32>
    %c14_101 = arith.constant 14 : index
    %c0_102 = arith.constant 0 : index
    %369 = vector.load %arg21[%c14_101, %c0_102] : memref<16x16xf32, #tpu.memory_space<vmem>>, vector<1x16xf32>
    tpu.vector_store %arg21[%c14_101, %c0_102], %368 {strides = array<i32>} : memref<16x16xf32, #tpu.memory_space<vmem>>, vector<1x16xf32>,
    %cst_103 = arith.constant dense<0.000000e+00> : vector<1x48xf32>
    %370 = tpu.matmul %368, %7, %cst_103 {dimension_numbers = #tpu.dot_dimension_numbers<[1], [0], [0], [1], [0, 0, 1, 1], [], []>} : vector<1x16xf32>, vector<16x48xf32>, vector<1x48xf32> -> vector<1x48xf32>
    %c15 = arith.constant 15 : index
    %c0_104 = arith.constant 0 : index
    %371 = vector.load %arg20[%c15, %c0_104] : memref<16x48xf32, #tpu.memory_space<vmem>>, vector<1x48xf32>
    %372 = vector.extract_strided_slice %371 {offsets = [0, 0], sizes = [1, 32], strides = [1, 1]} : vector<1x48xf32> to vector<1x32xf32>
    %373 = vector.extract_strided_slice %370 {offsets = [0, 0], sizes = [1, 32], strides = [1, 1]} : vector<1x48xf32> to vector<1x32xf32>
    %374 = arith.addf %372, %373 : vector<1x32xf32>
    %375 = arith.negf %374 : vector<1x32xf32>
    %376 = math.exp %375 : vector<1x32xf32>
    %cst_105 = arith.constant 1.000000e+00 : f32
    %377 = vector.broadcast %cst_105 : f32 to vector<1x32xf32>
    %378 = arith.addf %377, %376 : vector<1x32xf32>
    %379 = arith.divf %377, %378 : vector<1x32xf32>
    %380 = vector.extract_strided_slice %379 {offsets = [0, 0], sizes = [1, 16], strides = [1, 1]} : vector<1x32xf32> to vector<1x16xf32>
    %381 = vector.extract_strided_slice %379 {offsets = [0, 16], sizes = [1, 16], strides = [1, 1]} : vector<1x32xf32> to vector<1x16xf32>
    %382 = vector.extract_strided_slice %371 {offsets = [0, 32], sizes = [1, 16], strides = [1, 1]} : vector<1x48xf32> to vector<1x16xf32>
    %383 = vector.extract_strided_slice %370 {offsets = [0, 32], sizes = [1, 16], strides = [1, 1]} : vector<1x48xf32> to vector<1x16xf32>
    %384 = arith.addf %383, %8 : vector<1x16xf32>
    %385 = arith.mulf %380, %384 : vector<1x16xf32>
    %386 = arith.addf %382, %385 : vector<1x16xf32>
    %387 = math.tanh %386 : vector<1x16xf32>
    %cst_106 = arith.constant 1.000000e+00 : f32
    %388 = vector.broadcast %cst_106 : f32 to vector<1x16xf32>
    %389 = arith.subf %388, %381 : vector<1x16xf32>
    %390 = arith.mulf %389, %387 : vector<1x16xf32>
    %391 = arith.mulf %381, %368 : vector<1x16xf32>
    %392 = arith.addf %390, %391 : vector<1x16xf32>
    %c15_107 = arith.constant 15 : index
    %c0_108 = arith.constant 0 : index
    %393 = vector.load %arg21[%c15_107, %c0_108] : memref<16x16xf32, #tpu.memory_space<vmem>>, vector<1x16xf32>
    tpu.vector_store %arg21[%c15_107, %c0_108], %392 {strides = array<i32>} : memref<16x16xf32, #tpu.memory_space<vmem>>, vector<1x16xf32>,
    %c0_109 = arith.constant 0 : index
    %c0_110 = arith.constant 0 : index
    %394 = vector.load %arg18[%c0_109, %c0_110] : memref<1x16xf32, #tpu.memory_space<vmem>>, vector<1x16xf32>
    tpu.vector_store %arg18[%c0_109, %c0_110], %392 {strides = array<i32>} : memref<1x16xf32, #tpu.memory_space<vmem>>, vector<1x16xf32>,
    %c0_111 = arith.constant 0 : index
    %395 = memref.load %arg0[%c0_111] : memref<8xi32, #tpu.memory_space<smem>>
    %396 = arith.index_cast %395 : i32 to index
    %c0_112 = arith.constant 0 : index
    %397 = vector.load %arg21[%396, %c0_112] : memref<16x16xf32, #tpu.memory_space<vmem>>, vector<1x16xf32>
    %c0_113 = arith.constant 0 : index
    %c0_114 = arith.constant 0 : index
    %398 = vector.load %arg22[%c0_113, %c0_114] : memref<8x16xf32, #tpu.memory_space<vmem>>, vector<1x16xf32>
    tpu.vector_store %arg22[%c0_113, %c0_114], %397 {strides = array<i32>} : memref<8x16xf32, #tpu.memory_space<vmem>>, vector<1x16xf32>,
    %c1_115 = arith.constant 1 : index
    %399 = memref.load %arg0[%c1_115] : memref<8xi32, #tpu.memory_space<smem>>
    %400 = arith.index_cast %399 : i32 to index
    %c0_116 = arith.constant 0 : index
    %401 = vector.load %arg21[%400, %c0_116] : memref<16x16xf32, #tpu.memory_space<vmem>>, vector<1x16xf32>
    %c1_117 = arith.constant 1 : index
    %c0_118 = arith.constant 0 : index
    %402 = vector.load %arg22[%c1_117, %c0_118] : memref<8x16xf32, #tpu.memory_space<vmem>>, vector<1x16xf32>
    tpu.vector_store %arg22[%c1_117, %c0_118], %401 {strides = array<i32>} : memref<8x16xf32, #tpu.memory_space<vmem>>, vector<1x16xf32>,
    %c2_119 = arith.constant 2 : index
    %403 = memref.load %arg0[%c2_119] : memref<8xi32, #tpu.memory_space<smem>>
    %404 = arith.index_cast %403 : i32 to index
    %c0_120 = arith.constant 0 : index
    %405 = vector.load %arg21[%404, %c0_120] : memref<16x16xf32, #tpu.memory_space<vmem>>, vector<1x16xf32>
    %c2_121 = arith.constant 2 : index
    %c0_122 = arith.constant 0 : index
    %406 = vector.load %arg22[%c2_121, %c0_122] : memref<8x16xf32, #tpu.memory_space<vmem>>, vector<1x16xf32>
    tpu.vector_store %arg22[%c2_121, %c0_122], %405 {strides = array<i32>} : memref<8x16xf32, #tpu.memory_space<vmem>>, vector<1x16xf32>,
    %c3_123 = arith.constant 3 : index
    %407 = memref.load %arg0[%c3_123] : memref<8xi32, #tpu.memory_space<smem>>
    %408 = arith.index_cast %407 : i32 to index
    %c0_124 = arith.constant 0 : index
    %409 = vector.load %arg21[%408, %c0_124] : memref<16x16xf32, #tpu.memory_space<vmem>>, vector<1x16xf32>
    %c3_125 = arith.constant 3 : index
    %c0_126 = arith.constant 0 : index
    %410 = vector.load %arg22[%c3_125, %c0_126] : memref<8x16xf32, #tpu.memory_space<vmem>>, vector<1x16xf32>
    tpu.vector_store %arg22[%c3_125, %c0_126], %409 {strides = array<i32>} : memref<8x16xf32, #tpu.memory_space<vmem>>, vector<1x16xf32>,
    %c4_127 = arith.constant 4 : index
    %411 = memref.load %arg0[%c4_127] : memref<8xi32, #tpu.memory_space<smem>>
    %412 = arith.index_cast %411 : i32 to index
    %c0_128 = arith.constant 0 : index
    %413 = vector.load %arg21[%412, %c0_128] : memref<16x16xf32, #tpu.memory_space<vmem>>, vector<1x16xf32>
    %c4_129 = arith.constant 4 : index
    %c0_130 = arith.constant 0 : index
    %414 = vector.load %arg22[%c4_129, %c0_130] : memref<8x16xf32, #tpu.memory_space<vmem>>, vector<1x16xf32>
    tpu.vector_store %arg22[%c4_129, %c0_130], %413 {strides = array<i32>} : memref<8x16xf32, #tpu.memory_space<vmem>>, vector<1x16xf32>,
    %c5_131 = arith.constant 5 : index
    %415 = memref.load %arg0[%c5_131] : memref<8xi32, #tpu.memory_space<smem>>
    %416 = arith.index_cast %415 : i32 to index
    %c0_132 = arith.constant 0 : index
    %417 = vector.load %arg21[%416, %c0_132] : memref<16x16xf32, #tpu.memory_space<vmem>>, vector<1x16xf32>
    %c5_133 = arith.constant 5 : index
    %c0_134 = arith.constant 0 : index
    %418 = vector.load %arg22[%c5_133, %c0_134] : memref<8x16xf32, #tpu.memory_space<vmem>>, vector<1x16xf32>
    tpu.vector_store %arg22[%c5_133, %c0_134], %417 {strides = array<i32>} : memref<8x16xf32, #tpu.memory_space<vmem>>, vector<1x16xf32>,
    %c6_135 = arith.constant 6 : index
    %419 = memref.load %arg0[%c6_135] : memref<8xi32, #tpu.memory_space<smem>>
    %420 = arith.index_cast %419 : i32 to index
    %c0_136 = arith.constant 0 : index
    %421 = vector.load %arg21[%420, %c0_136] : memref<16x16xf32, #tpu.memory_space<vmem>>, vector<1x16xf32>
    %c6_137 = arith.constant 6 : index
    %c0_138 = arith.constant 0 : index
    %422 = vector.load %arg22[%c6_137, %c0_138] : memref<8x16xf32, #tpu.memory_space<vmem>>, vector<1x16xf32>
    tpu.vector_store %arg22[%c6_137, %c0_138], %421 {strides = array<i32>} : memref<8x16xf32, #tpu.memory_space<vmem>>, vector<1x16xf32>,
    %c7_139 = arith.constant 7 : index
    %423 = memref.load %arg0[%c7_139] : memref<8xi32, #tpu.memory_space<smem>>
    %424 = arith.index_cast %423 : i32 to index
    %c0_140 = arith.constant 0 : index
    %425 = vector.load %arg21[%424, %c0_140] : memref<16x16xf32, #tpu.memory_space<vmem>>, vector<1x16xf32>
    %c7_141 = arith.constant 7 : index
    %c0_142 = arith.constant 0 : index
    %426 = vector.load %arg22[%c7_141, %c0_142] : memref<8x16xf32, #tpu.memory_space<vmem>>, vector<1x16xf32>
    tpu.vector_store %arg22[%c7_141, %c0_142], %425 {strides = array<i32>} : memref<8x16xf32, #tpu.memory_space<vmem>>, vector<1x16xf32>,
    %c0_143 = arith.constant 0 : index
    %c0_144 = arith.constant 0 : index
    %427 = vector.load %arg2[%c0_143, %c0_144] : memref<8x8xf32, #tpu.memory_space<vmem>>, vector<8x8xf32>
    %c0_145 = arith.constant 0 : index
    %c0_146 = arith.constant 0 : index
    %428 = vector.load %arg8[%c0_145, %c0_146] : memref<8x48xf32, #tpu.memory_space<vmem>>, vector<8x48xf32>
    %cst_147 = arith.constant dense<0.000000e+00> : vector<8x48xf32>
    %429 = tpu.matmul %427, %428, %cst_147 {dimension_numbers = #tpu.dot_dimension_numbers<[1], [0], [0], [1], [0, 0, 1, 1], [], []>} : vector<8x8xf32>, vector<8x48xf32>, vector<8x48xf32> -> vector<8x48xf32>
    %c0_148 = arith.constant 0 : index
    %c0_149 = arith.constant 0 : index
    %430 = vector.load %arg22[%c0_148, %c0_149] : memref<8x16xf32, #tpu.memory_space<vmem>>, vector<8x16xf32>
    %c0_150 = arith.constant 0 : index
    %c0_151 = arith.constant 0 : index
    %431 = vector.load %arg9[%c0_150, %c0_151] : memref<16x48xf32, #tpu.memory_space<vmem>>, vector<16x48xf32>
    %cst_152 = arith.constant dense<0.000000e+00> : vector<8x48xf32>
    %432 = tpu.matmul %430, %431, %cst_152 {dimension_numbers = #tpu.dot_dimension_numbers<[1], [0], [0], [1], [0, 0, 1, 1], [], []>} : vector<8x16xf32>, vector<16x48xf32>, vector<8x48xf32> -> vector<8x48xf32>
    %433 = arith.addf %429, %432 : vector<8x48xf32>
    %c0_153 = arith.constant 0 : index
    %c0_154 = arith.constant 0 : index
    %434 = vector.load %arg11[%c0_153, %c0_154] : memref<1x48xf32, #tpu.memory_space<vmem>>, vector<1x48xf32>
    %435 = vector.broadcast %434 : vector<1x48xf32> to vector<8x48xf32>
    %436 = arith.addf %433, %435 : vector<8x48xf32>
    %c0_155 = arith.constant 0 : index
    %c0_156 = arith.constant 0 : index
    %437 = vector.load %arg23[%c0_155, %c0_156] : memref<8x48xf32, #tpu.memory_space<vmem>>, vector<8x48xf32>
    tpu.vector_store %arg23[%c0_155, %c0_156], %436 {strides = array<i32>} : memref<8x48xf32, #tpu.memory_space<vmem>>, vector<8x48xf32>,
    %c0_157 = arith.constant 0 : index
    %c0_158 = arith.constant 0 : index
    %438 = vector.load %arg10[%c0_157, %c0_158] : memref<16x48xf32, #tpu.memory_space<vmem>>, vector<16x48xf32>
    %c0_159 = arith.constant 0 : index
    %c0_160 = arith.constant 0 : index
    %439 = vector.load %arg12[%c0_159, %c0_160] : memref<1x16xf32, #tpu.memory_space<vmem>>, vector<1x16xf32>
    %cst_161 = arith.constant 0.000000e+00 : f32
    %440 = vector.broadcast %cst_161 : f32 to vector<1x16xf32>
    %cst_162 = arith.constant dense<0.000000e+00> : vector<1x48xf32>
    %441 = tpu.matmul %440, %438, %cst_162 {dimension_numbers = #tpu.dot_dimension_numbers<[1], [0], [0], [1], [0, 0, 1, 1], [], []>} : vector<1x16xf32>, vector<16x48xf32>, vector<1x48xf32> -> vector<1x48xf32>
    %c0_163 = arith.constant 0 : index
    %c0_164 = arith.constant 0 : index
    %442 = vector.load %arg23[%c0_163, %c0_164] : memref<8x48xf32, #tpu.memory_space<vmem>>, vector<1x48xf32>
    %443 = vector.extract_strided_slice %442 {offsets = [0, 0], sizes = [1, 32], strides = [1, 1]} : vector<1x48xf32> to vector<1x32xf32>
    %444 = vector.extract_strided_slice %441 {offsets = [0, 0], sizes = [1, 32], strides = [1, 1]} : vector<1x48xf32> to vector<1x32xf32>
    %445 = arith.addf %443, %444 : vector<1x32xf32>
    %446 = arith.negf %445 : vector<1x32xf32>
    %447 = math.exp %446 : vector<1x32xf32>
    %cst_165 = arith.constant 1.000000e+00 : f32
    %448 = vector.broadcast %cst_165 : f32 to vector<1x32xf32>
    %449 = arith.addf %448, %447 : vector<1x32xf32>
    %450 = arith.divf %448, %449 : vector<1x32xf32>
    %451 = vector.extract_strided_slice %450 {offsets = [0, 0], sizes = [1, 16], strides = [1, 1]} : vector<1x32xf32> to vector<1x16xf32>
    %452 = vector.extract_strided_slice %450 {offsets = [0, 16], sizes = [1, 16], strides = [1, 1]} : vector<1x32xf32> to vector<1x16xf32>
    %453 = vector.extract_strided_slice %442 {offsets = [0, 32], sizes = [1, 16], strides = [1, 1]} : vector<1x48xf32> to vector<1x16xf32>
    %454 = vector.extract_strided_slice %441 {offsets = [0, 32], sizes = [1, 16], strides = [1, 1]} : vector<1x48xf32> to vector<1x16xf32>
    %455 = arith.addf %454, %439 : vector<1x16xf32>
    %456 = arith.mulf %451, %455 : vector<1x16xf32>
    %457 = arith.addf %453, %456 : vector<1x16xf32>
    %458 = math.tanh %457 : vector<1x16xf32>
    %cst_166 = arith.constant 1.000000e+00 : f32
    %459 = vector.broadcast %cst_166 : f32 to vector<1x16xf32>
    %460 = arith.subf %459, %452 : vector<1x16xf32>
    %461 = arith.mulf %460, %458 : vector<1x16xf32>
    %462 = arith.mulf %452, %440 : vector<1x16xf32>
    %463 = arith.addf %461, %462 : vector<1x16xf32>
    %c0_167 = arith.constant 0 : index
    %c0_168 = arith.constant 0 : index
    %464 = vector.load %arg24[%c0_167, %c0_168] : memref<8x16xf32, #tpu.memory_space<vmem>>, vector<1x16xf32>
    tpu.vector_store %arg24[%c0_167, %c0_168], %463 {strides = array<i32>} : memref<8x16xf32, #tpu.memory_space<vmem>>, vector<1x16xf32>,
    %cst_169 = arith.constant dense<0.000000e+00> : vector<1x48xf32>
    %465 = tpu.matmul %463, %438, %cst_169 {dimension_numbers = #tpu.dot_dimension_numbers<[1], [0], [0], [1], [0, 0, 1, 1], [], []>} : vector<1x16xf32>, vector<16x48xf32>, vector<1x48xf32> -> vector<1x48xf32>
    %c1_170 = arith.constant 1 : index
    %c0_171 = arith.constant 0 : index
    %466 = vector.load %arg23[%c1_170, %c0_171] : memref<8x48xf32, #tpu.memory_space<vmem>>, vector<1x48xf32>
    %467 = vector.extract_strided_slice %466 {offsets = [0, 0], sizes = [1, 32], strides = [1, 1]} : vector<1x48xf32> to vector<1x32xf32>
    %468 = vector.extract_strided_slice %465 {offsets = [0, 0], sizes = [1, 32], strides = [1, 1]} : vector<1x48xf32> to vector<1x32xf32>
    %469 = arith.addf %467, %468 : vector<1x32xf32>
    %470 = arith.negf %469 : vector<1x32xf32>
    %471 = math.exp %470 : vector<1x32xf32>
    %cst_172 = arith.constant 1.000000e+00 : f32
    %472 = vector.broadcast %cst_172 : f32 to vector<1x32xf32>
    %473 = arith.addf %472, %471 : vector<1x32xf32>
    %474 = arith.divf %472, %473 : vector<1x32xf32>
    %475 = vector.extract_strided_slice %474 {offsets = [0, 0], sizes = [1, 16], strides = [1, 1]} : vector<1x32xf32> to vector<1x16xf32>
    %476 = vector.extract_strided_slice %474 {offsets = [0, 16], sizes = [1, 16], strides = [1, 1]} : vector<1x32xf32> to vector<1x16xf32>
    %477 = vector.extract_strided_slice %466 {offsets = [0, 32], sizes = [1, 16], strides = [1, 1]} : vector<1x48xf32> to vector<1x16xf32>
    %478 = vector.extract_strided_slice %465 {offsets = [0, 32], sizes = [1, 16], strides = [1, 1]} : vector<1x48xf32> to vector<1x16xf32>
    %479 = arith.addf %478, %439 : vector<1x16xf32>
    %480 = arith.mulf %475, %479 : vector<1x16xf32>
    %481 = arith.addf %477, %480 : vector<1x16xf32>
    %482 = math.tanh %481 : vector<1x16xf32>
    %cst_173 = arith.constant 1.000000e+00 : f32
    %483 = vector.broadcast %cst_173 : f32 to vector<1x16xf32>
    %484 = arith.subf %483, %476 : vector<1x16xf32>
    %485 = arith.mulf %484, %482 : vector<1x16xf32>
    %486 = arith.mulf %476, %463 : vector<1x16xf32>
    %487 = arith.addf %485, %486 : vector<1x16xf32>
    %c1_174 = arith.constant 1 : index
    %c0_175 = arith.constant 0 : index
    %488 = vector.load %arg24[%c1_174, %c0_175] : memref<8x16xf32, #tpu.memory_space<vmem>>, vector<1x16xf32>
    tpu.vector_store %arg24[%c1_174, %c0_175], %487 {strides = array<i32>} : memref<8x16xf32, #tpu.memory_space<vmem>>, vector<1x16xf32>,
    %cst_176 = arith.constant dense<0.000000e+00> : vector<1x48xf32>
    %489 = tpu.matmul %487, %438, %cst_176 {dimension_numbers = #tpu.dot_dimension_numbers<[1], [0], [0], [1], [0, 0, 1, 1], [], []>} : vector<1x16xf32>, vector<16x48xf32>, vector<1x48xf32> -> vector<1x48xf32>
    %c2_177 = arith.constant 2 : index
    %c0_178 = arith.constant 0 : index
    %490 = vector.load %arg23[%c2_177, %c0_178] : memref<8x48xf32, #tpu.memory_space<vmem>>, vector<1x48xf32>
    %491 = vector.extract_strided_slice %490 {offsets = [0, 0], sizes = [1, 32], strides = [1, 1]} : vector<1x48xf32> to vector<1x32xf32>
    %492 = vector.extract_strided_slice %489 {offsets = [0, 0], sizes = [1, 32], strides = [1, 1]} : vector<1x48xf32> to vector<1x32xf32>
    %493 = arith.addf %491, %492 : vector<1x32xf32>
    %494 = arith.negf %493 : vector<1x32xf32>
    %495 = math.exp %494 : vector<1x32xf32>
    %cst_179 = arith.constant 1.000000e+00 : f32
    %496 = vector.broadcast %cst_179 : f32 to vector<1x32xf32>
    %497 = arith.addf %496, %495 : vector<1x32xf32>
    %498 = arith.divf %496, %497 : vector<1x32xf32>
    %499 = vector.extract_strided_slice %498 {offsets = [0, 0], sizes = [1, 16], strides = [1, 1]} : vector<1x32xf32> to vector<1x16xf32>
    %500 = vector.extract_strided_slice %498 {offsets = [0, 16], sizes = [1, 16], strides = [1, 1]} : vector<1x32xf32> to vector<1x16xf32>
    %501 = vector.extract_strided_slice %490 {offsets = [0, 32], sizes = [1, 16], strides = [1, 1]} : vector<1x48xf32> to vector<1x16xf32>
    %502 = vector.extract_strided_slice %489 {offsets = [0, 32], sizes = [1, 16], strides = [1, 1]} : vector<1x48xf32> to vector<1x16xf32>
    %503 = arith.addf %502, %439 : vector<1x16xf32>
    %504 = arith.mulf %499, %503 : vector<1x16xf32>
    %505 = arith.addf %501, %504 : vector<1x16xf32>
    %506 = math.tanh %505 : vector<1x16xf32>
    %cst_180 = arith.constant 1.000000e+00 : f32
    %507 = vector.broadcast %cst_180 : f32 to vector<1x16xf32>
    %508 = arith.subf %507, %500 : vector<1x16xf32>
    %509 = arith.mulf %508, %506 : vector<1x16xf32>
    %510 = arith.mulf %500, %487 : vector<1x16xf32>
    %511 = arith.addf %509, %510 : vector<1x16xf32>
    %c2_181 = arith.constant 2 : index
    %c0_182 = arith.constant 0 : index
    %512 = vector.load %arg24[%c2_181, %c0_182] : memref<8x16xf32, #tpu.memory_space<vmem>>, vector<1x16xf32>
    tpu.vector_store %arg24[%c2_181, %c0_182], %511 {strides = array<i32>} : memref<8x16xf32, #tpu.memory_space<vmem>>, vector<1x16xf32>,
    %cst_183 = arith.constant dense<0.000000e+00> : vector<1x48xf32>
    %513 = tpu.matmul %511, %438, %cst_183 {dimension_numbers = #tpu.dot_dimension_numbers<[1], [0], [0], [1], [0, 0, 1, 1], [], []>} : vector<1x16xf32>, vector<16x48xf32>, vector<1x48xf32> -> vector<1x48xf32>
    %c3_184 = arith.constant 3 : index
    %c0_185 = arith.constant 0 : index
    %514 = vector.load %arg23[%c3_184, %c0_185] : memref<8x48xf32, #tpu.memory_space<vmem>>, vector<1x48xf32>
    %515 = vector.extract_strided_slice %514 {offsets = [0, 0], sizes = [1, 32], strides = [1, 1]} : vector<1x48xf32> to vector<1x32xf32>
    %516 = vector.extract_strided_slice %513 {offsets = [0, 0], sizes = [1, 32], strides = [1, 1]} : vector<1x48xf32> to vector<1x32xf32>
    %517 = arith.addf %515, %516 : vector<1x32xf32>
    %518 = arith.negf %517 : vector<1x32xf32>
    %519 = math.exp %518 : vector<1x32xf32>
    %cst_186 = arith.constant 1.000000e+00 : f32
    %520 = vector.broadcast %cst_186 : f32 to vector<1x32xf32>
    %521 = arith.addf %520, %519 : vector<1x32xf32>
    %522 = arith.divf %520, %521 : vector<1x32xf32>
    %523 = vector.extract_strided_slice %522 {offsets = [0, 0], sizes = [1, 16], strides = [1, 1]} : vector<1x32xf32> to vector<1x16xf32>
    %524 = vector.extract_strided_slice %522 {offsets = [0, 16], sizes = [1, 16], strides = [1, 1]} : vector<1x32xf32> to vector<1x16xf32>
    %525 = vector.extract_strided_slice %514 {offsets = [0, 32], sizes = [1, 16], strides = [1, 1]} : vector<1x48xf32> to vector<1x16xf32>
    %526 = vector.extract_strided_slice %513 {offsets = [0, 32], sizes = [1, 16], strides = [1, 1]} : vector<1x48xf32> to vector<1x16xf32>
    %527 = arith.addf %526, %439 : vector<1x16xf32>
    %528 = arith.mulf %523, %527 : vector<1x16xf32>
    %529 = arith.addf %525, %528 : vector<1x16xf32>
    %530 = math.tanh %529 : vector<1x16xf32>
    %cst_187 = arith.constant 1.000000e+00 : f32
    %531 = vector.broadcast %cst_187 : f32 to vector<1x16xf32>
    %532 = arith.subf %531, %524 : vector<1x16xf32>
    %533 = arith.mulf %532, %530 : vector<1x16xf32>
    %534 = arith.mulf %524, %511 : vector<1x16xf32>
    %535 = arith.addf %533, %534 : vector<1x16xf32>
    %c3_188 = arith.constant 3 : index
    %c0_189 = arith.constant 0 : index
    %536 = vector.load %arg24[%c3_188, %c0_189] : memref<8x16xf32, #tpu.memory_space<vmem>>, vector<1x16xf32>
    tpu.vector_store %arg24[%c3_188, %c0_189], %535 {strides = array<i32>} : memref<8x16xf32, #tpu.memory_space<vmem>>, vector<1x16xf32>,
    %cst_190 = arith.constant dense<0.000000e+00> : vector<1x48xf32>
    %537 = tpu.matmul %535, %438, %cst_190 {dimension_numbers = #tpu.dot_dimension_numbers<[1], [0], [0], [1], [0, 0, 1, 1], [], []>} : vector<1x16xf32>, vector<16x48xf32>, vector<1x48xf32> -> vector<1x48xf32>
    %c4_191 = arith.constant 4 : index
    %c0_192 = arith.constant 0 : index
    %538 = vector.load %arg23[%c4_191, %c0_192] : memref<8x48xf32, #tpu.memory_space<vmem>>, vector<1x48xf32>
    %539 = vector.extract_strided_slice %538 {offsets = [0, 0], sizes = [1, 32], strides = [1, 1]} : vector<1x48xf32> to vector<1x32xf32>
    %540 = vector.extract_strided_slice %537 {offsets = [0, 0], sizes = [1, 32], strides = [1, 1]} : vector<1x48xf32> to vector<1x32xf32>
    %541 = arith.addf %539, %540 : vector<1x32xf32>
    %542 = arith.negf %541 : vector<1x32xf32>
    %543 = math.exp %542 : vector<1x32xf32>
    %cst_193 = arith.constant 1.000000e+00 : f32
    %544 = vector.broadcast %cst_193 : f32 to vector<1x32xf32>
    %545 = arith.addf %544, %543 : vector<1x32xf32>
    %546 = arith.divf %544, %545 : vector<1x32xf32>
    %547 = vector.extract_strided_slice %546 {offsets = [0, 0], sizes = [1, 16], strides = [1, 1]} : vector<1x32xf32> to vector<1x16xf32>
    %548 = vector.extract_strided_slice %546 {offsets = [0, 16], sizes = [1, 16], strides = [1, 1]} : vector<1x32xf32> to vector<1x16xf32>
    %549 = vector.extract_strided_slice %538 {offsets = [0, 32], sizes = [1, 16], strides = [1, 1]} : vector<1x48xf32> to vector<1x16xf32>
    %550 = vector.extract_strided_slice %537 {offsets = [0, 32], sizes = [1, 16], strides = [1, 1]} : vector<1x48xf32> to vector<1x16xf32>
    %551 = arith.addf %550, %439 : vector<1x16xf32>
    %552 = arith.mulf %547, %551 : vector<1x16xf32>
    %553 = arith.addf %549, %552 : vector<1x16xf32>
    %554 = math.tanh %553 : vector<1x16xf32>
    %cst_194 = arith.constant 1.000000e+00 : f32
    %555 = vector.broadcast %cst_194 : f32 to vector<1x16xf32>
    %556 = arith.subf %555, %548 : vector<1x16xf32>
    %557 = arith.mulf %556, %554 : vector<1x16xf32>
    %558 = arith.mulf %548, %535 : vector<1x16xf32>
    %559 = arith.addf %557, %558 : vector<1x16xf32>
    %c4_195 = arith.constant 4 : index
    %c0_196 = arith.constant 0 : index
    %560 = vector.load %arg24[%c4_195, %c0_196] : memref<8x16xf32, #tpu.memory_space<vmem>>, vector<1x16xf32>
    tpu.vector_store %arg24[%c4_195, %c0_196], %559 {strides = array<i32>} : memref<8x16xf32, #tpu.memory_space<vmem>>, vector<1x16xf32>,
    %cst_197 = arith.constant dense<0.000000e+00> : vector<1x48xf32>
    %561 = tpu.matmul %559, %438, %cst_197 {dimension_numbers = #tpu.dot_dimension_numbers<[1], [0], [0], [1], [0, 0, 1, 1], [], []>} : vector<1x16xf32>, vector<16x48xf32>, vector<1x48xf32> -> vector<1x48xf32>
    %c5_198 = arith.constant 5 : index
    %c0_199 = arith.constant 0 : index
    %562 = vector.load %arg23[%c5_198, %c0_199] : memref<8x48xf32, #tpu.memory_space<vmem>>, vector<1x48xf32>
    %563 = vector.extract_strided_slice %562 {offsets = [0, 0], sizes = [1, 32], strides = [1, 1]} : vector<1x48xf32> to vector<1x32xf32>
    %564 = vector.extract_strided_slice %561 {offsets = [0, 0], sizes = [1, 32], strides = [1, 1]} : vector<1x48xf32> to vector<1x32xf32>
    %565 = arith.addf %563, %564 : vector<1x32xf32>
    %566 = arith.negf %565 : vector<1x32xf32>
    %567 = math.exp %566 : vector<1x32xf32>
    %cst_200 = arith.constant 1.000000e+00 : f32
    %568 = vector.broadcast %cst_200 : f32 to vector<1x32xf32>
    %569 = arith.addf %568, %567 : vector<1x32xf32>
    %570 = arith.divf %568, %569 : vector<1x32xf32>
    %571 = vector.extract_strided_slice %570 {offsets = [0, 0], sizes = [1, 16], strides = [1, 1]} : vector<1x32xf32> to vector<1x16xf32>
    %572 = vector.extract_strided_slice %570 {offsets = [0, 16], sizes = [1, 16], strides = [1, 1]} : vector<1x32xf32> to vector<1x16xf32>
    %573 = vector.extract_strided_slice %562 {offsets = [0, 32], sizes = [1, 16], strides = [1, 1]} : vector<1x48xf32> to vector<1x16xf32>
    %574 = vector.extract_strided_slice %561 {offsets = [0, 32], sizes = [1, 16], strides = [1, 1]} : vector<1x48xf32> to vector<1x16xf32>
    %575 = arith.addf %574, %439 : vector<1x16xf32>
    %576 = arith.mulf %571, %575 : vector<1x16xf32>
    %577 = arith.addf %573, %576 : vector<1x16xf32>
    %578 = math.tanh %577 : vector<1x16xf32>
    %cst_201 = arith.constant 1.000000e+00 : f32
    %579 = vector.broadcast %cst_201 : f32 to vector<1x16xf32>
    %580 = arith.subf %579, %572 : vector<1x16xf32>
    %581 = arith.mulf %580, %578 : vector<1x16xf32>
    %582 = arith.mulf %572, %559 : vector<1x16xf32>
    %583 = arith.addf %581, %582 : vector<1x16xf32>
    %c5_202 = arith.constant 5 : index
    %c0_203 = arith.constant 0 : index
    %584 = vector.load %arg24[%c5_202, %c0_203] : memref<8x16xf32, #tpu.memory_space<vmem>>, vector<1x16xf32>
    tpu.vector_store %arg24[%c5_202, %c0_203], %583 {strides = array<i32>} : memref<8x16xf32, #tpu.memory_space<vmem>>, vector<1x16xf32>,
    %cst_204 = arith.constant dense<0.000000e+00> : vector<1x48xf32>
    %585 = tpu.matmul %583, %438, %cst_204 {dimension_numbers = #tpu.dot_dimension_numbers<[1], [0], [0], [1], [0, 0, 1, 1], [], []>} : vector<1x16xf32>, vector<16x48xf32>, vector<1x48xf32> -> vector<1x48xf32>
    %c6_205 = arith.constant 6 : index
    %c0_206 = arith.constant 0 : index
    %586 = vector.load %arg23[%c6_205, %c0_206] : memref<8x48xf32, #tpu.memory_space<vmem>>, vector<1x48xf32>
    %587 = vector.extract_strided_slice %586 {offsets = [0, 0], sizes = [1, 32], strides = [1, 1]} : vector<1x48xf32> to vector<1x32xf32>
    %588 = vector.extract_strided_slice %585 {offsets = [0, 0], sizes = [1, 32], strides = [1, 1]} : vector<1x48xf32> to vector<1x32xf32>
    %589 = arith.addf %587, %588 : vector<1x32xf32>
    %590 = arith.negf %589 : vector<1x32xf32>
    %591 = math.exp %590 : vector<1x32xf32>
    %cst_207 = arith.constant 1.000000e+00 : f32
    %592 = vector.broadcast %cst_207 : f32 to vector<1x32xf32>
    %593 = arith.addf %592, %591 : vector<1x32xf32>
    %594 = arith.divf %592, %593 : vector<1x32xf32>
    %595 = vector.extract_strided_slice %594 {offsets = [0, 0], sizes = [1, 16], strides = [1, 1]} : vector<1x32xf32> to vector<1x16xf32>
    %596 = vector.extract_strided_slice %594 {offsets = [0, 16], sizes = [1, 16], strides = [1, 1]} : vector<1x32xf32> to vector<1x16xf32>
    %597 = vector.extract_strided_slice %586 {offsets = [0, 32], sizes = [1, 16], strides = [1, 1]} : vector<1x48xf32> to vector<1x16xf32>
    %598 = vector.extract_strided_slice %585 {offsets = [0, 32], sizes = [1, 16], strides = [1, 1]} : vector<1x48xf32> to vector<1x16xf32>
    %599 = arith.addf %598, %439 : vector<1x16xf32>
    %600 = arith.mulf %595, %599 : vector<1x16xf32>
    %601 = arith.addf %597, %600 : vector<1x16xf32>
    %602 = math.tanh %601 : vector<1x16xf32>
    %cst_208 = arith.constant 1.000000e+00 : f32
    %603 = vector.broadcast %cst_208 : f32 to vector<1x16xf32>
    %604 = arith.subf %603, %596 : vector<1x16xf32>
    %605 = arith.mulf %604, %602 : vector<1x16xf32>
    %606 = arith.mulf %596, %583 : vector<1x16xf32>
    %607 = arith.addf %605, %606 : vector<1x16xf32>
    %c6_209 = arith.constant 6 : index
    %c0_210 = arith.constant 0 : index
    %608 = vector.load %arg24[%c6_209, %c0_210] : memref<8x16xf32, #tpu.memory_space<vmem>>, vector<1x16xf32>
    tpu.vector_store %arg24[%c6_209, %c0_210], %607 {strides = array<i32>} : memref<8x16xf32, #tpu.memory_space<vmem>>, vector<1x16xf32>,
    %cst_211 = arith.constant dense<0.000000e+00> : vector<1x48xf32>
    %609 = tpu.matmul %607, %438, %cst_211 {dimension_numbers = #tpu.dot_dimension_numbers<[1], [0], [0], [1], [0, 0, 1, 1], [], []>} : vector<1x16xf32>, vector<16x48xf32>, vector<1x48xf32> -> vector<1x48xf32>
    %c7_212 = arith.constant 7 : index
    %c0_213 = arith.constant 0 : index
    %610 = vector.load %arg23[%c7_212, %c0_213] : memref<8x48xf32, #tpu.memory_space<vmem>>, vector<1x48xf32>
    %611 = vector.extract_strided_slice %610 {offsets = [0, 0], sizes = [1, 32], strides = [1, 1]} : vector<1x48xf32> to vector<1x32xf32>
    %612 = vector.extract_strided_slice %609 {offsets = [0, 0], sizes = [1, 32], strides = [1, 1]} : vector<1x48xf32> to vector<1x32xf32>
    %613 = arith.addf %611, %612 : vector<1x32xf32>
    %614 = arith.negf %613 : vector<1x32xf32>
    %615 = math.exp %614 : vector<1x32xf32>
    %cst_214 = arith.constant 1.000000e+00 : f32
    %616 = vector.broadcast %cst_214 : f32 to vector<1x32xf32>
    %617 = arith.addf %616, %615 : vector<1x32xf32>
    %618 = arith.divf %616, %617 : vector<1x32xf32>
    %619 = vector.extract_strided_slice %618 {offsets = [0, 0], sizes = [1, 16], strides = [1, 1]} : vector<1x32xf32> to vector<1x16xf32>
    %620 = vector.extract_strided_slice %618 {offsets = [0, 16], sizes = [1, 16], strides = [1, 1]} : vector<1x32xf32> to vector<1x16xf32>
    %621 = vector.extract_strided_slice %610 {offsets = [0, 32], sizes = [1, 16], strides = [1, 1]} : vector<1x48xf32> to vector<1x16xf32>
    %622 = vector.extract_strided_slice %609 {offsets = [0, 32], sizes = [1, 16], strides = [1, 1]} : vector<1x48xf32> to vector<1x16xf32>
    %623 = arith.addf %622, %439 : vector<1x16xf32>
    %624 = arith.mulf %619, %623 : vector<1x16xf32>
    %625 = arith.addf %621, %624 : vector<1x16xf32>
    %626 = math.tanh %625 : vector<1x16xf32>
    %cst_215 = arith.constant 1.000000e+00 : f32
    %627 = vector.broadcast %cst_215 : f32 to vector<1x16xf32>
    %628 = arith.subf %627, %620 : vector<1x16xf32>
    %629 = arith.mulf %628, %626 : vector<1x16xf32>
    %630 = arith.mulf %620, %607 : vector<1x16xf32>
    %631 = arith.addf %629, %630 : vector<1x16xf32>
    %c7_216 = arith.constant 7 : index
    %c0_217 = arith.constant 0 : index
    %632 = vector.load %arg24[%c7_216, %c0_217] : memref<8x16xf32, #tpu.memory_space<vmem>>, vector<1x16xf32>
    tpu.vector_store %arg24[%c7_216, %c0_217], %631 {strides = array<i32>} : memref<8x16xf32, #tpu.memory_space<vmem>>, vector<1x16xf32>,
    %c0_218 = arith.constant 0 : index
    %c0_219 = arith.constant 0 : index
    %633 = vector.load %arg3[%c0_218, %c0_219] : memref<8x8xf32, #tpu.memory_space<vmem>>, vector<8x8xf32>
    %c0_220 = arith.constant 0 : index
    %c0_221 = arith.constant 0 : index
    %634 = vector.load %arg13[%c0_220, %c0_221] : memref<8x96xf32, #tpu.memory_space<vmem>>, vector<8x96xf32>
    %cst_222 = arith.constant dense<0.000000e+00> : vector<8x96xf32>
    %635 = tpu.matmul %633, %634, %cst_222 {dimension_numbers = #tpu.dot_dimension_numbers<[1], [0], [0], [1], [0, 0, 1, 1], [], []>} : vector<8x8xf32>, vector<8x96xf32>, vector<8x96xf32> -> vector<8x96xf32>
    %c0_223 = arith.constant 0 : index
    %c0_224 = arith.constant 0 : index
    %636 = vector.load %arg24[%c0_223, %c0_224] : memref<8x16xf32, #tpu.memory_space<vmem>>, vector<8x16xf32>
    %c0_225 = arith.constant 0 : index
    %c0_226 = arith.constant 0 : index
    %637 = vector.load %arg14[%c0_225, %c0_226] : memref<16x96xf32, #tpu.memory_space<vmem>>, vector<16x96xf32>
    %cst_227 = arith.constant dense<0.000000e+00> : vector<8x96xf32>
    %638 = tpu.matmul %636, %637, %cst_227 {dimension_numbers = #tpu.dot_dimension_numbers<[1], [0], [0], [1], [0, 0, 1, 1], [], []>} : vector<8x16xf32>, vector<16x96xf32>, vector<8x96xf32> -> vector<8x96xf32>
    %639 = arith.addf %635, %638 : vector<8x96xf32>
    %c0_228 = arith.constant 0 : index
    %c0_229 = arith.constant 0 : index
    %640 = vector.load %arg16[%c0_228, %c0_229] : memref<1x96xf32, #tpu.memory_space<vmem>>, vector<1x96xf32>
    %641 = vector.broadcast %640 : vector<1x96xf32> to vector<8x96xf32>
    %642 = arith.addf %639, %641 : vector<8x96xf32>
    %c0_230 = arith.constant 0 : index
    %c0_231 = arith.constant 0 : index
    %643 = vector.load %arg25[%c0_230, %c0_231] : memref<8x96xf32, #tpu.memory_space<vmem>>, vector<8x96xf32>
    tpu.vector_store %arg25[%c0_230, %c0_231], %642 {strides = array<i32>} : memref<8x96xf32, #tpu.memory_space<vmem>>, vector<8x96xf32>,
    %c0_232 = arith.constant 0 : index
    %c0_233 = arith.constant 0 : index
    %644 = vector.load %arg15[%c0_232, %c0_233] : memref<32x96xf32, #tpu.memory_space<vmem>>, vector<32x96xf32>
    %c0_234 = arith.constant 0 : index
    %c0_235 = arith.constant 0 : index
    %645 = vector.load %arg17[%c0_234, %c0_235] : memref<1x32xf32, #tpu.memory_space<vmem>>, vector<1x32xf32>
    %cst_236 = arith.constant 0.000000e+00 : f32
    %646 = vector.broadcast %cst_236 : f32 to vector<1x32xf32>
    %cst_237 = arith.constant dense<0.000000e+00> : vector<1x96xf32>
    %647 = tpu.matmul %646, %644, %cst_237 {dimension_numbers = #tpu.dot_dimension_numbers<[1], [0], [0], [1], [0, 0, 1, 1], [], []>} : vector<1x32xf32>, vector<32x96xf32>, vector<1x96xf32> -> vector<1x96xf32>
    %c0_238 = arith.constant 0 : index
    %c0_239 = arith.constant 0 : index
    %648 = vector.load %arg25[%c0_238, %c0_239] : memref<8x96xf32, #tpu.memory_space<vmem>>, vector<1x96xf32>
    %649 = vector.extract_strided_slice %648 {offsets = [0, 0], sizes = [1, 64], strides = [1, 1]} : vector<1x96xf32> to vector<1x64xf32>
    %650 = vector.extract_strided_slice %647 {offsets = [0, 0], sizes = [1, 64], strides = [1, 1]} : vector<1x96xf32> to vector<1x64xf32>
    %651 = arith.addf %649, %650 : vector<1x64xf32>
    %652 = arith.negf %651 : vector<1x64xf32>
    %653 = math.exp %652 : vector<1x64xf32>
    %cst_240 = arith.constant 1.000000e+00 : f32
    %654 = vector.broadcast %cst_240 : f32 to vector<1x64xf32>
    %655 = arith.addf %654, %653 : vector<1x64xf32>
    %656 = arith.divf %654, %655 : vector<1x64xf32>
    %657 = vector.extract_strided_slice %656 {offsets = [0, 0], sizes = [1, 32], strides = [1, 1]} : vector<1x64xf32> to vector<1x32xf32>
    %658 = vector.extract_strided_slice %656 {offsets = [0, 32], sizes = [1, 32], strides = [1, 1]} : vector<1x64xf32> to vector<1x32xf32>
    %659 = vector.extract_strided_slice %648 {offsets = [0, 64], sizes = [1, 32], strides = [1, 1]} : vector<1x96xf32> to vector<1x32xf32>
    %660 = vector.extract_strided_slice %647 {offsets = [0, 64], sizes = [1, 32], strides = [1, 1]} : vector<1x96xf32> to vector<1x32xf32>
    %661 = arith.addf %660, %645 : vector<1x32xf32>
    %662 = arith.mulf %657, %661 : vector<1x32xf32>
    %663 = arith.addf %659, %662 : vector<1x32xf32>
    %664 = math.tanh %663 : vector<1x32xf32>
    %cst_241 = arith.constant 1.000000e+00 : f32
    %665 = vector.broadcast %cst_241 : f32 to vector<1x32xf32>
    %666 = arith.subf %665, %658 : vector<1x32xf32>
    %667 = arith.mulf %666, %664 : vector<1x32xf32>
    %668 = arith.mulf %658, %646 : vector<1x32xf32>
    %669 = arith.addf %667, %668 : vector<1x32xf32>
    %cst_242 = arith.constant dense<0.000000e+00> : vector<1x96xf32>
    %670 = tpu.matmul %669, %644, %cst_242 {dimension_numbers = #tpu.dot_dimension_numbers<[1], [0], [0], [1], [0, 0, 1, 1], [], []>} : vector<1x32xf32>, vector<32x96xf32>, vector<1x96xf32> -> vector<1x96xf32>
    %c1_243 = arith.constant 1 : index
    %c0_244 = arith.constant 0 : index
    %671 = vector.load %arg25[%c1_243, %c0_244] : memref<8x96xf32, #tpu.memory_space<vmem>>, vector<1x96xf32>
    %672 = vector.extract_strided_slice %671 {offsets = [0, 0], sizes = [1, 64], strides = [1, 1]} : vector<1x96xf32> to vector<1x64xf32>
    %673 = vector.extract_strided_slice %670 {offsets = [0, 0], sizes = [1, 64], strides = [1, 1]} : vector<1x96xf32> to vector<1x64xf32>
    %674 = arith.addf %672, %673 : vector<1x64xf32>
    %675 = arith.negf %674 : vector<1x64xf32>
    %676 = math.exp %675 : vector<1x64xf32>
    %cst_245 = arith.constant 1.000000e+00 : f32
    %677 = vector.broadcast %cst_245 : f32 to vector<1x64xf32>
    %678 = arith.addf %677, %676 : vector<1x64xf32>
    %679 = arith.divf %677, %678 : vector<1x64xf32>
    %680 = vector.extract_strided_slice %679 {offsets = [0, 0], sizes = [1, 32], strides = [1, 1]} : vector<1x64xf32> to vector<1x32xf32>
    %681 = vector.extract_strided_slice %679 {offsets = [0, 32], sizes = [1, 32], strides = [1, 1]} : vector<1x64xf32> to vector<1x32xf32>
    %682 = vector.extract_strided_slice %671 {offsets = [0, 64], sizes = [1, 32], strides = [1, 1]} : vector<1x96xf32> to vector<1x32xf32>
    %683 = vector.extract_strided_slice %670 {offsets = [0, 64], sizes = [1, 32], strides = [1, 1]} : vector<1x96xf32> to vector<1x32xf32>
    %684 = arith.addf %683, %645 : vector<1x32xf32>
    %685 = arith.mulf %680, %684 : vector<1x32xf32>
    %686 = arith.addf %682, %685 : vector<1x32xf32>
    %687 = math.tanh %686 : vector<1x32xf32>
    %cst_246 = arith.constant 1.000000e+00 : f32
    %688 = vector.broadcast %cst_246 : f32 to vector<1x32xf32>
    %689 = arith.subf %688, %681 : vector<1x32xf32>
    %690 = arith.mulf %689, %687 : vector<1x32xf32>
    %691 = arith.mulf %681, %669 : vector<1x32xf32>
    %692 = arith.addf %690, %691 : vector<1x32xf32>
    %cst_247 = arith.constant dense<0.000000e+00> : vector<1x96xf32>
    %693 = tpu.matmul %692, %644, %cst_247 {dimension_numbers = #tpu.dot_dimension_numbers<[1], [0], [0], [1], [0, 0, 1, 1], [], []>} : vector<1x32xf32>, vector<32x96xf32>, vector<1x96xf32> -> vector<1x96xf32>
    %c2_248 = arith.constant 2 : index
    %c0_249 = arith.constant 0 : index
    %694 = vector.load %arg25[%c2_248, %c0_249] : memref<8x96xf32, #tpu.memory_space<vmem>>, vector<1x96xf32>
    %695 = vector.extract_strided_slice %694 {offsets = [0, 0], sizes = [1, 64], strides = [1, 1]} : vector<1x96xf32> to vector<1x64xf32>
    %696 = vector.extract_strided_slice %693 {offsets = [0, 0], sizes = [1, 64], strides = [1, 1]} : vector<1x96xf32> to vector<1x64xf32>
    %697 = arith.addf %695, %696 : vector<1x64xf32>
    %698 = arith.negf %697 : vector<1x64xf32>
    %699 = math.exp %698 : vector<1x64xf32>
    %cst_250 = arith.constant 1.000000e+00 : f32
    %700 = vector.broadcast %cst_250 : f32 to vector<1x64xf32>
    %701 = arith.addf %700, %699 : vector<1x64xf32>
    %702 = arith.divf %700, %701 : vector<1x64xf32>
    %703 = vector.extract_strided_slice %702 {offsets = [0, 0], sizes = [1, 32], strides = [1, 1]} : vector<1x64xf32> to vector<1x32xf32>
    %704 = vector.extract_strided_slice %702 {offsets = [0, 32], sizes = [1, 32], strides = [1, 1]} : vector<1x64xf32> to vector<1x32xf32>
    %705 = vector.extract_strided_slice %694 {offsets = [0, 64], sizes = [1, 32], strides = [1, 1]} : vector<1x96xf32> to vector<1x32xf32>
    %706 = vector.extract_strided_slice %693 {offsets = [0, 64], sizes = [1, 32], strides = [1, 1]} : vector<1x96xf32> to vector<1x32xf32>
    %707 = arith.addf %706, %645 : vector<1x32xf32>
    %708 = arith.mulf %703, %707 : vector<1x32xf32>
    %709 = arith.addf %705, %708 : vector<1x32xf32>
    %710 = math.tanh %709 : vector<1x32xf32>
    %cst_251 = arith.constant 1.000000e+00 : f32
    %711 = vector.broadcast %cst_251 : f32 to vector<1x32xf32>
    %712 = arith.subf %711, %704 : vector<1x32xf32>
    %713 = arith.mulf %712, %710 : vector<1x32xf32>
    %714 = arith.mulf %704, %692 : vector<1x32xf32>
    %715 = arith.addf %713, %714 : vector<1x32xf32>
    %cst_252 = arith.constant dense<0.000000e+00> : vector<1x96xf32>
    %716 = tpu.matmul %715, %644, %cst_252 {dimension_numbers = #tpu.dot_dimension_numbers<[1], [0], [0], [1], [0, 0, 1, 1], [], []>} : vector<1x32xf32>, vector<32x96xf32>, vector<1x96xf32> -> vector<1x96xf32>
    %c3_253 = arith.constant 3 : index
    %c0_254 = arith.constant 0 : index
    %717 = vector.load %arg25[%c3_253, %c0_254] : memref<8x96xf32, #tpu.memory_space<vmem>>, vector<1x96xf32>
    %718 = vector.extract_strided_slice %717 {offsets = [0, 0], sizes = [1, 64], strides = [1, 1]} : vector<1x96xf32> to vector<1x64xf32>
    %719 = vector.extract_strided_slice %716 {offsets = [0, 0], sizes = [1, 64], strides = [1, 1]} : vector<1x96xf32> to vector<1x64xf32>
    %720 = arith.addf %718, %719 : vector<1x64xf32>
    %721 = arith.negf %720 : vector<1x64xf32>
    %722 = math.exp %721 : vector<1x64xf32>
    %cst_255 = arith.constant 1.000000e+00 : f32
    %723 = vector.broadcast %cst_255 : f32 to vector<1x64xf32>
    %724 = arith.addf %723, %722 : vector<1x64xf32>
    %725 = arith.divf %723, %724 : vector<1x64xf32>
    %726 = vector.extract_strided_slice %725 {offsets = [0, 0], sizes = [1, 32], strides = [1, 1]} : vector<1x64xf32> to vector<1x32xf32>
    %727 = vector.extract_strided_slice %725 {offsets = [0, 32], sizes = [1, 32], strides = [1, 1]} : vector<1x64xf32> to vector<1x32xf32>
    %728 = vector.extract_strided_slice %717 {offsets = [0, 64], sizes = [1, 32], strides = [1, 1]} : vector<1x96xf32> to vector<1x32xf32>
    %729 = vector.extract_strided_slice %716 {offsets = [0, 64], sizes = [1, 32], strides = [1, 1]} : vector<1x96xf32> to vector<1x32xf32>
    %730 = arith.addf %729, %645 : vector<1x32xf32>
    %731 = arith.mulf %726, %730 : vector<1x32xf32>
    %732 = arith.addf %728, %731 : vector<1x32xf32>
    %733 = math.tanh %732 : vector<1x32xf32>
    %cst_256 = arith.constant 1.000000e+00 : f32
    %734 = vector.broadcast %cst_256 : f32 to vector<1x32xf32>
    %735 = arith.subf %734, %727 : vector<1x32xf32>
    %736 = arith.mulf %735, %733 : vector<1x32xf32>
    %737 = arith.mulf %727, %715 : vector<1x32xf32>
    %738 = arith.addf %736, %737 : vector<1x32xf32>
    %cst_257 = arith.constant dense<0.000000e+00> : vector<1x96xf32>
    %739 = tpu.matmul %738, %644, %cst_257 {dimension_numbers = #tpu.dot_dimension_numbers<[1], [0], [0], [1], [0, 0, 1, 1], [], []>} : vector<1x32xf32>, vector<32x96xf32>, vector<1x96xf32> -> vector<1x96xf32>
    %c4_258 = arith.constant 4 : index
    %c0_259 = arith.constant 0 : index
    %740 = vector.load %arg25[%c4_258, %c0_259] : memref<8x96xf32, #tpu.memory_space<vmem>>, vector<1x96xf32>
    %741 = vector.extract_strided_slice %740 {offsets = [0, 0], sizes = [1, 64], strides = [1, 1]} : vector<1x96xf32> to vector<1x64xf32>
    %742 = vector.extract_strided_slice %739 {offsets = [0, 0], sizes = [1, 64], strides = [1, 1]} : vector<1x96xf32> to vector<1x64xf32>
    %743 = arith.addf %741, %742 : vector<1x64xf32>
    %744 = arith.negf %743 : vector<1x64xf32>
    %745 = math.exp %744 : vector<1x64xf32>
    %cst_260 = arith.constant 1.000000e+00 : f32
    %746 = vector.broadcast %cst_260 : f32 to vector<1x64xf32>
    %747 = arith.addf %746, %745 : vector<1x64xf32>
    %748 = arith.divf %746, %747 : vector<1x64xf32>
    %749 = vector.extract_strided_slice %748 {offsets = [0, 0], sizes = [1, 32], strides = [1, 1]} : vector<1x64xf32> to vector<1x32xf32>
    %750 = vector.extract_strided_slice %748 {offsets = [0, 32], sizes = [1, 32], strides = [1, 1]} : vector<1x64xf32> to vector<1x32xf32>
    %751 = vector.extract_strided_slice %740 {offsets = [0, 64], sizes = [1, 32], strides = [1, 1]} : vector<1x96xf32> to vector<1x32xf32>
    %752 = vector.extract_strided_slice %739 {offsets = [0, 64], sizes = [1, 32], strides = [1, 1]} : vector<1x96xf32> to vector<1x32xf32>
    %753 = arith.addf %752, %645 : vector<1x32xf32>
    %754 = arith.mulf %749, %753 : vector<1x32xf32>
    %755 = arith.addf %751, %754 : vector<1x32xf32>
    %756 = math.tanh %755 : vector<1x32xf32>
    %cst_261 = arith.constant 1.000000e+00 : f32
    %757 = vector.broadcast %cst_261 : f32 to vector<1x32xf32>
    %758 = arith.subf %757, %750 : vector<1x32xf32>
    %759 = arith.mulf %758, %756 : vector<1x32xf32>
    %760 = arith.mulf %750, %738 : vector<1x32xf32>
    %761 = arith.addf %759, %760 : vector<1x32xf32>
    %cst_262 = arith.constant dense<0.000000e+00> : vector<1x96xf32>
    %762 = tpu.matmul %761, %644, %cst_262 {dimension_numbers = #tpu.dot_dimension_numbers<[1], [0], [0], [1], [0, 0, 1, 1], [], []>} : vector<1x32xf32>, vector<32x96xf32>, vector<1x96xf32> -> vector<1x96xf32>
    %c5_263 = arith.constant 5 : index
    %c0_264 = arith.constant 0 : index
    %763 = vector.load %arg25[%c5_263, %c0_264] : memref<8x96xf32, #tpu.memory_space<vmem>>, vector<1x96xf32>
    %764 = vector.extract_strided_slice %763 {offsets = [0, 0], sizes = [1, 64], strides = [1, 1]} : vector<1x96xf32> to vector<1x64xf32>
    %765 = vector.extract_strided_slice %762 {offsets = [0, 0], sizes = [1, 64], strides = [1, 1]} : vector<1x96xf32> to vector<1x64xf32>
    %766 = arith.addf %764, %765 : vector<1x64xf32>
    %767 = arith.negf %766 : vector<1x64xf32>
    %768 = math.exp %767 : vector<1x64xf32>
    %cst_265 = arith.constant 1.000000e+00 : f32
    %769 = vector.broadcast %cst_265 : f32 to vector<1x64xf32>
    %770 = arith.addf %769, %768 : vector<1x64xf32>
    %771 = arith.divf %769, %770 : vector<1x64xf32>
    %772 = vector.extract_strided_slice %771 {offsets = [0, 0], sizes = [1, 32], strides = [1, 1]} : vector<1x64xf32> to vector<1x32xf32>
    %773 = vector.extract_strided_slice %771 {offsets = [0, 32], sizes = [1, 32], strides = [1, 1]} : vector<1x64xf32> to vector<1x32xf32>
    %774 = vector.extract_strided_slice %763 {offsets = [0, 64], sizes = [1, 32], strides = [1, 1]} : vector<1x96xf32> to vector<1x32xf32>
    %775 = vector.extract_strided_slice %762 {offsets = [0, 64], sizes = [1, 32], strides = [1, 1]} : vector<1x96xf32> to vector<1x32xf32>
    %776 = arith.addf %775, %645 : vector<1x32xf32>
    %777 = arith.mulf %772, %776 : vector<1x32xf32>
    %778 = arith.addf %774, %777 : vector<1x32xf32>
    %779 = math.tanh %778 : vector<1x32xf32>
    %cst_266 = arith.constant 1.000000e+00 : f32
    %780 = vector.broadcast %cst_266 : f32 to vector<1x32xf32>
    %781 = arith.subf %780, %773 : vector<1x32xf32>
    %782 = arith.mulf %781, %779 : vector<1x32xf32>
    %783 = arith.mulf %773, %761 : vector<1x32xf32>
    %784 = arith.addf %782, %783 : vector<1x32xf32>
    %cst_267 = arith.constant dense<0.000000e+00> : vector<1x96xf32>
    %785 = tpu.matmul %784, %644, %cst_267 {dimension_numbers = #tpu.dot_dimension_numbers<[1], [0], [0], [1], [0, 0, 1, 1], [], []>} : vector<1x32xf32>, vector<32x96xf32>, vector<1x96xf32> -> vector<1x96xf32>
    %c6_268 = arith.constant 6 : index
    %c0_269 = arith.constant 0 : index
    %786 = vector.load %arg25[%c6_268, %c0_269] : memref<8x96xf32, #tpu.memory_space<vmem>>, vector<1x96xf32>
    %787 = vector.extract_strided_slice %786 {offsets = [0, 0], sizes = [1, 64], strides = [1, 1]} : vector<1x96xf32> to vector<1x64xf32>
    %788 = vector.extract_strided_slice %785 {offsets = [0, 0], sizes = [1, 64], strides = [1, 1]} : vector<1x96xf32> to vector<1x64xf32>
    %789 = arith.addf %787, %788 : vector<1x64xf32>
    %790 = arith.negf %789 : vector<1x64xf32>
    %791 = math.exp %790 : vector<1x64xf32>
    %cst_270 = arith.constant 1.000000e+00 : f32
    %792 = vector.broadcast %cst_270 : f32 to vector<1x64xf32>
    %793 = arith.addf %792, %791 : vector<1x64xf32>
    %794 = arith.divf %792, %793 : vector<1x64xf32>
    %795 = vector.extract_strided_slice %794 {offsets = [0, 0], sizes = [1, 32], strides = [1, 1]} : vector<1x64xf32> to vector<1x32xf32>
    %796 = vector.extract_strided_slice %794 {offsets = [0, 32], sizes = [1, 32], strides = [1, 1]} : vector<1x64xf32> to vector<1x32xf32>
    %797 = vector.extract_strided_slice %786 {offsets = [0, 64], sizes = [1, 32], strides = [1, 1]} : vector<1x96xf32> to vector<1x32xf32>
    %798 = vector.extract_strided_slice %785 {offsets = [0, 64], sizes = [1, 32], strides = [1, 1]} : vector<1x96xf32> to vector<1x32xf32>
    %799 = arith.addf %798, %645 : vector<1x32xf32>
    %800 = arith.mulf %795, %799 : vector<1x32xf32>
    %801 = arith.addf %797, %800 : vector<1x32xf32>
    %802 = math.tanh %801 : vector<1x32xf32>
    %cst_271 = arith.constant 1.000000e+00 : f32
    %803 = vector.broadcast %cst_271 : f32 to vector<1x32xf32>
    %804 = arith.subf %803, %796 : vector<1x32xf32>
    %805 = arith.mulf %804, %802 : vector<1x32xf32>
    %806 = arith.mulf %796, %784 : vector<1x32xf32>
    %807 = arith.addf %805, %806 : vector<1x32xf32>
    %cst_272 = arith.constant dense<0.000000e+00> : vector<1x96xf32>
    %808 = tpu.matmul %807, %644, %cst_272 {dimension_numbers = #tpu.dot_dimension_numbers<[1], [0], [0], [1], [0, 0, 1, 1], [], []>} : vector<1x32xf32>, vector<32x96xf32>, vector<1x96xf32> -> vector<1x96xf32>
    %c7_273 = arith.constant 7 : index
    %c0_274 = arith.constant 0 : index
    %809 = vector.load %arg25[%c7_273, %c0_274] : memref<8x96xf32, #tpu.memory_space<vmem>>, vector<1x96xf32>
    %810 = vector.extract_strided_slice %809 {offsets = [0, 0], sizes = [1, 64], strides = [1, 1]} : vector<1x96xf32> to vector<1x64xf32>
    %811 = vector.extract_strided_slice %808 {offsets = [0, 0], sizes = [1, 64], strides = [1, 1]} : vector<1x96xf32> to vector<1x64xf32>
    %812 = arith.addf %810, %811 : vector<1x64xf32>
    %813 = arith.negf %812 : vector<1x64xf32>
    %814 = math.exp %813 : vector<1x64xf32>
    %cst_275 = arith.constant 1.000000e+00 : f32
    %815 = vector.broadcast %cst_275 : f32 to vector<1x64xf32>
    %816 = arith.addf %815, %814 : vector<1x64xf32>
    %817 = arith.divf %815, %816 : vector<1x64xf32>
    %818 = vector.extract_strided_slice %817 {offsets = [0, 0], sizes = [1, 32], strides = [1, 1]} : vector<1x64xf32> to vector<1x32xf32>
    %819 = vector.extract_strided_slice %817 {offsets = [0, 32], sizes = [1, 32], strides = [1, 1]} : vector<1x64xf32> to vector<1x32xf32>
    %820 = vector.extract_strided_slice %809 {offsets = [0, 64], sizes = [1, 32], strides = [1, 1]} : vector<1x96xf32> to vector<1x32xf32>
    %821 = vector.extract_strided_slice %808 {offsets = [0, 64], sizes = [1, 32], strides = [1, 1]} : vector<1x96xf32> to vector<1x32xf32>
    %822 = arith.addf %821, %645 : vector<1x32xf32>
    %823 = arith.mulf %818, %822 : vector<1x32xf32>
    %824 = arith.addf %820, %823 : vector<1x32xf32>
    %825 = math.tanh %824 : vector<1x32xf32>
    %cst_276 = arith.constant 1.000000e+00 : f32
    %826 = vector.broadcast %cst_276 : f32 to vector<1x32xf32>
    %827 = arith.subf %826, %819 : vector<1x32xf32>
    %828 = arith.mulf %827, %825 : vector<1x32xf32>
    %829 = arith.mulf %819, %807 : vector<1x32xf32>
    %830 = arith.addf %828, %829 : vector<1x32xf32>
    %c0_277 = arith.constant 0 : index
    %c0_278 = arith.constant 0 : index
    %831 = vector.load %arg19[%c0_277, %c0_278] : memref<1x32xf32, #tpu.memory_space<vmem>>, vector<1x32xf32>
    tpu.vector_store %arg19[%c0_277, %c0_278], %830 {strides = array<i32>} : memref<1x32xf32, #tpu.memory_space<vmem>>, vector<1x32xf32>,
    return
  }
}

</mosaic_0001>

<bundles_post_ra>
// kernel: graph_gru_forward.1
= control target key start
LH: loop header
LB: loop body
LE: loop exit
PB: predicated region body
PF: predicated region fallthrough
CT: control target
= control target key end

     0   :  { %s5445_s0 = inlined_call_operand.vmem [shape: s32[8], index: 0, kind: input, shape index: {}]   ;;  %s5446_s1 = inlined_call_operand.vmem [shape: f32[16,8], index: 1, kind: input, shape index: {}]   ;;  %s5447_s2 = inlined_call_operand.vmem [shape: f32[8,8], index: 2, kind: input, shape index: {}]   ;;  %s5448_s3 = inlined_call_operand.vmem [shape: f32[8,8], index: 3, kind: input, shape index: {}]   ;;  %s5449_s4 = inlined_call_operand.vmem [shape: f32[8,48], index: 4, kind: input, shape index: {}]   ;;  %s5450_s5 = inlined_call_operand.vmem [shape: f32[16,48], index: 5, kind: input, shape index: {}]   ;;  %s5451_s6 = inlined_call_operand.vmem [shape: f32[1,48], index: 6, kind: input, shape index: {}]   ;;  %s5452_s7 = inlined_call_operand.vmem [shape: f32[1,16], index: 7, kind: input, shape index: {}]   ;;  %s5453_s8 = inlined_call_operand.vmem [shape: f32[8,48], index: 8, kind: input, shape index: {}]   ;;  %s5454_s9 = inlined_call_operand.vmem [shape: f32[16,48], index: 9, kind: input, shape index: {}]   ;;  %s5455_s10 = inlined_call_operand.vmem [shape: f32[16,48], index: 10, kind: input, shape index: {}]   ;;  %s5456_s11 = inlined_call_operand.vmem [shape: f32[1,48], index: 11, kind: input, shape index: {}]   ;;  %s5457_s12 = inlined_call_operand.vmem [shape: f32[1,16], index: 12, kind: input, shape index: {}]   ;;  %s5458_s13 = inlined_call_operand.vmem [shape: f32[8,96], index: 13, kind: input, shape index: {}]   ;;  %s5459_s14 = inlined_call_operand.vmem [shape: f32[16,96], index: 14, kind: input, shape index: {}]   ;;  %s5460_s15 = inlined_call_operand.vmem [shape: f32[32,96], index: 15, kind: input, shape index: {}]   ;;  %s5461_s16 = inlined_call_operand.vmem [shape: f32[1,96], index: 16, kind: input, shape index: {}]   ;;  %s5462_s17 = inlined_call_operand.vmem [shape: f32[1,32], index: 17, kind: input, shape index: {}]   ;;  %s5463_s18 = inlined_call_operand.hbm [shape: f32[1,16], index: 18, kind: output, shape index: {0}]   ;;  %s5464_s19 = inlined_call_operand.hbm [shape: f32[1,32], index: 19, kind: output, shape index: {1}]  }
   0x1   :  { %5466 = sst [smem:[#allocation17_spill]] %s5445_s0 }
   0x2   :  { %5467 = sst [smem:[#allocation18_spill]] %s5446_s1 }
   0x3   :  { %5468 = sst [smem:[#allocation19_spill]] %s5447_s2 }
   0x4   :  { %5469 = sst [smem:[#allocation20_spill]] %s5448_s3 }
   0x5   :  { %25 = vsyncpa [#allocation10], 0 }
   0x6   :  { %26 = vsyncpa [#allocation9], 0 }
   0x7   :  { %27 = vsyncpa [#allocation13], 0  ;;  %s5470_s20 = sld [smem:[#allocation17_spill]] }
   0xd   :  { %s34_s21 = sshll.u32 %s5470_s20, 4  ;;  %s35_s21 = int_to_ptr.vmem [resolvable:$true] %s34_s21 }
   0xe   :  { %s4764_s1 = scalar_lea.vmem %s35_s21, 16  ;;  %p4769_p1 = scmp.lt.s32.totalorder %s35_s21, %s35_s21 }
   0xf   :  { %p4765_p0 = scmp.ne.s32.totalorder %s35_s21, %s4764_s1  ;;  %p4770_p2 = scmp.lt.s32.totalorder %s4764_s1, %s4764_s1 }
  0x11   :  { %p4771_p3 = por %p4770_p2, %p4769_p1 }
  0x13   :  { %p4772_p4 = pnand %p4771_p3, %p4765_p0 }
  0x15   :  { %4775 = shalt.err (!%p4772_p4)
}
  0x16   :  { %s4826_s22 = smov [#allocation8]  }
  0x17   :  { %37 = dma.vmem_to_smem %s35_s21, 16, %s4826_s22, [#allocation10]  }
  0x18   :  { %4820 = dma.done.wait [#allocation10], 16  }
  0x19   :  { %4821 = vsyncadd [#allocation10], 4294967280 }
  0x1a   :  { %75 = sfence }
  0x1b   :  { %v78_v0 = vld [vmem:[%s5449_s4] sm:$0xff]  ;;  %s5471_s3 = sld [smem:[#allocation18_spill]]  ;;  %vm86_vm0 = vcmask 64512   ;;  %v172_v4 = vld [vmem:[%s5450_s5 + $0x8] sm:$0xff]  ;;  %v4827_v6 = vmov 0.0|0.0   ;;  %vm4828_vm1 = vmmov 0  }
  0x1c   :  { %4151 = vmatprep.subr.mxu0 %v78_v0  ;;  %v171_v3 = vld [vmem:[%s5450_s5] sm:$0xff]  ;;  %4436 = vmatprep.subr.bf16.mxu1 %v4827_v6  ;;  %v4829_v8 = vmov 0.0   ;;  %s4830_s5 = smov 32   ;;  %vm168_vm2 = vcmask 392192   ;;  %s4831_s1 = smov 96   ;;  %vm288_vm3 = vcmask 122880  }
  0x1d   :  { %v3950_v5 = vld [vmem:[%s5452_s7] ss:$0 sm:$0xff]  ;;  %4152 = vmatpush3.msra.mxu0 %v78_v0  ;;  %v4959_v7 = vpack.c.bf16 %v172_v4, %v171_v3  ;;  %4160 = vmatprep.mubr.msk.f32.mxu1 %vm4828_vm1, %v4829_v8  ;;  %vm174_vm4 = vcmask 130048   ;;  %s5472_s0 = sld [smem:[#allocation19_spill]]  ;;  %s3981_s20 = sld [smem:[#allocation8 + $0x1]]  ;;  %vm3066_vm5 = vcmask 785408  }
  0x1e   :  { %261 = vrot.lane.b32.xlu0 %v3950_v5, %s4830_s5  ;;  %4439 = vmatprep.subr.bf16.mxu0 %v4827_v6  ;;  %v3946_v9 = vld [vmem:[%s5451_s6] ss:$0 sm:$0xff]  ;;  %s4832_s6 = smov 112   ;;  %s3982_s7 = sld [smem:[#allocation8 + $0x2]]  ;;  %vm3073_vm6 = vcmask 261120  }
  0x1f   :  { %4438 = vmatpush3.bf16.msra.mxu1 %v4959_v7  ;;  %s3983_s21 = sld [smem:[#allocation8 + $0x3]]  ;;  %s3984_s22 = sld [smem:[#allocation8 + $0x4]] }
  0x20   :  { %4442 = vmatprep.subr.bf16.mxu1 %v4827_v6  ;;  %s3985_s2 = sld [smem:[#allocation8 + $0x5]]  ;;  %s3986_s23 = sld [smem:[#allocation8 + $0x6]] }
  0x21   :  { %v76_v1 = vld [vmem:[%s5471_s3] sm:$0xff]  ;;  %v77_v2 = vld [vmem:[%s5471_s3 + $0x8] sm:$0xff]  ;;  %s3987_s24 = sld [smem:[#allocation8 + $0x7]] }
  0x22   :  { %4153 = vmatprep.mubr.msk.f32.mxu0 %vm86_vm0, %v76_v1  ;;  %4161 = vmatmul.mubr.f32.vlgmr.msra.gmra.mrb[0].mxu1 %v4829_v8 }
  0x23   :  { %4154 = vmatmul.mubr.msk.f32.vlgmr.msra.gmra.mrb[0].mxu0 %vm86_vm0, %v77_v2  ;;  %4444 = vmatpush3.bf16.msra.mxu1 %v4959_v7  ;;  %s1871_s3 = scalar_lea.vmem [#allocation3], %s3981_s20 }
  0x24   :  { %4167 = vmatprep.mubr.msk.f32.mxu0 %vm4828_vm1, %v4829_v8  ;;  %4441 = vmatpush3.bf16.msra.mxu0 %v4959_v7 }
  0x25   :  { %4445 = vmatprep.subr.bf16.mxu0 %v4827_v6  ;;  %4174 = vmatprep.mubr.msk.f32.mxu1 %vm4828_vm1, %v4829_v8  ;;  %s1879_s26 = scalar_lea.vmem [#allocation3], %s3983_s21  ;;  %s1883_s27 = scalar_lea.vmem [#allocation3], %s3984_s22 }
  0x26   :  { %4448 = vmatprep.subr.bf16.mxu1 %v4827_v6  ;;  %s1887_s28 = scalar_lea.vmem [#allocation3], %s3985_s2 }
  0x27   :  { %s1895_s29 = scalar_lea.vmem [#allocation3], %s3987_s24 }
  0x90   :  { %v4980_v14 = vpop.permute.xlu0 %261 }
  0xf5   :  { %v244_v15 = vpop.f32.mrb[0].mxu1 }
  0xf6   :  { %v4155_v10 = vpop.f32.mrb[0].mxu0  ;;  %v264_v16 = vadd.f32 %v4980_v14, %v244_v15  ;;  %v4162_v17 = vpop.f32.mrb[1].mxu1 }
  0xf7   :  { %v165_v11 = vadd.f32 %v4155_v10, %v3946_v9  ;;  %v159_v12 = vpop.f32.mrb[1].mxu0 }
  0xf8   :  { %v160_v13 = vadd.f32 %v3946_v9, %v159_v12  ;;  %266 = vrot.lane.b32.xlu0 %v264_v16, %s4831_s1 }
  0xf9   :  { %170 = vst.msk [vmem:[#allocation2 + $0x8] sm:$0xff] %vm168_vm2, %v165_v11 }
  0xfa   :  { %169 = vst.msk [vmem:[#allocation2] sm:$0xff] %vm168_vm2, %v160_v13 }
 0x101   :  { %v248_v18 = vld [vmem:[#allocation2] sm:$0x1]  ;;  %v362_v38 = vld [vmem:[#allocation2 + $0x1] sm:$0x1]  ;;  %v467_v58 = vld [vmem:[#allocation2 + $0x2] sm:$0x1] }
 0x102   :  { %v249_v19 = vadd.f32 %v248_v18, %v244_v15 }
 0x104   :  { %v3949_v20 = vmul.f32 -1.442695, %v249_v19 }
 0x106   :  { %4572 = vpow2.f32 %v3949_v20 }
 0x110   :  { %v4573_v21 = vpop.eup %4572 }
 0x111   :  { %v253_v22 = vadd.f32 1.0, %v4573_v21 }
 0x113   :  { %4574 = vrcp.f32 %v253_v22 }
 0x11d   :  { %v4575_v23 = vpop.eup %4574 }
 0x11e   :  { %v276_v29 = vsub.f32 1.0, %v4575_v23  ;;  %v282_v31 = vmul.f32 0.0, %v4575_v23 }
 0x16a   :  { %v267_v24 = vpop.permute.xlu0 %266 }
 0x16b   :  { %v269_v25 = vmul.f32 %v4575_v23, %v267_v24 }
 0x16d   :  { %271 = vrot.lane.b32.xlu1 %v269_v25, %s4830_s5 }
 0x1df   :  { %v272_v26 = vpop.permute.xlu1 %271 }
 0x1e0   :  { %v274_v27 = vadd.f32 %v272_v26, %v248_v18  ;;  %v572_v18 = vld [vmem:[#allocation2 + $0x3] sm:$0x1] }
 0x1e2   :  { %4576 = vtanh.f32 %v274_v27 }
 0x1ec   :  { %v4577_v28 = vpop.eup %4576 }
 0x1ed   :  { %278 = vrot.lane.b32.xlu1 %v4577_v28, %s4832_s6 }
 0x25f   :  { %v279_v30 = vpop.permute.xlu1 %278 }
 0x260   :  { %v281_v32 = vmul.f32 %v279_v30, %v276_v29 }
 0x262   :  { %v283_v33 = vadd.f32 %v282_v31, %v281_v32 }
 0x264   :  { %285 = vrot.lane.b32.xlu0 %v283_v33, %s4832_s6 }
 0x2d6   :  { %v286_v34 = vpop.permute.xlu0 %285 }
 0x2d7   :  { %289 = vst.msk [vmem:[#allocation3] sm:$0x1] %vm288_vm3, %v286_v34  ;;  %4168 = vmatmul.mubr.msk.f32.vlgmr.msra.gmra.mrb[2].mxu0 %vm174_vm4, %v286_v34 }
 0x2d8   :  { %4447 = vmatpush3.bf16.msra.mxu0 %v4959_v7  ;;  %4181 = vmatprep.mubr.msk.f32.mxu0 %vm4828_vm1, %v4829_v8 }
 0x2d9   :  { %4451 = vmatprep.subr.bf16.mxu0 %v4827_v6 }
 0x3aa   :  { %v358_v35 = vpop.f32.mrb[2].mxu0 }
 0x3ab   :  { %v370_v36 = vadd.f32 %v358_v35, %v4980_v14  ;;  %v4169_v37 = vpop.f32.mrb[3].mxu0  ;;  %v363_v39 = vadd.f32 %v362_v38, %v358_v35 }
 0x3ad   :  { %372 = vrot.lane.b32.xlu1 %v370_v36, %s4831_s1  ;;  %v3952_v40 = vmul.f32 -1.442695, %v363_v39 }
 0x3af   :  { %4578 = vpow2.f32 %v3952_v40 }
 0x3b9   :  { %v4579_v41 = vpop.eup %4578 }
 0x3ba   :  { %v367_v42 = vadd.f32 1.0, %v4579_v41 }
 0x3bc   :  { %4580 = vrcp.f32 %v367_v42 }
 0x3c6   :  { %v4581_v43 = vpop.eup %4580 }
 0x3c7   :  { %v382_v49 = vsub.f32 1.0, %v4581_v43  ;;  %v388_v51 = vmul.f32 %v4581_v43, %v283_v33 }
 0x41f   :  { %v373_v44 = vpop.permute.xlu1 %372 }
 0x420   :  { %v375_v45 = vmul.f32 %v4581_v43, %v373_v44 }
 0x422   :  { %377 = vrot.lane.b32.xlu0 %v375_v45, %s4830_s5 }
 0x494   :  { %v378_v46 = vpop.permute.xlu0 %377 }
 0x495   :  { %v380_v47 = vadd.f32 %v378_v46, %v362_v38  ;;  %v677_v38 = vld [vmem:[#allocation2 + $0x4] sm:$0x1] }
 0x497   :  { %4582 = vtanh.f32 %v380_v47 }
 0x4a1   :  { %v4583_v48 = vpop.eup %4582 }
 0x4a2   :  { %384 = vrot.lane.b32.xlu1 %v4583_v48, %s4832_s6 }
 0x514   :  { %v385_v50 = vpop.permute.xlu1 %384 }
 0x515   :  { %v387_v52 = vmul.f32 %v385_v50, %v382_v49 }
 0x517   :  { %v389_v53 = vadd.f32 %v388_v51, %v387_v52 }
 0x519   :  { %391 = vrot.lane.b32.xlu0 %v389_v53, %s4832_s6 }
 0x58b   :  { %v392_v54 = vpop.permute.xlu0 %391 }
 0x58c   :  { %394 = vst.msk [vmem:[#allocation3 + $0x1] sm:$0x1] %vm288_vm3, %v392_v54  ;;  %4175 = vmatmul.mubr.msk.f32.vlgmr.msra.gmra.mrb[2].mxu1 %vm174_vm4, %v392_v54 }
 0x58d   :  { %4450 = vmatpush3.bf16.msra.mxu1 %v4959_v7  ;;  %4188 = vmatprep.mubr.msk.f32.mxu1 %vm4828_vm1, %v4829_v8 }
 0x58e   :  { %4454 = vmatprep.subr.bf16.mxu1 %v4827_v6 }
 0x65f   :  { %v463_v55 = vpop.f32.mrb[2].mxu1 }
 0x660   :  { %v475_v56 = vadd.f32 %v463_v55, %v4980_v14  ;;  %v4176_v57 = vpop.f32.mrb[3].mxu1  ;;  %v468_v59 = vadd.f32 %v467_v58, %v463_v55 }
 0x662   :  { %477 = vrot.lane.b32.xlu1 %v475_v56, %s4831_s1  ;;  %v3954_v60 = vmul.f32 -1.442695, %v468_v59 }
 0x664   :  { %4584 = vpow2.f32 %v3954_v60 }
 0x66e   :  { %v4585_v61 = vpop.eup %4584 }
 0x66f   :  { %v472_v62 = vadd.f32 1.0, %v4585_v61 }
 0x671   :  { %4586 = vrcp.f32 %v472_v62 }
 0x67b   :  { %v4587_v63 = vpop.eup %4586 }
 0x67c   :  { %v487_v5 = vsub.f32 1.0, %v4587_v63  ;;  %v493_v10 = vmul.f32 %v4587_v63, %v389_v53 }
 0x6d4   :  { %v478_v0 = vpop.permute.xlu1 %477 }
 0x6d5   :  { %v480_v1 = vmul.f32 %v4587_v63, %v478_v0 }
 0x6d7   :  { %482 = vrot.lane.b32.xlu0 %v480_v1, %s4830_s5 }
 0x749   :  { %v483_v2 = vpop.permute.xlu0 %482 }
 0x74a   :  { %v485_v3 = vadd.f32 %v483_v2, %v467_v58  ;;  %v782_v58 = vld [vmem:[#allocation2 + $0x5] sm:$0x1] }
 0x74c   :  { %4588 = vtanh.f32 %v485_v3 }
 0x756   :  { %v4589_v4 = vpop.eup %4588 }
 0x757   :  { %489 = vrot.lane.b32.xlu1 %v4589_v4, %s4832_s6 }
 0x7c9   :  { %v490_v9 = vpop.permute.xlu1 %489 }
 0x7ca   :  { %v492_v11 = vmul.f32 %v490_v9, %v487_v5 }
 0x7cc   :  { %v494_v12 = vadd.f32 %v493_v10, %v492_v11 }
 0x7ce   :  { %496 = vrot.lane.b32.xlu0 %v494_v12, %s4832_s6 }
 0x840   :  { %v497_v13 = vpop.permute.xlu0 %496 }
 0x841   :  { %499 = vst.msk [vmem:[#allocation3 + $0x2] sm:$0x1] %vm288_vm3, %v497_v13  ;;  %4182 = vmatmul.mubr.msk.f32.vlgmr.msra.gmra.mrb[4].mxu0 %vm174_vm4, %v497_v13 }
 0x842   :  { %4453 = vmatpush3.bf16.msra.mxu0 %v4959_v7  ;;  %4195 = vmatprep.mubr.msk.f32.mxu0 %vm4828_vm1, %v4829_v8 }
 0x843   :  { %4457 = vmatprep.subr.bf16.mxu0 %v4827_v6 }
 0x914   :  { %v568_v15 = vpop.f32.mrb[4].mxu0 }
 0x915   :  { %v580_v16 = vadd.f32 %v568_v15, %v4980_v14  ;;  %v4183_v17 = vpop.f32.mrb[5].mxu0  ;;  %v573_v19 = vadd.f32 %v572_v18, %v568_v15 }
 0x917   :  { %582 = vrot.lane.b32.xlu1 %v580_v16, %s4831_s1  ;;  %v3956_v20 = vmul.f32 -1.442695, %v573_v19 }
 0x919   :  { %4590 = vpow2.f32 %v3956_v20 }
 0x923   :  { %v4591_v21 = vpop.eup %4590 }
 0x924   :  { %v577_v22 = vadd.f32 1.0, %v4591_v21 }
 0x926   :  { %4592 = vrcp.f32 %v577_v22 }
 0x930   :  { %v4593_v23 = vpop.eup %4592 }
 0x931   :  { %v592_v29 = vsub.f32 1.0, %v4593_v23  ;;  %v598_v31 = vmul.f32 %v4593_v23, %v494_v12 }
 0x989   :  { %v583_v24 = vpop.permute.xlu1 %582 }
 0x98a   :  { %v585_v25 = vmul.f32 %v4593_v23, %v583_v24 }
 0x98c   :  { %587 = vrot.lane.b32.xlu0 %v585_v25, %s4830_s5 }
 0x9fe   :  { %v588_v26 = vpop.permute.xlu0 %587 }
 0x9ff   :  { %v590_v27 = vadd.f32 %v588_v26, %v572_v18  ;;  %v887_v18 = vld [vmem:[#allocation2 + $0x6] sm:$0x1] }
 0xa01   :  { %4594 = vtanh.f32 %v590_v27 }
 0xa0b   :  { %v4595_v28 = vpop.eup %4594 }
 0xa0c   :  { %594 = vrot.lane.b32.xlu1 %v4595_v28, %s4832_s6 }
 0xa7e   :  { %v595_v30 = vpop.permute.xlu1 %594 }
 0xa7f   :  { %v597_v32 = vmul.f32 %v595_v30, %v592_v29 }
 0xa81   :  { %v599_v33 = vadd.f32 %v598_v31, %v597_v32 }
 0xa83   :  { %601 = vrot.lane.b32.xlu0 %v599_v33, %s4832_s6 }
 0xaf5   :  { %v602_v34 = vpop.permute.xlu0 %601 }
 0xaf6   :  { %604 = vst.msk [vmem:[#allocation3 + $0x3] sm:$0x1] %vm288_vm3, %v602_v34  ;;  %4189 = vmatmul.mubr.msk.f32.vlgmr.msra.gmra.mrb[4].mxu1 %vm174_vm4, %v602_v34 }
 0xaf7   :  { %4456 = vmatpush3.bf16.msra.mxu1 %v4959_v7  ;;  %4202 = vmatprep.mubr.msk.f32.mxu1 %vm4828_vm1, %v4829_v8 }
 0xaf8   :  { %4460 = vmatprep.subr.bf16.mxu1 %v4827_v6 }
 0xbc9   :  { %v673_v35 = vpop.f32.mrb[4].mxu1 }
 0xbca   :  { %v685_v36 = vadd.f32 %v673_v35, %v4980_v14  ;;  %v4190_v37 = vpop.f32.mrb[5].mxu1  ;;  %v678_v39 = vadd.f32 %v677_v38, %v673_v35 }
 0xbcc   :  { %687 = vrot.lane.b32.xlu1 %v685_v36, %s4831_s1  ;;  %v3958_v40 = vmul.f32 -1.442695, %v678_v39 }
 0xbce   :  { %4596 = vpow2.f32 %v3958_v40 }
 0xbd8   :  { %v4597_v41 = vpop.eup %4596 }
 0xbd9   :  { %v682_v42 = vadd.f32 1.0, %v4597_v41 }
 0xbdb   :  { %4598 = vrcp.f32 %v682_v42 }
 0xbe5   :  { %v4599_v43 = vpop.eup %4598 }
 0xbe6   :  { %v697_v49 = vsub.f32 1.0, %v4599_v43  ;;  %v703_v51 = vmul.f32 %v4599_v43, %v599_v33 }
 0xc3e   :  { %v688_v44 = vpop.permute.xlu1 %687 }
 0xc3f   :  { %v690_v45 = vmul.f32 %v4599_v43, %v688_v44 }
 0xc41   :  { %692 = vrot.lane.b32.xlu0 %v690_v45, %s4830_s5 }
 0xcb3   :  { %v693_v46 = vpop.permute.xlu0 %692 }
 0xcb4   :  { %v695_v47 = vadd.f32 %v693_v46, %v677_v38  ;;  %v992_v38 = vld [vmem:[#allocation2 + $0x7] sm:$0x1] }
 0xcb6   :  { %4600 = vtanh.f32 %v695_v47 }
 0xcc0   :  { %v4601_v48 = vpop.eup %4600 }
 0xcc1   :  { %699 = vrot.lane.b32.xlu1 %v4601_v48, %s4832_s6 }
 0xd33   :  { %v700_v50 = vpop.permute.xlu1 %699 }
 0xd34   :  { %v702_v52 = vmul.f32 %v700_v50, %v697_v49 }
 0xd36   :  { %v704_v53 = vadd.f32 %v703_v51, %v702_v52 }
 0xd38   :  { %706 = vrot.lane.b32.xlu0 %v704_v53, %s4832_s6 }
 0xdaa   :  { %v707_v54 = vpop.permute.xlu0 %706 }
 0xdab   :  { %709 = vst.msk [vmem:[#allocation3 + $0x4] sm:$0x1] %vm288_vm3, %v707_v54  ;;  %4196 = vmatmul.mubr.msk.f32.vlgmr.msra.gmra.mrb[6].mxu0 %vm174_vm4, %v707_v54 }
 0xdac   :  { %4459 = vmatpush3.bf16.msra.mxu0 %v4959_v7  ;;  %4209 = vmatprep.mubr.msk.f32.mxu0 %vm4828_vm1, %v4829_v8 }
 0xdad   :  { %4463 = vmatprep.subr.bf16.mxu0 %v4827_v6 }
 0xe7e   :  { %v778_v55 = vpop.f32.mrb[6].mxu0 }
 0xe7f   :  { %v790_v56 = vadd.f32 %v778_v55, %v4980_v14  ;;  %v4197_v57 = vpop.f32.mrb[7].mxu0  ;;  %v783_v59 = vadd.f32 %v782_v58, %v778_v55 }
 0xe81   :  { %792 = vrot.lane.b32.xlu1 %v790_v56, %s4831_s1  ;;  %v3960_v60 = vmul.f32 -1.442695, %v783_v59 }
 0xe83   :  { %4602 = vpow2.f32 %v3960_v60 }
 0xe8d   :  { %v4603_v61 = vpop.eup %4602 }
 0xe8e   :  { %v787_v62 = vadd.f32 1.0, %v4603_v61 }
 0xe90   :  { %4604 = vrcp.f32 %v787_v62 }
 0xe9a   :  { %v4605_v63 = vpop.eup %4604 }
 0xe9b   :  { %v802_v5 = vsub.f32 1.0, %v4605_v63  ;;  %v808_v10 = vmul.f32 %v4605_v63, %v704_v53 }
 0xef3   :  { %v793_v0 = vpop.permute.xlu1 %792 }
 0xef4   :  { %v795_v1 = vmul.f32 %v4605_v63, %v793_v0 }
 0xef6   :  { %797 = vrot.lane.b32.xlu0 %v795_v1, %s4830_s5 }
 0xf68   :  { %v798_v2 = vpop.permute.xlu0 %797 }
 0xf69   :  { %v800_v3 = vadd.f32 %v798_v2, %v782_v58  ;;  %v1097_v58 = vld [vmem:[#allocation2 + $0x8] sm:$0x1] }
 0xf6b   :  { %4606 = vtanh.f32 %v800_v3 }
 0xf75   :  { %v4607_v4 = vpop.eup %4606 }
 0xf76   :  { %804 = vrot.lane.b32.xlu1 %v4607_v4, %s4832_s6 }
 0xfe8   :  { %v805_v9 = vpop.permute.xlu1 %804 }
 0xfe9   :  { %v807_v11 = vmul.f32 %v805_v9, %v802_v5 }
 0xfeb   :  { %v809_v12 = vadd.f32 %v808_v10, %v807_v11 }
 0xfed   :  { %811 = vrot.lane.b32.xlu0 %v809_v12, %s4832_s6 }
0x105f   :  { %v812_v13 = vpop.permute.xlu0 %811 }
0x1060   :  { %814 = vst.msk [vmem:[#allocation3 + $0x5] sm:$0x1] %vm288_vm3, %v812_v13  ;;  %4203 = vmatmul.mubr.msk.f32.vlgmr.msra.gmra.mrb[6].mxu1 %vm174_vm4, %v812_v13 }
0x1061   :  { %4462 = vmatpush3.bf16.msra.mxu1 %v4959_v7  ;;  %4216 = vmatprep.mubr.msk.f32.mxu1 %vm4828_vm1, %v4829_v8 }
0x1062   :  { %4466 = vmatprep.subr.bf16.mxu1 %v4827_v6 }
0x1133   :  { %v883_v15 = vpop.f32.mrb[6].mxu1 }
0x1134   :  { %v895_v16 = vadd.f32 %v883_v15, %v4980_v14  ;;  %v4204_v17 = vpop.f32.mrb[7].mxu1  ;;  %v888_v19 = vadd.f32 %v887_v18, %v883_v15 }
0x1136   :  { %897 = vrot.lane.b32.xlu1 %v895_v16, %s4831_s1  ;;  %v3962_v20 = vmul.f32 -1.442695, %v888_v19 }
0x1138   :  { %4608 = vpow2.f32 %v3962_v20 }
0x1142   :  { %v4609_v21 = vpop.eup %4608 }
0x1143   :  { %v892_v22 = vadd.f32 1.0, %v4609_v21 }
0x1145   :  { %4610 = vrcp.f32 %v892_v22 }
0x114f   :  { %v4611_v23 = vpop.eup %4610 }
0x1150   :  { %v907_v29 = vsub.f32 1.0, %v4611_v23  ;;  %v913_v31 = vmul.f32 %v4611_v23, %v809_v12 }
0x11a8   :  { %v898_v24 = vpop.permute.xlu1 %897 }
0x11a9   :  { %v900_v25 = vmul.f32 %v4611_v23, %v898_v24 }
0x11ab   :  { %902 = vrot.lane.b32.xlu0 %v900_v25, %s4830_s5 }
0x121d   :  { %v903_v26 = vpop.permute.xlu0 %902 }
0x121e   :  { %v905_v27 = vadd.f32 %v903_v26, %v887_v18  ;;  %v1202_v18 = vld [vmem:[#allocation2 + $0x9] sm:$0x1] }
0x1220   :  { %4612 = vtanh.f32 %v905_v27 }
0x122a   :  { %v4613_v28 = vpop.eup %4612 }
0x122b   :  { %909 = vrot.lane.b32.xlu1 %v4613_v28, %s4832_s6 }
0x129d   :  { %v910_v30 = vpop.permute.xlu1 %909 }
0x129e   :  { %v912_v32 = vmul.f32 %v910_v30, %v907_v29 }
0x12a0   :  { %v914_v33 = vadd.f32 %v913_v31, %v912_v32 }
0x12a2   :  { %916 = vrot.lane.b32.xlu0 %v914_v33, %s4832_s6 }
0x1314   :  { %v917_v34 = vpop.permute.xlu0 %916 }
0x1315   :  { %919 = vst.msk [vmem:[#allocation3 + $0x6] sm:$0x1] %vm288_vm3, %v917_v34  ;;  %4210 = vmatmul.mubr.msk.f32.vlgmr.msra.gmra.mrb[8].mxu0 %vm174_vm4, %v917_v34 }
0x1316   :  { %4465 = vmatpush3.bf16.msra.mxu0 %v4959_v7  ;;  %4223 = vmatprep.mubr.msk.f32.mxu0 %vm4828_vm1, %v4829_v8 }
0x1317   :  { %4469 = vmatprep.subr.bf16.mxu0 %v4827_v6 }
0x13e8   :  { %v988_v35 = vpop.f32.mrb[8].mxu0 }
0x13e9   :  { %v1000_v36 = vadd.f32 %v988_v35, %v4980_v14  ;;  %v4211_v37 = vpop.f32.mrb[9].mxu0  ;;  %v993_v39 = vadd.f32 %v992_v38, %v988_v35 }
0x13eb   :  { %1002 = vrot.lane.b32.xlu1 %v1000_v36, %s4831_s1  ;;  %v3964_v40 = vmul.f32 -1.442695, %v993_v39 }
0x13ed   :  { %4614 = vpow2.f32 %v3964_v40 }
0x13f7   :  { %v4615_v41 = vpop.eup %4614 }
0x13f8   :  { %v997_v42 = vadd.f32 1.0, %v4615_v41 }
0x13fa   :  { %4616 = vrcp.f32 %v997_v42 }
0x1404   :  { %v4617_v43 = vpop.eup %4616 }
0x1405   :  { %v1012_v49 = vsub.f32 1.0, %v4617_v43  ;;  %v1018_v51 = vmul.f32 %v4617_v43, %v914_v33 }
0x145d   :  { %v1003_v44 = vpop.permute.xlu1 %1002 }
0x145e   :  { %v1005_v45 = vmul.f32 %v4617_v43, %v1003_v44 }
0x1460   :  { %1007 = vrot.lane.b32.xlu0 %v1005_v45, %s4830_s5 }
0x14d2   :  { %v1008_v46 = vpop.permute.xlu0 %1007 }
0x14d3   :  { %v1010_v47 = vadd.f32 %v1008_v46, %v992_v38  ;;  %v1307_v38 = vld [vmem:[#allocation2 + $0xa] sm:$0x1] }
0x14d5   :  { %4618 = vtanh.f32 %v1010_v47 }
0x14df   :  { %v4619_v48 = vpop.eup %4618 }
0x14e0   :  { %1014 = vrot.lane.b32.xlu1 %v4619_v48, %s4832_s6 }
0x1552   :  { %v1015_v50 = vpop.permute.xlu1 %1014 }
0x1553   :  { %v1017_v52 = vmul.f32 %v1015_v50, %v1012_v49 }
0x1555   :  { %v1019_v53 = vadd.f32 %v1018_v51, %v1017_v52 }
0x1557   :  { %1021 = vrot.lane.b32.xlu0 %v1019_v53, %s4832_s6 }
0x15c9   :  { %v1022_v54 = vpop.permute.xlu0 %1021 }
0x15ca   :  { %1024 = vst.msk [vmem:[#allocation3 + $0x7] sm:$0x1] %vm288_vm3, %v1022_v54  ;;  %4217 = vmatmul.mubr.msk.f32.vlgmr.msra.gmra.mrb[8].mxu1 %vm174_vm4, %v1022_v54 }
0x15cb   :  { %4468 = vmatpush3.bf16.msra.mxu1 %v4959_v7  ;;  %4230 = vmatprep.mubr.msk.f32.mxu1 %vm4828_vm1, %v4829_v8 }
0x15cc   :  { %4472 = vmatprep.subr.bf16.mxu1 %v4827_v6 }
0x169d   :  { %v1093_v55 = vpop.f32.mrb[8].mxu1 }
0x169e   :  { %v1105_v56 = vadd.f32 %v1093_v55, %v4980_v14  ;;  %v4218_v57 = vpop.f32.mrb[9].mxu1  ;;  %v1098_v59 = vadd.f32 %v1097_v58, %v1093_v55 }
0x16a0   :  { %1107 = vrot.lane.b32.xlu1 %v1105_v56, %s4831_s1  ;;  %v3966_v60 = vmul.f32 -1.442695, %v1098_v59 }
0x16a2   :  { %4620 = vpow2.f32 %v3966_v60 }
0x16ac   :  { %v4621_v61 = vpop.eup %4620 }
0x16ad   :  { %v1102_v62 = vadd.f32 1.0, %v4621_v61 }
0x16af   :  { %4622 = vrcp.f32 %v1102_v62 }
0x16b9   :  { %v4623_v63 = vpop.eup %4622 }
0x16ba   :  { %v1117_v5 = vsub.f32 1.0, %v4623_v63  ;;  %v1123_v10 = vmul.f32 %v4623_v63, %v1019_v53 }
0x1712   :  { %v1108_v0 = vpop.permute.xlu1 %1107 }
0x1713   :  { %v1110_v1 = vmul.f32 %v4623_v63, %v1108_v0 }
0x1715   :  { %1112 = vrot.lane.b32.xlu0 %v1110_v1, %s4830_s5 }
0x1787   :  { %v1113_v2 = vpop.permute.xlu0 %1112 }
0x1788   :  { %v1115_v3 = vadd.f32 %v1113_v2, %v1097_v58  ;;  %v1412_v58 = vld [vmem:[#allocation2 + $0xb] sm:$0x1] }
0x178a   :  { %4624 = vtanh.f32 %v1115_v3 }
0x1794   :  { %v4625_v4 = vpop.eup %4624 }
0x1795   :  { %1119 = vrot.lane.b32.xlu1 %v4625_v4, %s4832_s6 }
0x1807   :  { %v1120_v9 = vpop.permute.xlu1 %1119 }
0x1808   :  { %v1122_v11 = vmul.f32 %v1120_v9, %v1117_v5 }
0x180a   :  { %v1124_v12 = vadd.f32 %v1123_v10, %v1122_v11 }
0x180c   :  { %1126 = vrot.lane.b32.xlu0 %v1124_v12, %s4832_s6 }
0x187e   :  { %v1127_v13 = vpop.permute.xlu0 %1126 }
0x187f   :  { %1129 = vst.msk [vmem:[#allocation3 + $0x8] sm:$0x1] %vm288_vm3, %v1127_v13  ;;  %4224 = vmatmul.mubr.msk.f32.vlgmr.msra.gmra.mrb[10].mxu0 %vm174_vm4, %v1127_v13 }
0x1880   :  { %4471 = vmatpush3.bf16.msra.mxu0 %v4959_v7  ;;  %4237 = vmatprep.mubr.msk.f32.mxu0 %vm4828_vm1, %v4829_v8 }
0x1881   :  { %4475 = vmatprep.subr.bf16.mxu0 %v4827_v6 }
0x1952   :  { %v1198_v15 = vpop.f32.mrb[10].mxu0 }
0x1953   :  { %v1210_v16 = vadd.f32 %v1198_v15, %v4980_v14  ;;  %v4225_v17 = vpop.f32.mrb[11].mxu0  ;;  %v1203_v19 = vadd.f32 %v1202_v18, %v1198_v15 }
0x1955   :  { %1212 = vrot.lane.b32.xlu1 %v1210_v16, %s4831_s1  ;;  %v3968_v20 = vmul.f32 -1.442695, %v1203_v19 }
0x1957   :  { %4626 = vpow2.f32 %v3968_v20 }
0x1961   :  { %v4627_v21 = vpop.eup %4626 }
0x1962   :  { %v1207_v22 = vadd.f32 1.0, %v4627_v21 }
0x1964   :  { %4628 = vrcp.f32 %v1207_v22 }
0x196e   :  { %v4629_v23 = vpop.eup %4628 }
0x196f   :  { %v1222_v29 = vsub.f32 1.0, %v4629_v23  ;;  %v1228_v31 = vmul.f32 %v4629_v23, %v1124_v12 }
0x19c7   :  { %v1213_v24 = vpop.permute.xlu1 %1212 }
0x19c8   :  { %v1215_v25 = vmul.f32 %v4629_v23, %v1213_v24 }
0x19ca   :  { %1217 = vrot.lane.b32.xlu0 %v1215_v25, %s4830_s5 }
0x1a3c   :  { %v1218_v26 = vpop.permute.xlu0 %1217 }
0x1a3d   :  { %v1220_v27 = vadd.f32 %v1218_v26, %v1202_v18  ;;  %v1517_v18 = vld [vmem:[#allocation2 + $0xc] sm:$0x1] }
0x1a3f   :  { %4630 = vtanh.f32 %v1220_v27 }
0x1a49   :  { %v4631_v28 = vpop.eup %4630 }
0x1a4a   :  { %1224 = vrot.lane.b32.xlu1 %v4631_v28, %s4832_s6 }
0x1abc   :  { %v1225_v30 = vpop.permute.xlu1 %1224 }
0x1abd   :  { %v1227_v32 = vmul.f32 %v1225_v30, %v1222_v29 }
0x1abf   :  { %v1229_v33 = vadd.f32 %v1228_v31, %v1227_v32 }
0x1ac1   :  { %1231 = vrot.lane.b32.xlu0 %v1229_v33, %s4832_s6 }
0x1b33   :  { %v1232_v34 = vpop.permute.xlu0 %1231 }
0x1b34   :  { %1234 = vst.msk [vmem:[#allocation3 + $0x9] sm:$0x1] %vm288_vm3, %v1232_v34  ;;  %4231 = vmatmul.mubr.msk.f32.vlgmr.msra.gmra.mrb[10].mxu1 %vm174_vm4, %v1232_v34 }
0x1b35   :  { %4474 = vmatpush3.bf16.msra.mxu1 %v4959_v7  ;;  %4244 = vmatprep.mubr.msk.f32.mxu1 %vm4828_vm1, %v4829_v8 }
0x1b36   :  { %4478 = vmatprep.subr.bf16.mxu1 %v4827_v6 }
0x1c07   :  { %v1303_v35 = vpop.f32.mrb[10].mxu1 }
0x1c08   :  { %v1315_v36 = vadd.f32 %v1303_v35, %v4980_v14  ;;  %v4232_v37 = vpop.f32.mrb[11].mxu1  ;;  %v1308_v39 = vadd.f32 %v1307_v38, %v1303_v35 }
0x1c0a   :  { %1317 = vrot.lane.b32.xlu1 %v1315_v36, %s4831_s1  ;;  %v3970_v40 = vmul.f32 -1.442695, %v1308_v39 }
0x1c0c   :  { %4632 = vpow2.f32 %v3970_v40 }
0x1c16   :  { %v4633_v41 = vpop.eup %4632 }
0x1c17   :  { %v1312_v42 = vadd.f32 1.0, %v4633_v41 }
0x1c19   :  { %4634 = vrcp.f32 %v1312_v42 }
0x1c23   :  { %v4635_v43 = vpop.eup %4634 }
0x1c24   :  { %v1327_v49 = vsub.f32 1.0, %v4635_v43  ;;  %v1333_v51 = vmul.f32 %v4635_v43, %v1229_v33 }
0x1c7c   :  { %v1318_v44 = vpop.permute.xlu1 %1317 }
0x1c7d   :  { %v1320_v45 = vmul.f32 %v4635_v43, %v1318_v44 }
0x1c7f   :  { %1322 = vrot.lane.b32.xlu0 %v1320_v45, %s4830_s5 }
0x1cf1   :  { %v1323_v46 = vpop.permute.xlu0 %1322 }
0x1cf2   :  { %v1325_v47 = vadd.f32 %v1323_v46, %v1307_v38  ;;  %v1622_v38 = vld [vmem:[#allocation2 + $0xd] sm:$0x1] }
0x1cf4   :  { %4636 = vtanh.f32 %v1325_v47 }
0x1cfe   :  { %v4637_v48 = vpop.eup %4636 }
0x1cff   :  { %1329 = vrot.lane.b32.xlu1 %v4637_v48, %s4832_s6 }
0x1d71   :  { %v1330_v50 = vpop.permute.xlu1 %1329 }
0x1d72   :  { %v1332_v52 = vmul.f32 %v1330_v50, %v1327_v49 }
0x1d74   :  { %v1334_v53 = vadd.f32 %v1333_v51, %v1332_v52 }
0x1d76   :  { %1336 = vrot.lane.b32.xlu0 %v1334_v53, %s4832_s6 }
0x1de8   :  { %v1337_v54 = vpop.permute.xlu0 %1336 }
0x1de9   :  { %1339 = vst.msk [vmem:[#allocation3 + $0xa] sm:$0x1] %vm288_vm3, %v1337_v54  ;;  %4238 = vmatmul.mubr.msk.f32.vlgmr.msra.gmra.mrb[12].mxu0 %vm174_vm4, %v1337_v54 }
0x1dea   :  { %4477 = vmatpush3.bf16.msra.mxu0 %v4959_v7  ;;  %4251 = vmatprep.mubr.msk.f32.mxu0 %vm4828_vm1, %v4829_v8 }
0x1deb   :  { %4481 = vmatprep.subr.bf16.mxu0 %v4827_v6 }
0x1ebc   :  { %v1408_v55 = vpop.f32.mrb[12].mxu0 }
0x1ebd   :  { %v1420_v56 = vadd.f32 %v1408_v55, %v4980_v14  ;;  %v4239_v57 = vpop.f32.mrb[13].mxu0  ;;  %v1413_v59 = vadd.f32 %v1412_v58, %v1408_v55 }
0x1ebe   :  { %v1727_v57 = vld [vmem:[#allocation2 + $0xe] sm:$0x1] }
0x1ebf   :  { %1422 = vrot.lane.b32.xlu1 %v1420_v56, %s4831_s1  ;;  %v3972_v60 = vmul.f32 -1.442695, %v1413_v59 }
0x1ec1   :  { %4638 = vpow2.f32 %v3972_v60 }
0x1ecb   :  { %v4639_v61 = vpop.eup %4638 }
0x1ecc   :  { %v1417_v62 = vadd.f32 1.0, %v4639_v61 }
0x1ece   :  { %4640 = vrcp.f32 %v1417_v62 }
0x1ed8   :  { %v4641_v63 = vpop.eup %4640 }
0x1ed9   :  { %v1432_v5 = vsub.f32 1.0, %v4641_v63  ;;  %v1438_v10 = vmul.f32 %v4641_v63, %v1334_v53 }
0x1f31   :  { %v1423_v0 = vpop.permute.xlu1 %1422 }
0x1f32   :  { %v1425_v1 = vmul.f32 %v4641_v63, %v1423_v0 }
0x1f34   :  { %1427 = vrot.lane.b32.xlu0 %v1425_v1, %s4830_s5 }
0x1fa6   :  { %v1428_v2 = vpop.permute.xlu0 %1427 }
0x1fa7   :  { %v1430_v3 = vadd.f32 %v1428_v2, %v1412_v58 }
0x1fa9   :  { %4642 = vtanh.f32 %v1430_v3 }
0x1fb3   :  { %v4643_v4 = vpop.eup %4642 }
0x1fb4   :  { %1434 = vrot.lane.b32.xlu1 %v4643_v4, %s4832_s6 }
0x2026   :  { %v1435_v9 = vpop.permute.xlu1 %1434 }
0x2027   :  { %v1437_v11 = vmul.f32 %v1435_v9, %v1432_v5 }
0x2029   :  { %v1439_v12 = vadd.f32 %v1438_v10, %v1437_v11 }
0x202b   :  { %1441 = vrot.lane.b32.xlu0 %v1439_v12, %s4832_s6 }
0x209d   :  { %v1442_v13 = vpop.permute.xlu0 %1441 }
0x209e   :  { %1444 = vst.msk [vmem:[#allocation3 + $0xb] sm:$0x1] %vm288_vm3, %v1442_v13  ;;  %4245 = vmatmul.mubr.msk.f32.vlgmr.msra.gmra.mrb[12].mxu1 %vm174_vm4, %v1442_v13 }
0x209f   :  { %4480 = vmatpush3.bf16.msra.mxu1 %v4959_v7  ;;  %4258 = vmatprep.mubr.msk.f32.mxu1 %vm4828_vm1, %v4829_v8 }
0x20a0   :  { %4484 = vmatprep.subr.bf16.mxu1 %v4827_v6 }
0x2171   :  { %v1513_v15 = vpop.f32.mrb[12].mxu1 }
0x2172   :  { %v1525_v16 = vadd.f32 %v1513_v15, %v4980_v14  ;;  %v4246_v17 = vpop.f32.mrb[13].mxu1  ;;  %v1518_v19 = vadd.f32 %v1517_v18, %v1513_v15 }
0x2173   :  { %v1832_v17 = vld [vmem:[#allocation2 + $0xf] sm:$0x1] }
0x2174   :  { %1527 = vrot.lane.b32.xlu1 %v1525_v16, %s4831_s1  ;;  %v3974_v20 = vmul.f32 -1.442695, %v1518_v19 }
0x2176   :  { %4644 = vpow2.f32 %v3974_v20 }
0x2180   :  { %v4645_v21 = vpop.eup %4644 }
0x2181   :  { %v1522_v22 = vadd.f32 1.0, %v4645_v21 }
0x2183   :  { %4646 = vrcp.f32 %v1522_v22 }
0x218d   :  { %v4647_v23 = vpop.eup %4646 }
0x218e   :  { %v1537_v29 = vsub.f32 1.0, %v4647_v23  ;;  %v1543_v31 = vmul.f32 %v4647_v23, %v1439_v12 }
0x21e6   :  { %v1528_v24 = vpop.permute.xlu1 %1527 }
0x21e7   :  { %v1530_v25 = vmul.f32 %v4647_v23, %v1528_v24 }
0x21e9   :  { %1532 = vrot.lane.b32.xlu0 %v1530_v25, %s4830_s5 }
0x225b   :  { %v1533_v26 = vpop.permute.xlu0 %1532 }
0x225c   :  { %v1535_v27 = vadd.f32 %v1533_v26, %v1517_v18 }
0x225e   :  { %4648 = vtanh.f32 %v1535_v27 }
0x2268   :  { %v4649_v28 = vpop.eup %4648 }
0x2269   :  { %1539 = vrot.lane.b32.xlu1 %v4649_v28, %s4832_s6 }
0x22db   :  { %v1540_v30 = vpop.permute.xlu1 %1539 }
0x22dc   :  { %v1542_v32 = vmul.f32 %v1540_v30, %v1537_v29 }
0x22de   :  { %v1544_v33 = vadd.f32 %v1543_v31, %v1542_v32  ;;  %v1901_v31 = vld [vmem:[%s5454_s9] sm:$0xff]  ;;  %v1902_v32 = vld [vmem:[%s5454_s9 + $0x8] sm:$0xff]  ;;  %s1891_s9 = scalar_lea.vmem [#allocation3], %s3986_s23 }
0x22e0   :  { %1546 = vrot.lane.b32.xlu0 %v1544_v33, %s4832_s6 }
0x2352   :  { %v1547_v34 = vpop.permute.xlu0 %1546 }
0x2353   :  { %1549 = vst.msk [vmem:[#allocation3 + $0xc] sm:$0x1] %vm288_vm3, %v1547_v34  ;;  %4252 = vmatmul.mubr.msk.f32.vlgmr.msra.gmra.mrb[14].mxu0 %vm174_vm4, %v1547_v34 }
0x2354   :  { %4483 = vmatpush3.bf16.msra.mxu0 %v4959_v7  ;;  %4265 = vmatprep.mubr.msk.f32.mxu0 %vm4828_vm1, %v4829_v8 }
0x2355   :  { %4275 = vmatprep.subr.mxu0 %v4829_v8 }
0x2426   :  { %v1618_v35 = vpop.f32.mrb[14].mxu0 }
0x2427   :  { %v1630_v36 = vadd.f32 %v1618_v35, %v4980_v14  ;;  %v4253_v37 = vpop.f32.mrb[15].mxu0  ;;  %v1623_v39 = vadd.f32 %v1622_v38, %v1618_v35  ;;  %v4485_v35 = vpack.c.bf16 %v1902_v32, %v1901_v31 }
0x2428   :  { %v2059_v37 = vld [vmem:[%s5455_s10 + $0x8] sm:$0xff] }
0x2429   :  { %1632 = vrot.lane.b32.xlu1 %v1630_v36, %s4831_s1  ;;  %v3976_v40 = vmul.f32 -1.442695, %v1623_v39  ;;  %v2058_v36 = vld [vmem:[%s5455_s10] sm:$0xff]  ;;  %s1866_s10 = sld [smem:[#allocation8]] }
0x242a   :  { %v5170_v39 = vpack.c.bf16 %v2059_v37, %v2058_v36 }
0x242b   :  { %4650 = vpow2.f32 %v3976_v40  ;;  %v3992_v40 = vld [vmem:[%s5457_s12] ss:$0 sm:$0xff]  ;;  %s1875_s12 = scalar_lea.vmem [#allocation3], %s3982_s7 }
0x242f   :  { %s1867_s25 = scalar_lea.vmem [#allocation3], %s1866_s10 }
0x2435   :  { %v4651_v41 = vpop.eup %4650 }
0x2436   :  { %v1627_v42 = vadd.f32 1.0, %v4651_v41 }
0x2438   :  { %4652 = vrcp.f32 %v1627_v42 }
0x2442   :  { %v4653_v43 = vpop.eup %4652 }
0x2443   :  { %v1642_v48 = vsub.f32 1.0, %v4653_v43  ;;  %v1648_v50 = vmul.f32 %v4653_v43, %v1544_v33  ;;  %v1899_v33 = vld [vmem:[%s5453_s8] sm:$0xff] }
0x249b   :  { %v1633_v7 = vpop.permute.xlu1 %1632 }
0x249c   :  { %v1635_v44 = vmul.f32 %v4653_v43, %v1633_v7 }
0x249e   :  { %1637 = vrot.lane.b32.xlu0 %v1635_v44, %s4830_s5 }
0x2510   :  { %v1638_v45 = vpop.permute.xlu0 %1637 }
0x2511   :  { %v1640_v46 = vadd.f32 %v1638_v45, %v1622_v38  ;;  %v1898_v38 = vld [vmem:[%s5472_s0] sm:$0xff] }
0x2513   :  { %4654 = vtanh.f32 %v1640_v46 }
0x251d   :  { %v4655_v47 = vpop.eup %4654 }
0x251e   :  { %1644 = vrot.lane.b32.xlu1 %v4655_v47, %s4832_s6 }
0x2590   :  { %v1645_v49 = vpop.permute.xlu1 %1644 }
0x2591   :  { %v1647_v51 = vmul.f32 %v1645_v49, %v1642_v48 }
0x2593   :  { %v1649_v52 = vadd.f32 %v1648_v50, %v1647_v51 }
0x2595   :  { %1651 = vrot.lane.b32.xlu0 %v1649_v52, %s4832_s6 }
0x2607   :  { %v1652_v53 = vpop.permute.xlu0 %1651 }
0x2608   :  { %1654 = vst.msk [vmem:[#allocation3 + $0xd] sm:$0x1] %vm288_vm3, %v1652_v53  ;;  %4259 = vmatmul.mubr.msk.f32.vlgmr.msra.gmra.mrb[14].mxu1 %vm174_vm4, %v1652_v53  ;;  %v3990_v53 = vld [vmem:[%s5456_s11] ss:$0 sm:$0xff] }
0x2609   :  { %4272 = vmatprep.mubr.msk.f32.mxu1 %vm4828_vm1, %v4829_v8  ;;  %4486 = vmatpush3.bf16.msra.mxu1 %v4485_v35 }
0x260a   :  { %4487 = vmatprep.subr.bf16.mxu1 %v4827_v6 }
0x26db   :  { %v1723_v54 = vpop.f32.mrb[14].mxu1 }
0x26dc   :  { %v1735_v55 = vadd.f32 %v1723_v54, %v4980_v14  ;;  %v4260_v56 = vpop.f32.mrb[15].mxu1  ;;  %v1728_v58 = vadd.f32 %v1727_v57, %v1723_v54 }
0x26de   :  { %1737 = vrot.lane.b32.xlu1 %v1735_v55, %s4831_s1  ;;  %v3978_v59 = vmul.f32 -1.442695, %v1728_v58 }
0x26e0   :  { %4656 = vpow2.f32 %v3978_v59 }
0x26ea   :  { %v4657_v60 = vpop.eup %4656 }
0x26eb   :  { %v1732_v61 = vadd.f32 1.0, %v4657_v60 }
0x26ed   :  { %4658 = vrcp.f32 %v1732_v61 }
0x26f7   :  { %v4659_v62 = vpop.eup %4658 }
0x26f8   :  { %v1747_v4 = vsub.f32 1.0, %v4659_v62  ;;  %v1753_v9 = vmul.f32 %v4659_v62, %v1649_v52 }
0x2750   :  { %v1738_v63 = vpop.permute.xlu1 %1737 }
0x2751   :  { %v1740_v0 = vmul.f32 %v4659_v62, %v1738_v63 }
0x2753   :  { %1742 = vrot.lane.b32.xlu0 %v1740_v0, %s4830_s5 }
0x27c5   :  { %v1743_v1 = vpop.permute.xlu0 %1742 }
0x27c6   :  { %v1745_v2 = vadd.f32 %v1743_v1, %v1727_v57 }
0x27c8   :  { %4660 = vtanh.f32 %v1745_v2 }
0x27d2   :  { %v4661_v3 = vpop.eup %4660 }
0x27d3   :  { %1749 = vrot.lane.b32.xlu1 %v4661_v3, %s4832_s6 }
0x2845   :  { %v1750_v5 = vpop.permute.xlu1 %1749 }
0x2846   :  { %v1752_v10 = vmul.f32 %v1750_v5, %v1747_v4 }
0x2848   :  { %v1754_v11 = vadd.f32 %v1753_v9, %v1752_v10 }
0x284a   :  { %1756 = vrot.lane.b32.xlu0 %v1754_v11, %s4832_s6 }
0x28bc   :  { %v1757_v12 = vpop.permute.xlu0 %1756 }
0x28bd   :  { %1759 = vst.msk [vmem:[#allocation3 + $0xe] sm:$0x1] %vm288_vm3, %v1757_v12  ;;  %4266 = vmatmul.mubr.msk.f32.vlgmr.msra.gmra.mrb[16].mxu0 %vm174_vm4, %v1757_v12 }
0x28be   :  { %4277 = vmatprep.mubr.msk.f32.mxu0 %vm4828_vm1, %v4829_v8  ;;  %4276 = vmatpush3.msra.mxu0 %v1899_v33 }
0x28bf   :  { %4490 = vmatprep.subr.bf16.mxu0 %v4827_v6 }
0x28c1   :  { %4278 = vmatmul.mubr.msk.f32.vlgmr.msra.gmra.mrb[18].mxu0 %vm86_vm0, %v1898_v38 }
0x28c2   :  { %4492 = vmatpush3.bf16.msra.mxu0 %v5170_v39  ;;  %4291 = vmatprep.mubr.msk.f32.mxu0 %vm4828_vm1, %v4829_v8 }
0x28c3   :  { %4496 = vmatprep.subr.bf16.mxu0 %v4827_v6 }
0x2990   :  { %v1828_v13 = vpop.f32.mrb[16].mxu0 }
0x2991   :  { %v1840_v15 = vadd.f32 %v1828_v13, %v4980_v14  ;;  %v4267_v16 = vpop.f32.mrb[17].mxu0  ;;  %v1833_v18 = vadd.f32 %v1832_v17, %v1828_v13 }
0x2993   :  { %1842 = vrot.lane.b32.xlu1 %v1840_v15, %s4831_s1  ;;  %v3980_v19 = vmul.f32 -1.442695, %v1833_v18 }
0x2994   :  { %v2045_v50 = vpop.f32.mrb[18].mxu0 }
0x2995   :  { %4662 = vpow2.f32 %v3980_v19  ;;  %v4279_v51 = vpop.f32.mrb[19].mxu0 }
0x299f   :  { %v4663_v20 = vpop.eup %4662 }
0x29a0   :  { %v1837_v21 = vadd.f32 1.0, %v4663_v20 }
0x29a2   :  { %4664 = vrcp.f32 %v1837_v21 }
0x29ac   :  { %v4665_v22 = vpop.eup %4664 }
0x29ad   :  { %v1852_v14 = vsub.f32 1.0, %v4665_v22  ;;  %v1858_v29 = vmul.f32 %v4665_v22, %v1754_v11 }
0x2a05   :  { %v1843_v23 = vpop.permute.xlu1 %1842 }
0x2a06   :  { %v1845_v24 = vmul.f32 %v4665_v22, %v1843_v23 }
0x2a08   :  { %1847 = vrot.lane.b32.xlu0 %v1845_v24, %s4830_s5 }
0x2a7a   :  { %v1848_v25 = vpop.permute.xlu0 %1847 }
0x2a7b   :  { %v1850_v26 = vadd.f32 %v1848_v25, %v1832_v17 }
0x2a7d   :  { %4666 = vtanh.f32 %v1850_v26 }
0x2a87   :  { %v4667_v27 = vpop.eup %4666 }
0x2a88   :  { %1854 = vrot.lane.b32.xlu1 %v4667_v27, %s4832_s6 }
0x2a8c   :  { %2144 = vrot.lane.b32.xlu1 %v3992_v40, %s4830_s5 }
0x2afa   :  { %v1855_v28 = vpop.permute.xlu1 %1854 }
0x2afb   :  { %v1857_v30 = vmul.f32 %v1855_v28, %v1852_v14 }
0x2afd   :  { %v1859_v34 = vadd.f32 %v1858_v29, %v1857_v30 }
0x2afe   :  { %v5204_v56 = vpop.permute.xlu1 %2144 }
0x2aff   :  { %1861 = vrot.lane.b32.xlu0 %v1859_v34, %s4832_s6 }
0x2b71   :  { %v1862_v41 = vpop.permute.xlu0 %1861 }
0x2b72   :  { %1864 = vst.msk [vmem:[#allocation3 + $0xf] sm:$0x1] %vm288_vm3, %v1862_v41  ;;  %1865 = vst.msk [vmem:[#allocation11] sm:$0x1] %vm288_vm3, %v1862_v41 }
0x2b79   :  { %v1868_v42 = vld [vmem:[%s1867_s25] sm:$0x1] }
0x2b7a   :  { %v1872_v43 = vld [vmem:[%s1871_s3] sm:$0x1]  ;;  %1869 = vst.msk [vmem:[#allocation4] sm:$0x1] %vm288_vm3, %v1868_v42 }
0x2b7b   :  { %v1876_v7 = vld [vmem:[%s1875_s12] sm:$0x1]  ;;  %1873 = vst.msk [vmem:[#allocation4 + $0x1] sm:$0x1] %vm288_vm3, %v1872_v43 }
0x2b7c   :  { %1877 = vst.msk [vmem:[#allocation4 + $0x2] sm:$0x1] %vm288_vm3, %v1876_v7  ;;  %v1880_v44 = vld [vmem:[%s1879_s26] sm:$0x1] }
0x2b7d   :  { %v1884_v45 = vld [vmem:[%s1883_s27] sm:$0x1]  ;;  %1881 = vst.msk [vmem:[#allocation4 + $0x3] sm:$0x1] %vm288_vm3, %v1880_v44 }
0x2b7e   :  { %v1888_v46 = vld [vmem:[%s1887_s28] sm:$0x1]  ;;  %1885 = vst.msk [vmem:[#allocation4 + $0x4] sm:$0x1] %vm288_vm3, %v1884_v45 }
0x2b7f   :  { %1889 = vst.msk [vmem:[#allocation4 + $0x5] sm:$0x1] %vm288_vm3, %v1888_v46  ;;  %v1892_v47 = vld [vmem:[%s1891_s9] sm:$0x1] }
0x2b80   :  { %v1896_v48 = vld [vmem:[%s1895_s29] sm:$0x1]  ;;  %1893 = vst.msk [vmem:[#allocation4 + $0x6] sm:$0x1] %vm288_vm3, %v1892_v47 }
0x2b81   :  { %1897 = vst.msk [vmem:[#allocation4 + $0x7] sm:$0x1] %vm288_vm3, %v1896_v48 }
0x2b88   :  { %v1900_v49 = vld [vmem:[#allocation4] sm:$0xff] }
0x2b89   :  { %4273 = vmatmul.mubr.msk.f32.vlgmr.msra.gmra.mrb[16].mxu1 %vm174_vm4, %v1900_v49 }
0x2b8a   :  { %4489 = vmatpush3.bf16.msra.mxu1 %v5170_v39  ;;  %4284 = vmatprep.mubr.msk.f32.mxu1 %vm4828_vm1, %v4829_v8 }
0x2b8b   :  { %4493 = vmatprep.subr.bf16.mxu1 %v4827_v6 }
0x2b8d   :  { %4285 = vmatmul.mubr.f32.vlgmr.msra.gmra.mrb[18].mxu1 %v4829_v8 }
0x2b8e   :  { %4495 = vmatpush3.bf16.msra.mxu1 %v5170_v39  ;;  %4298 = vmatprep.mubr.msk.f32.mxu1 %vm4828_vm1, %v4829_v8 }
0x2b8f   :  { %4499 = vmatprep.subr.bf16.mxu1 %v4827_v6 }
0x2c5c   :  { %v1972_v52 = vpop.f32.mrb[16].mxu1 }
0x2c5d   :  { %v2046_v54 = vadd.f32 %v2045_v50, %v1972_v52  ;;  %v4274_v55 = vpop.f32.mrb[17].mxu1 }
0x2c5f   :  { %v2056_v57 = vadd.f32 %v3990_v53, %v2046_v54 }
0x2c60   :  { %v2127_v58 = vpop.f32.mrb[18].mxu1 }
0x2c61   :  { %2057 = vst.msk [vmem:[#allocation5] sm:$0xff] %vm168_vm2, %v2056_v57  ;;  %v2147_v59 = vadd.f32 %v5204_v56, %v2127_v58  ;;  %v4286_v60 = vpop.f32.mrb[19].mxu1 }
0x2c63   :  { %2149 = vrot.lane.b32.xlu0 %v2147_v59, %s4831_s1 }
0x2c68   :  { %v2131_v61 = vld [vmem:[#allocation5] sm:$0x1]  ;;  %v2244_v21 = vld [vmem:[#allocation5 + $0x1] sm:$0x1]  ;;  %v2349_v41 = vld [vmem:[#allocation5 + $0x2] sm:$0x1] }
0x2c69   :  { %v2132_v62 = vadd.f32 %v2131_v61, %v2127_v58 }
0x2c6b   :  { %v3991_v63 = vmul.f32 -1.442695, %v2132_v62 }
0x2c6d   :  { %4668 = vpow2.f32 %v3991_v63 }
0x2c77   :  { %v4669_v0 = vpop.eup %4668 }
0x2c78   :  { %v2136_v1 = vadd.f32 1.0, %v4669_v0 }
0x2c7a   :  { %4670 = vrcp.f32 %v2136_v1 }
0x2c84   :  { %v4671_v2 = vpop.eup %4670 }
0x2c85   :  { %v2159_v11 = vsub.f32 1.0, %v4671_v2  ;;  %v2165_v13 = vmul.f32 0.0, %v4671_v2 }
0x2cd5   :  { %v2150_v3 = vpop.permute.xlu0 %2149 }
0x2cd6   :  { %v2152_v4 = vmul.f32 %v4671_v2, %v2150_v3 }
0x2cd8   :  { %2154 = vrot.lane.b32.xlu1 %v2152_v4, %s4830_s5 }
0x2d4a   :  { %v2155_v5 = vpop.permute.xlu1 %2154 }
0x2d4b   :  { %v2157_v9 = vadd.f32 %v2155_v5, %v2131_v61  ;;  %v2454_v61 = vld [vmem:[#allocation5 + $0x3] sm:$0x1] }
0x2d4d   :  { %4672 = vtanh.f32 %v2157_v9 }
0x2d57   :  { %v4673_v10 = vpop.eup %4672 }
0x2d58   :  { %2161 = vrot.lane.b32.xlu0 %v4673_v10, %s4832_s6 }
0x2dca   :  { %v2162_v12 = vpop.permute.xlu0 %2161 }
0x2dcb   :  { %v2164_v15 = vmul.f32 %v2162_v12, %v2159_v11 }
0x2dcd   :  { %v2166_v16 = vadd.f32 %v2165_v13, %v2164_v15 }
0x2dcf   :  { %2168 = vrot.lane.b32.xlu1 %v2166_v16, %s4832_s6 }
0x2e41   :  { %v2169_v17 = vpop.permute.xlu1 %2168 }
0x2e42   :  { %2171 = vst.msk [vmem:[#allocation6] sm:$0x1] %vm288_vm3, %v2169_v17  ;;  %4292 = vmatmul.mubr.msk.f32.vlgmr.msra.gmra.mrb[20].mxu0 %vm174_vm4, %v2169_v17 }
0x2e43   :  { %4498 = vmatpush3.bf16.msra.mxu0 %v5170_v39  ;;  %4305 = vmatprep.mubr.msk.f32.mxu0 %vm4828_vm1, %v4829_v8 }
0x2e44   :  { %4502 = vmatprep.subr.bf16.mxu0 %v4827_v6 }
0x2f15   :  { %v2240_v18 = vpop.f32.mrb[20].mxu0 }
0x2f16   :  { %v2252_v19 = vadd.f32 %v2240_v18, %v5204_v56  ;;  %v4293_v20 = vpop.f32.mrb[21].mxu0  ;;  %v2245_v22 = vadd.f32 %v2244_v21, %v2240_v18 }
0x2f18   :  { %2254 = vrot.lane.b32.xlu0 %v2252_v19, %s4831_s1  ;;  %v3994_v23 = vmul.f32 -1.442695, %v2245_v22 }
0x2f1a   :  { %4674 = vpow2.f32 %v3994_v23 }
0x2f24   :  { %v4675_v24 = vpop.eup %4674 }
0x2f25   :  { %v2249_v25 = vadd.f32 1.0, %v4675_v24 }
0x2f27   :  { %4676 = vrcp.f32 %v2249_v25 }
0x2f31   :  { %v4677_v26 = vpop.eup %4676 }
0x2f32   :  { %v2264_v31 = vsub.f32 1.0, %v4677_v26  ;;  %v2270_v33 = vmul.f32 %v4677_v26, %v2166_v16 }
0x2f8a   :  { %v2255_v27 = vpop.permute.xlu0 %2254 }
0x2f8b   :  { %v2257_v14 = vmul.f32 %v4677_v26, %v2255_v27 }
0x2f8d   :  { %2259 = vrot.lane.b32.xlu1 %v2257_v14, %s4830_s5 }
0x2fff   :  { %v2260_v28 = vpop.permute.xlu1 %2259 }
0x3000   :  { %v2262_v29 = vadd.f32 %v2260_v28, %v2244_v21  ;;  %v2559_v21 = vld [vmem:[#allocation5 + $0x4] sm:$0x1] }
0x3002   :  { %4678 = vtanh.f32 %v2262_v29 }
0x300c   :  { %v4679_v30 = vpop.eup %4678 }
0x300d   :  { %2266 = vrot.lane.b32.xlu0 %v4679_v30, %s4832_s6 }
0x307f   :  { %v2267_v32 = vpop.permute.xlu0 %2266 }
0x3080   :  { %v2269_v34 = vmul.f32 %v2267_v32, %v2264_v31 }
0x3082   :  { %v2271_v35 = vadd.f32 %v2270_v33, %v2269_v34 }
0x3084   :  { %2273 = vrot.lane.b32.xlu1 %v2271_v35, %s4832_s6 }
0x30f6   :  { %v2274_v36 = vpop.permute.xlu1 %2273 }
0x30f7   :  { %2276 = vst.msk [vmem:[#allocation6 + $0x1] sm:$0x1] %vm288_vm3, %v2274_v36  ;;  %4299 = vmatmul.mubr.msk.f32.vlgmr.msra.gmra.mrb[20].mxu1 %vm174_vm4, %v2274_v36 }
0x30f8   :  { %4501 = vmatpush3.bf16.msra.mxu1 %v5170_v39  ;;  %4312 = vmatprep.mubr.msk.f32.mxu1 %vm4828_vm1, %v4829_v8 }
0x30f9   :  { %4505 = vmatprep.subr.bf16.mxu1 %v4827_v6 }
0x31ca   :  { %v2345_v37 = vpop.f32.mrb[20].mxu1 }
0x31cb   :  { %v2357_v38 = vadd.f32 %v2345_v37, %v5204_v56  ;;  %v4300_v40 = vpop.f32.mrb[21].mxu1  ;;  %v2350_v42 = vadd.f32 %v2349_v41, %v2345_v37 }
0x31cd   :  { %2359 = vrot.lane.b32.xlu0 %v2357_v38, %s4831_s1  ;;  %v3996_v43 = vmul.f32 -1.442695, %v2350_v42 }
0x31cf   :  { %4680 = vpow2.f32 %v3996_v43 }
0x31d9   :  { %v4681_v7 = vpop.eup %4680 }
0x31da   :  { %v2354_v44 = vadd.f32 1.0, %v4681_v7 }
0x31dc   :  { %4682 = vrcp.f32 %v2354_v44 }
0x31e6   :  { %v4683_v45 = vpop.eup %4682 }
0x31e7   :  { %v2369_v51 = vsub.f32 1.0, %v4683_v45  ;;  %v2375_v53 = vmul.f32 %v4683_v45, %v2271_v35 }
0x323f   :  { %v2360_v46 = vpop.permute.xlu0 %2359 }
0x3240   :  { %v2362_v47 = vmul.f32 %v4683_v45, %v2360_v46 }
0x3242   :  { %2364 = vrot.lane.b32.xlu1 %v2362_v47, %s4830_s5 }
0x32b4   :  { %v2365_v48 = vpop.permute.xlu1 %2364 }
0x32b5   :  { %v2367_v49 = vadd.f32 %v2365_v48, %v2349_v41  ;;  %v2664_v41 = vld [vmem:[#allocation5 + $0x5] sm:$0x1] }
0x32b7   :  { %4684 = vtanh.f32 %v2367_v49 }
0x32c1   :  { %v4685_v50 = vpop.eup %4684 }
0x32c2   :  { %2371 = vrot.lane.b32.xlu0 %v4685_v50, %s4832_s6 }
0x3334   :  { %v2372_v52 = vpop.permute.xlu0 %2371 }
0x3335   :  { %v2374_v54 = vmul.f32 %v2372_v52, %v2369_v51 }
0x3337   :  { %v2376_v55 = vadd.f32 %v2375_v53, %v2374_v54 }
0x3339   :  { %2378 = vrot.lane.b32.xlu1 %v2376_v55, %s4832_s6 }
0x33ab   :  { %v2379_v57 = vpop.permute.xlu1 %2378 }
0x33ac   :  { %2381 = vst.msk [vmem:[#allocation6 + $0x2] sm:$0x1] %vm288_vm3, %v2379_v57  ;;  %4306 = vmatmul.mubr.msk.f32.vlgmr.msra.gmra.mrb[22].mxu0 %vm174_vm4, %v2379_v57 }
0x33ad   :  { %4504 = vmatpush3.bf16.msra.mxu0 %v5170_v39  ;;  %4319 = vmatprep.mubr.msk.f32.mxu0 %vm4828_vm1, %v4829_v8 }
0x33ae   :  { %4508 = vmatprep.subr.bf16.mxu0 %v4827_v6 }
0x347f   :  { %v2450_v58 = vpop.f32.mrb[22].mxu0 }
0x3480   :  { %v2462_v59 = vadd.f32 %v2450_v58, %v5204_v56  ;;  %v4307_v60 = vpop.f32.mrb[23].mxu0  ;;  %v2455_v62 = vadd.f32 %v2454_v61, %v2450_v58 }
0x3481   :  { %v2769_v60 = vld [vmem:[#allocation5 + $0x6] sm:$0x1] }
0x3482   :  { %2464 = vrot.lane.b32.xlu0 %v2462_v59, %s4831_s1  ;;  %v3998_v63 = vmul.f32 -1.442695, %v2455_v62 }
0x3484   :  { %4686 = vpow2.f32 %v3998_v63 }
0x348e   :  { %v4687_v0 = vpop.eup %4686 }
0x348f   :  { %v2459_v1 = vadd.f32 1.0, %v4687_v0 }
0x3491   :  { %4688 = vrcp.f32 %v2459_v1 }
0x349b   :  { %v4689_v2 = vpop.eup %4688 }
0x349c   :  { %v2474_v11 = vsub.f32 1.0, %v4689_v2  ;;  %v2480_v13 = vmul.f32 %v4689_v2, %v2376_v55 }
0x34f4   :  { %v2465_v3 = vpop.permute.xlu0 %2464 }
0x34f5   :  { %v2467_v4 = vmul.f32 %v4689_v2, %v2465_v3 }
0x34f7   :  { %2469 = vrot.lane.b32.xlu1 %v2467_v4, %s4830_s5 }
0x3569   :  { %v2470_v5 = vpop.permute.xlu1 %2469 }
0x356a   :  { %v2472_v9 = vadd.f32 %v2470_v5, %v2454_v61 }
0x356c   :  { %4690 = vtanh.f32 %v2472_v9 }
0x3576   :  { %v4691_v10 = vpop.eup %4690 }
0x3577   :  { %2476 = vrot.lane.b32.xlu0 %v4691_v10, %s4832_s6 }
0x35e9   :  { %v2477_v12 = vpop.permute.xlu0 %2476 }
0x35ea   :  { %v2479_v15 = vmul.f32 %v2477_v12, %v2474_v11 }
0x35ec   :  { %v2481_v16 = vadd.f32 %v2480_v13, %v2479_v15 }
0x35ee   :  { %2483 = vrot.lane.b32.xlu1 %v2481_v16, %s4832_s6 }
0x3660   :  { %v2484_v17 = vpop.permute.xlu1 %2483 }
0x3661   :  { %2486 = vst.msk [vmem:[#allocation6 + $0x3] sm:$0x1] %vm288_vm3, %v2484_v17  ;;  %4313 = vmatmul.mubr.msk.f32.vlgmr.msra.gmra.mrb[22].mxu1 %vm174_vm4, %v2484_v17 }
0x3662   :  { %4507 = vmatpush3.bf16.msra.mxu1 %v5170_v39  ;;  %4326 = vmatprep.mubr.msk.f32.mxu1 %vm4828_vm1, %v4829_v8 }
0x3663   :  { %4511 = vmatprep.subr.bf16.mxu1 %v4827_v6 }
0x3734   :  { %v2555_v18 = vpop.f32.mrb[22].mxu1 }
0x3735   :  { %v2567_v19 = vadd.f32 %v2555_v18, %v5204_v56  ;;  %v4314_v20 = vpop.f32.mrb[23].mxu1  ;;  %v2560_v22 = vadd.f32 %v2559_v21, %v2555_v18 }
0x3736   :  { %v2874_v20 = vld [vmem:[#allocation5 + $0x7] sm:$0x1] }
0x3737   :  { %2569 = vrot.lane.b32.xlu0 %v2567_v19, %s4831_s1  ;;  %v4000_v23 = vmul.f32 -1.442695, %v2560_v22 }
0x3739   :  { %4692 = vpow2.f32 %v4000_v23 }
0x3743   :  { %v4693_v24 = vpop.eup %4692 }
0x3744   :  { %v2564_v25 = vadd.f32 1.0, %v4693_v24 }
0x3746   :  { %4694 = vrcp.f32 %v2564_v25 }
0x3750   :  { %v4695_v26 = vpop.eup %4694 }
0x3751   :  { %v2579_v31 = vsub.f32 1.0, %v4695_v26  ;;  %v2585_v33 = vmul.f32 %v4695_v26, %v2481_v16 }
0x37a9   :  { %v2570_v27 = vpop.permute.xlu0 %2569 }
0x37aa   :  { %v2572_v14 = vmul.f32 %v4695_v26, %v2570_v27 }
0x37ac   :  { %2574 = vrot.lane.b32.xlu1 %v2572_v14, %s4830_s5 }
0x381e   :  { %v2575_v28 = vpop.permute.xlu1 %2574 }
0x381f   :  { %v2577_v29 = vadd.f32 %v2575_v28, %v2559_v21 }
0x3821   :  { %4696 = vtanh.f32 %v2577_v29 }
0x382b   :  { %v4697_v30 = vpop.eup %4696 }
0x382c   :  { %2581 = vrot.lane.b32.xlu0 %v4697_v30, %s4832_s6  ;;  %v2911_v30 = vld [vmem:[%s5459_s14 + $0x8] sm:$0xff] }
0x389e   :  { %v2582_v32 = vpop.permute.xlu0 %2581 }
0x389f   :  { %v2584_v34 = vmul.f32 %v2582_v32, %v2579_v31  ;;  %v2908_v31 = vld [vmem:[%s5458_s13] sm:$0xff]  ;;  %s5473_s13 = sld [smem:[#allocation20_spill]] }
0x38a1   :  { %v2586_v35 = vadd.f32 %v2585_v33, %v2584_v34  ;;  %v3068_v34 = vld [vmem:[%s5460_s15] sm:$0xff] }
0x38a3   :  { %2588 = vrot.lane.b32.xlu1 %v2586_v35, %s4832_s6 }
0x3915   :  { %v2589_v36 = vpop.permute.xlu1 %2588 }
0x3916   :  { %2591 = vst.msk [vmem:[#allocation6 + $0x4] sm:$0x1] %vm288_vm3, %v2589_v36  ;;  %4320 = vmatmul.mubr.msk.f32.vlgmr.msra.gmra.mrb[24].mxu0 %vm174_vm4, %v2589_v36 }
0x3917   :  { %4510 = vmatpush3.bf16.msra.mxu0 %v5170_v39  ;;  %4333 = vmatprep.mubr.msk.f32.mxu0 %vm4828_vm1, %v4829_v8 }
0x3918   :  { %4343 = vmatprep.subr.mxu0 %v4829_v8 }
0x39e9   :  { %v2660_v37 = vpop.f32.mrb[24].mxu0 }
0x39ea   :  { %v2672_v38 = vadd.f32 %v2660_v37, %v5204_v56  ;;  %v4321_v40 = vpop.f32.mrb[25].mxu0  ;;  %v2665_v42 = vadd.f32 %v2664_v41, %v2660_v37  ;;  %v2907_v37 = vld [vmem:[%s5473_s13] sm:$0xff] }
0x39ec   :  { %2674 = vrot.lane.b32.xlu0 %v2672_v38, %s4831_s1  ;;  %v4002_v43 = vmul.f32 -1.442695, %v2665_v42  ;;  %v3070_v42 = vld [vmem:[%s5460_s15 + $0x10] sm:$0xff] }
0x39ee   :  { %4698 = vpow2.f32 %v4002_v43  ;;  %v3071_v43 = vld [vmem:[%s5460_s15 + $0x18] sm:$0xff] }
0x39f8   :  { %v4699_v7 = vpop.eup %4698 }
0x39f9   :  { %v2669_v44 = vadd.f32 1.0, %v4699_v7 }
0x39fb   :  { %4700 = vrcp.f32 %v2669_v44  ;;  %v5317_v44 = vpack.c.bf16 %v3071_v43, %v3070_v42 }
0x3a05   :  { %v4701_v45 = vpop.eup %4700 }
0x3a06   :  { %v2684_v50 = vsub.f32 1.0, %v4701_v45  ;;  %v2690_v52 = vmul.f32 %v4701_v45, %v2586_v35  ;;  %v3069_v35 = vld [vmem:[%s5460_s15 + $0x8] sm:$0xff]  ;;  %s4833_s15 = smov 64  }
0x3a07   :  { %v5304_v38 = vpack.c.bf16 %v3069_v35, %v3068_v34 }
0x3a5e   :  { %v2675_v39 = vpop.permute.xlu0 %2674 }
0x3a5f   :  { %v2677_v46 = vmul.f32 %v4701_v45, %v2675_v39  ;;  %v4011_v45 = vld [vmem:[%s5462_s17] ss:$0 sm:$0xff] }
0x3a61   :  { %2679 = vrot.lane.b32.xlu1 %v2677_v46, %s4830_s5 }
0x3ad3   :  { %v2680_v47 = vpop.permute.xlu1 %2679 }
0x3ad4   :  { %v2682_v48 = vadd.f32 %v2680_v47, %v2664_v41 }
0x3ad6   :  { %4702 = vtanh.f32 %v2682_v48 }
0x3ae0   :  { %v4703_v49 = vpop.eup %4702 }
0x3ae1   :  { %2686 = vrot.lane.b32.xlu0 %v4703_v49, %s4832_s6 }
0x3b53   :  { %v2687_v51 = vpop.permute.xlu0 %2686 }
0x3b54   :  { %v2689_v53 = vmul.f32 %v2687_v51, %v2684_v50  ;;  %v4009_v50 = vld [vmem:[%s5461_s16] ss:$0 sm:$0xff]  ;;  %s4834_s16 = smov [#allocation11]  }
0x3b55   :  { %s3915_s28 = sshll.u32 %s4834_s16, 4  ;;  %s3916_s28 = int_to_ptr.vmem [resolvable:$true] %s3915_s28 }
0x3b56   :  { %v2691_v54 = vadd.f32 %v2690_v52, %v2689_v53  ;;  %s4776_s9 = scalar_lea.vmem %s3916_s28, 16  ;;  %s4780_s29 = scalar_lea.vmem %s3916_s28, 32 }
0x3b57   :  { %p4777_p5 = scmp.ne.s32.totalorder %s3916_s28, %s4776_s9  ;;  %p4781_p6 = scmp.lt.s32.totalorder %s3916_s28, %s3916_s28 }
0x3b58   :  { %2693 = vrot.lane.b32.xlu1 %v2691_v54, %s4832_s6  ;;  %p4782_p7 = scmp.lt.s32.totalorder %s4780_s29, %s4776_s9 }
0x3b5a   :  { %p4783_p8 = por %p4782_p7, %p4781_p6 }
0x3b5c   :  { %p4784_p9 = pnand %p4783_p8, %p4777_p5 }
0x3bca   :  { %v2694_v55 = vpop.permute.xlu1 %2693 }
0x3bcb   :  { %2696 = vst.msk [vmem:[#allocation6 + $0x5] sm:$0x1] %vm288_vm3, %v2694_v55  ;;  %4327 = vmatmul.mubr.msk.f32.vlgmr.msra.gmra.mrb[24].mxu1 %vm174_vm4, %v2694_v55 }
0x3bcc   :  { %4340 = vmatprep.mubr.msk.f32.mxu1 %vm4828_vm1, %v4829_v8 }
0x3c9e   :  { %v2765_v57 = vpop.f32.mrb[24].mxu1 }
0x3c9f   :  { %v2777_v58 = vadd.f32 %v2765_v57, %v5204_v56  ;;  %v4328_v59 = vpop.f32.mrb[25].mxu1  ;;  %v2770_v61 = vadd.f32 %v2769_v60, %v2765_v57 }
0x3ca1   :  { %2779 = vrot.lane.b32.xlu0 %v2777_v58, %s4831_s1  ;;  %v4004_v62 = vmul.f32 -1.442695, %v2770_v61 }
0x3ca3   :  { %4704 = vpow2.f32 %v4004_v62 }
0x3cad   :  { %v4705_v63 = vpop.eup %4704 }
0x3cae   :  { %v2774_v0 = vadd.f32 1.0, %v4705_v63 }
0x3cb0   :  { %4706 = vrcp.f32 %v2774_v0 }
0x3cba   :  { %v4707_v1 = vpop.eup %4706 }
0x3cbb   :  { %v2789_v10 = vsub.f32 1.0, %v4707_v1  ;;  %v2795_v12 = vmul.f32 %v4707_v1, %v2691_v54 }
0x3d13   :  { %v2780_v2 = vpop.permute.xlu0 %2779 }
0x3d14   :  { %v2782_v3 = vmul.f32 %v4707_v1, %v2780_v2 }
0x3d16   :  { %2784 = vrot.lane.b32.xlu1 %v2782_v3, %s4830_s5 }
0x3d88   :  { %v2785_v4 = vpop.permute.xlu1 %2784 }
0x3d89   :  { %v2787_v5 = vadd.f32 %v2785_v4, %v2769_v60 }
0x3d8b   :  { %4708 = vtanh.f32 %v2787_v5 }
0x3d95   :  { %v4709_v9 = vpop.eup %4708 }
0x3d96   :  { %2791 = vrot.lane.b32.xlu0 %v4709_v9, %s4832_s6 }
0x3e08   :  { %v2792_v11 = vpop.permute.xlu0 %2791 }
0x3e09   :  { %v2794_v13 = vmul.f32 %v2792_v11, %v2789_v10 }
0x3e0b   :  { %v2796_v15 = vadd.f32 %v2795_v12, %v2794_v13 }
0x3e0d   :  { %2798 = vrot.lane.b32.xlu1 %v2796_v15, %s4832_s6 }
0x3e7f   :  { %v2799_v16 = vpop.permute.xlu1 %2798 }
0x3e80   :  { %2801 = vst.msk [vmem:[#allocation6 + $0x6] sm:$0x1] %vm288_vm3, %v2799_v16  ;;  %4334 = vmatmul.mubr.msk.f32.vlgmr.msra.gmra.mrb[26].mxu0 %vm174_vm4, %v2799_v16 }
0x3e81   :  { %4345 = vmatprep.mubr.msk.f32.mxu0 %vm4828_vm1, %v4829_v8  ;;  %4344 = vmatpush3.msra.mxu0 %v2908_v31 }
0x3e82   :  { %4520 = vmatprep.subr.bf16.mxu0 %v4827_v6 }
0x3e84   :  { %4346 = vmatmul.mubr.msk.f32.vlgmr.msra.gmra.mrb[28].mxu0 %vm86_vm0, %v2907_v37 }
0x3e85   :  { %4522 = vmatpush3.bf16.msra.mxu0 %v5304_v38  ;;  %4367 = vmatprep.mubr.msk.f32.mxu0 %vm4828_vm1, %v4829_v8 }
0x3e86   :  { %4523 = vmatprep.subr.bf16.mxu0 %v4827_v6 }
0x3e89   :  { %4525 = vmatpush3.bf16.msra.mxu0 %v5317_v44 }
0x3e8a   :  { %4532 = vmatprep.subr.bf16.mxu0 %v4827_v6 }
0x3f53   :  { %v2870_v17 = vpop.f32.mrb[26].mxu0 }
0x3f54   :  { %v2882_v18 = vadd.f32 %v2870_v17, %v5204_v56  ;;  %v4335_v19 = vpop.f32.mrb[27].mxu0  ;;  %v2875_v21 = vadd.f32 %v2874_v20, %v2870_v17  ;;  %v2910_v56 = vld [vmem:[%s5459_s14] sm:$0xff] }
0x3f55   :  { %v4512_v32 = vpack.c.bf16 %v2911_v30, %v2910_v56 }
0x3f56   :  { %2884 = vrot.lane.b32.xlu0 %v2882_v18, %s4831_s1  ;;  %v4006_v22 = vmul.f32 -1.442695, %v2875_v21 }
0x3f57   :  { %4513 = vmatpush3.bf16.msra.mxu1 %v4512_v32  ;;  %v3054_v47 = vpop.f32.mrb[28].mxu0 }
0x3f58   :  { %4710 = vpow2.f32 %v4006_v22  ;;  %4514 = vmatprep.subr.bf16.mxu1 %v4827_v6  ;;  %v4347_v48 = vpop.f32.mrb[29].mxu0 }
0x3f62   :  { %v4711_v23 = vpop.eup %4710 }
0x3f63   :  { %v2879_v24 = vadd.f32 1.0, %v4711_v23 }
0x3f65   :  { %4712 = vrcp.f32 %v2879_v24 }
0x3f6f   :  { %v4713_v25 = vpop.eup %4712 }
0x3f70   :  { %v2894_v33 = vsub.f32 1.0, %v4713_v25  ;;  %v2900_v40 = vmul.f32 %v4713_v25, %v2796_v15 }
0x3fc8   :  { %v2885_v26 = vpop.permute.xlu0 %2884 }
0x3fc9   :  { %v2887_v27 = vmul.f32 %v4713_v25, %v2885_v26 }
0x3fcb   :  { %2889 = vrot.lane.b32.xlu1 %v2887_v27, %s4830_s5 }
0x403d   :  { %v2890_v14 = vpop.permute.xlu1 %2889 }
0x403e   :  { %v2892_v28 = vadd.f32 %v2890_v14, %v2874_v20 }
0x4040   :  { %4714 = vtanh.f32 %v2892_v28 }
0x404a   :  { %v4715_v29 = vpop.eup %4714 }
0x404b   :  { %2896 = vrot.lane.b32.xlu0 %v4715_v29, %s4832_s6 }
0x404f   :  { %3159 = vrot.lane.b32.xlu0 %v4011_v45, %s4833_s15 }
0x40bd   :  { %v2897_v36 = vpop.permute.xlu0 %2896 }
0x40be   :  { %v2899_v41 = vmul.f32 %v2897_v36, %v2894_v33 }
0x40c0   :  { %v2901_v7 = vadd.f32 %v2900_v40, %v2899_v41 }
0x40c1   :  { %v5344_v54 = vpop.permute.xlu0 %3159 }
0x40c2   :  { %2903 = vrot.lane.b32.xlu1 %v2901_v7, %s4832_s6 }
0x4134   :  { %v2904_v39 = vpop.permute.xlu1 %2903 }
0x4135   :  { %2906 = vst.msk [vmem:[#allocation6 + $0x7] sm:$0x1] %vm288_vm3, %v2904_v39 }
0x413c   :  { %v2909_v46 = vld [vmem:[#allocation6] sm:$0xff] }
0x413d   :  { %4341 = vmatmul.mubr.msk.f32.vlgmr.msra.gmra.mrb[26].mxu1 %vm174_vm4, %v2909_v46 }
0x413e   :  { %4516 = vmatpush3.bf16.msra.mxu1 %v5304_v38  ;;  %4356 = vmatprep.mubr.msk.f32.mxu1 %vm4828_vm1, %v4829_v8 }
0x413f   :  { %4517 = vmatprep.subr.bf16.mxu1 %v4827_v6 }
0x4142   :  { %4519 = vmatpush3.bf16.msra.mxu1 %v5317_v44 }
0x4143   :  { %4526 = vmatprep.subr.bf16.mxu1 %v4827_v6 }
0x4145   :  { %4357 = vmatmul.mubr.f32.vlgmr.msra.gmra.mrb[28].mxu1 %v4829_v8 }
0x4146   :  { %4528 = vmatpush3.bf16.msra.mxu1 %v5304_v38  ;;  %4378 = vmatprep.mubr.msk.f32.mxu1 %vm4828_vm1, %v4829_v8 }
0x4147   :  { %4529 = vmatprep.subr.bf16.mxu1 %v4827_v6 }
0x414a   :  { %4531 = vmatpush3.bf16.msra.mxu1 %v5317_v44 }
0x414b   :  { %4538 = vmatprep.subr.bf16.mxu1 %v4827_v6 }
0x4210   :  { %v2981_v49 = vpop.f32.mrb[26].mxu1 }
0x4211   :  { %v3055_v51 = vadd.f32 %v3054_v47, %v2981_v49  ;;  %v4342_v52 = vpop.f32.mrb[27].mxu1 }
0x4213   :  { %v3065_v53 = vadd.f32 %v4009_v50, %v3055_v51 }
0x4215   :  { %3067 = vst.msk [vmem:[#allocation7] sm:$0xff] %vm3066_vm5, %v3065_v53 }
0x4218   :  { %v3142_v55 = vpop.f32.mrb[28].mxu1 }
0x4219   :  { %v3162_v57 = vadd.f32 %v5344_v54, %v3142_v55  ;;  %v4358_v58 = vpop.f32.mrb[29].mxu1 }
0x421b   :  { %3164 = vrot.lane.b32.xlu1 %v3162_v57, %s4833_s15 }
0x421c   :  { %v3146_v59 = vld [vmem:[#allocation7] sm:$0x1]  ;;  %v3257_v19 = vld [vmem:[#allocation7 + $0x1] sm:$0x1]  ;;  %v3360_v37 = vld [vmem:[#allocation7 + $0x2] sm:$0x1] }
0x421d   :  { %v3147_v60 = vadd.f32 %v3146_v59, %v3142_v55 }
0x421f   :  { %v4010_v61 = vmul.f32 -1.442695, %v3147_v60  ;;  %v3463_v60 = vld [vmem:[#allocation7 + $0x3] sm:$0x1] }
0x4221   :  { %4716 = vpow2.f32 %v4010_v61 }
0x422b   :  { %v4717_v62 = vpop.eup %4716 }
0x422c   :  { %v3151_v63 = vadd.f32 1.0, %v4717_v62 }
0x422e   :  { %4718 = vrcp.f32 %v3151_v63 }
0x4238   :  { %v4719_v0 = vpop.eup %4718 }
0x4239   :  { %v3174_v9 = vsub.f32 1.0, %v4719_v0  ;;  %v3180_v11 = vmul.f32 0.0, %v4719_v0 }
0x428d   :  { %v3165_v1 = vpop.permute.xlu1 %3164 }
0x428e   :  { %v3167_v2 = vmul.f32 %v4719_v0, %v3165_v1 }
0x4290   :  { %3169 = vrot.lane.b32.xlu0 %v3167_v2, %s4833_s15 }
0x4302   :  { %v3170_v3 = vpop.permute.xlu0 %3169 }
0x4303   :  { %v3172_v4 = vadd.f32 %v3170_v3, %v3146_v59 }
0x4305   :  { %4720 = vtanh.f32 %v3172_v4 }
0x430f   :  { %v4721_v5 = vpop.eup %4720 }
0x4310   :  { %3176 = vrot.lane.b32.xlu1 %v4721_v5, %s4831_s1 }
0x4382   :  { %v3177_v10 = vpop.permute.xlu1 %3176 }
0x4383   :  { %v3179_v12 = vmul.f32 %v3177_v10, %v3174_v9 }
0x4385   :  { %v3181_v13 = vadd.f32 %v3180_v11, %v3179_v12 }
0x4387   :  { %3183 = vrot.lane.b32.xlu0 %v3181_v13, %s4831_s1 }
0x43f9   :  { %v3184_v15 = vpop.permute.xlu0 %3183 }
0x43fa   :  { %4368 = vmatmul.mubr.msk.f32.vlgmr.msra.gmra.mrb[30].mxu0 %vm3073_vm6, %v3184_v15 }
0x43fb   :  { %4534 = vmatpush3.bf16.msra.mxu0 %v5304_v38  ;;  %4389 = vmatprep.mubr.msk.f32.mxu0 %vm4828_vm1, %v4829_v8 }
0x43fc   :  { %4535 = vmatprep.subr.bf16.mxu0 %v4827_v6 }
0x43ff   :  { %4537 = vmatpush3.bf16.msra.mxu0 %v5317_v44 }
0x4400   :  { %4544 = vmatprep.subr.bf16.mxu0 %v4827_v6 }
0x44cd   :  { %v3253_v16 = vpop.f32.mrb[30].mxu0 }
0x44ce   :  { %v3265_v17 = vadd.f32 %v3253_v16, %v5344_v54  ;;  %v4369_v18 = vpop.f32.mrb[31].mxu0  ;;  %v3258_v20 = vadd.f32 %v3257_v19, %v3253_v16 }
0x44d0   :  { %3267 = vrot.lane.b32.xlu1 %v3265_v17, %s4833_s15  ;;  %v4013_v21 = vmul.f32 -1.442695, %v3258_v20  ;;  %v3566_v20 = vld [vmem:[#allocation7 + $0x4] sm:$0x1] }
0x44d2   :  { %4722 = vpow2.f32 %v4013_v21 }
0x44dc   :  { %v4723_v22 = vpop.eup %4722 }
0x44dd   :  { %v3262_v23 = vadd.f32 1.0, %v4723_v22 }
0x44df   :  { %4724 = vrcp.f32 %v3262_v23 }
0x44e9   :  { %v4725_v24 = vpop.eup %4724 }
0x44ea   :  { %v3277_v29 = vsub.f32 1.0, %v4725_v24  ;;  %v3283_v30 = vmul.f32 %v4725_v24, %v3181_v13 }
0x4542   :  { %v3268_v25 = vpop.permute.xlu1 %3267 }
0x4543   :  { %v3270_v26 = vmul.f32 %v4725_v24, %v3268_v25 }
0x4545   :  { %3272 = vrot.lane.b32.xlu0 %v3270_v26, %s4833_s15 }
0x45b7   :  { %v3273_v27 = vpop.permute.xlu0 %3272 }
0x45b8   :  { %v3275_v14 = vadd.f32 %v3273_v27, %v3257_v19 }
0x45ba   :  { %4726 = vtanh.f32 %v3275_v14 }
0x45c4   :  { %v4727_v28 = vpop.eup %4726 }
0x45c5   :  { %3279 = vrot.lane.b32.xlu1 %v4727_v28, %s4831_s1 }
0x4637   :  { %v3280_v56 = vpop.permute.xlu1 %3279 }
0x4638   :  { %v3282_v31 = vmul.f32 %v3280_v56, %v3277_v29 }
0x463a   :  { %v3284_v32 = vadd.f32 %v3283_v30, %v3282_v31 }
0x463c   :  { %3286 = vrot.lane.b32.xlu0 %v3284_v32, %s4831_s1 }
0x46ae   :  { %v3287_v33 = vpop.permute.xlu0 %3286 }
0x46af   :  { %4379 = vmatmul.mubr.msk.f32.vlgmr.msra.gmra.mrb[30].mxu1 %vm3073_vm6, %v3287_v33 }
0x46b0   :  { %4540 = vmatpush3.bf16.msra.mxu1 %v5304_v38  ;;  %4400 = vmatprep.mubr.msk.f32.mxu1 %vm4828_vm1, %v4829_v8 }
0x46b1   :  { %4541 = vmatprep.subr.bf16.mxu1 %v4827_v6 }
0x46b4   :  { %4543 = vmatpush3.bf16.msra.mxu1 %v5317_v44 }
0x46b5   :  { %4550 = vmatprep.subr.bf16.mxu1 %v4827_v6 }
0x4782   :  { %v3356_v34 = vpop.f32.mrb[30].mxu1 }
0x4783   :  { %v3368_v35 = vadd.f32 %v3356_v34, %v5344_v54  ;;  %v4380_v36 = vpop.f32.mrb[31].mxu1  ;;  %v3361_v40 = vadd.f32 %v3360_v37, %v3356_v34 }
0x4785   :  { %3370 = vrot.lane.b32.xlu1 %v3368_v35, %s4833_s15  ;;  %v4015_v41 = vmul.f32 -1.442695, %v3361_v40  ;;  %v3669_v40 = vld [vmem:[#allocation7 + $0x5] sm:$0x1] }
0x4787   :  { %4728 = vpow2.f32 %v4015_v41 }
0x4791   :  { %v4729_v42 = vpop.eup %4728 }
0x4792   :  { %v3365_v43 = vadd.f32 1.0, %v4729_v42 }
0x4794   :  { %4730 = vrcp.f32 %v3365_v43 }
0x479e   :  { %v4731_v7 = vpop.eup %4730 }
0x479f   :  { %v3380_v49 = vsub.f32 1.0, %v4731_v7  ;;  %v3386_v51 = vmul.f32 %v4731_v7, %v3284_v32 }
0x47f7   :  { %v3371_v45 = vpop.permute.xlu1 %3370 }
0x47f8   :  { %v3373_v39 = vmul.f32 %v4731_v7, %v3371_v45 }
0x47fa   :  { %3375 = vrot.lane.b32.xlu0 %v3373_v39, %s4833_s15 }
0x486c   :  { %v3376_v46 = vpop.permute.xlu0 %3375 }
0x486d   :  { %v3378_v47 = vadd.f32 %v3376_v46, %v3360_v37 }
0x486f   :  { %4732 = vtanh.f32 %v3378_v47 }
0x4879   :  { %v4733_v48 = vpop.eup %4732 }
0x487a   :  { %3382 = vrot.lane.b32.xlu1 %v4733_v48, %s4831_s1 }
0x48ec   :  { %v3383_v50 = vpop.permute.xlu1 %3382 }
0x48ed   :  { %v3385_v52 = vmul.f32 %v3383_v50, %v3380_v49 }
0x48ef   :  { %v3387_v53 = vadd.f32 %v3386_v51, %v3385_v52 }
0x48f1   :  { %3389 = vrot.lane.b32.xlu0 %v3387_v53, %s4831_s1 }
0x4963   :  { %v3390_v55 = vpop.permute.xlu0 %3389 }
0x4964   :  { %4390 = vmatmul.mubr.msk.f32.vlgmr.msra.gmra.mrb[32].mxu0 %vm3073_vm6, %v3390_v55 }
0x4965   :  { %4546 = vmatpush3.bf16.msra.mxu0 %v5304_v38  ;;  %4411 = vmatprep.mubr.msk.f32.mxu0 %vm4828_vm1, %v4829_v8 }
0x4966   :  { %4547 = vmatprep.subr.bf16.mxu0 %v4827_v6 }
0x4969   :  { %4549 = vmatpush3.bf16.msra.mxu0 %v5317_v44 }
0x496a   :  { %4556 = vmatprep.subr.bf16.mxu0 %v4827_v6 }
0x4a37   :  { %v3459_v57 = vpop.f32.mrb[32].mxu0 }
0x4a38   :  { %v3471_v58 = vadd.f32 %v3459_v57, %v5344_v54  ;;  %v4391_v59 = vpop.f32.mrb[33].mxu0  ;;  %v3464_v61 = vadd.f32 %v3463_v60, %v3459_v57  ;;  %v3772_v57 = vld [vmem:[#allocation7 + $0x6] sm:$0x1] }
0x4a3a   :  { %3473 = vrot.lane.b32.xlu1 %v3471_v58, %s4833_s15  ;;  %v4017_v62 = vmul.f32 -1.442695, %v3464_v61 }
0x4a3c   :  { %4734 = vpow2.f32 %v4017_v62 }
0x4a46   :  { %v4735_v63 = vpop.eup %4734 }
0x4a47   :  { %v3468_v0 = vadd.f32 1.0, %v4735_v63 }
0x4a49   :  { %4736 = vrcp.f32 %v3468_v0 }
0x4a53   :  { %v4737_v1 = vpop.eup %4736 }
0x4a54   :  { %v3483_v10 = vsub.f32 1.0, %v4737_v1  ;;  %v3489_v12 = vmul.f32 %v4737_v1, %v3387_v53 }
0x4aac   :  { %v3474_v2 = vpop.permute.xlu1 %3473 }
0x4aad   :  { %v3476_v3 = vmul.f32 %v4737_v1, %v3474_v2 }
0x4aaf   :  { %3478 = vrot.lane.b32.xlu0 %v3476_v3, %s4833_s15 }
0x4b21   :  { %v3479_v4 = vpop.permute.xlu0 %3478 }
0x4b22   :  { %v3481_v5 = vadd.f32 %v3479_v4, %v3463_v60 }
0x4b24   :  { %4738 = vtanh.f32 %v3481_v5 }
0x4b2e   :  { %v4739_v9 = vpop.eup %4738 }
0x4b2f   :  { %3485 = vrot.lane.b32.xlu1 %v4739_v9, %s4831_s1 }
0x4ba1   :  { %v3486_v11 = vpop.permute.xlu1 %3485 }
0x4ba2   :  { %v3488_v13 = vmul.f32 %v3486_v11, %v3483_v10 }
0x4ba4   :  { %v3490_v15 = vadd.f32 %v3489_v12, %v3488_v13 }
0x4ba6   :  { %3492 = vrot.lane.b32.xlu0 %v3490_v15, %s4831_s1 }
0x4c18   :  { %v3493_v16 = vpop.permute.xlu0 %3492 }
0x4c19   :  { %4401 = vmatmul.mubr.msk.f32.vlgmr.msra.gmra.mrb[32].mxu1 %vm3073_vm6, %v3493_v16 }
0x4c1a   :  { %4552 = vmatpush3.bf16.msra.mxu1 %v5304_v38  ;;  %4422 = vmatprep.mubr.msk.f32.mxu1 %vm4828_vm1, %v4829_v8 }
0x4c1b   :  { %4553 = vmatprep.subr.bf16.mxu1 %v4827_v6 }
0x4c1e   :  { %4555 = vmatpush3.bf16.msra.mxu1 %v5317_v44 }
0x4cec   :  { %v3562_v17 = vpop.f32.mrb[32].mxu1 }
0x4ced   :  { %v3574_v18 = vadd.f32 %v3562_v17, %v5344_v54  ;;  %v4402_v19 = vpop.f32.mrb[33].mxu1  ;;  %v3567_v21 = vadd.f32 %v3566_v20, %v3562_v17  ;;  %v3875_v17 = vld [vmem:[#allocation7 + $0x7] sm:$0x1] }
0x4cef   :  { %3576 = vrot.lane.b32.xlu1 %v3574_v18, %s4833_s15  ;;  %v4019_v22 = vmul.f32 -1.442695, %v3567_v21 }
0x4cf1   :  { %4740 = vpow2.f32 %v4019_v22 }
0x4cfb   :  { %v4741_v23 = vpop.eup %4740 }
0x4cfc   :  { %v3571_v24 = vadd.f32 1.0, %v4741_v23 }
0x4cfe   :  { %4742 = vrcp.f32 %v3571_v24 }
0x4d08   :  { %v4743_v25 = vpop.eup %4742 }
0x4d09   :  { %v3586_v56 = vsub.f32 1.0, %v4743_v25  ;;  %v3592_v31 = vmul.f32 %v4743_v25, %v3490_v15 }
0x4d61   :  { %v3577_v26 = vpop.permute.xlu1 %3576 }
0x4d62   :  { %v3579_v27 = vmul.f32 %v4743_v25, %v3577_v26 }
0x4d64   :  { %3581 = vrot.lane.b32.xlu0 %v3579_v27, %s4833_s15 }
0x4dd6   :  { %v3582_v14 = vpop.permute.xlu0 %3581 }
0x4dd7   :  { %v3584_v28 = vadd.f32 %v3582_v14, %v3566_v20 }
0x4dd9   :  { %4744 = vtanh.f32 %v3584_v28 }
0x4de3   :  { %v4745_v29 = vpop.eup %4744 }
0x4de4   :  { %3588 = vrot.lane.b32.xlu1 %v4745_v29, %s4831_s1 }
0x4e56   :  { %v3589_v30 = vpop.permute.xlu1 %3588 }
0x4e57   :  { %v3591_v32 = vmul.f32 %v3589_v30, %v3586_v56 }
0x4e59   :  { %v3593_v33 = vadd.f32 %v3592_v31, %v3591_v32 }
0x4e5b   :  { %3595 = vrot.lane.b32.xlu0 %v3593_v33, %s4831_s1 }
0x4ecd   :  { %v3596_v34 = vpop.permute.xlu0 %3595 }
0x4ece   :  { %4412 = vmatmul.mubr.msk.f32.vlgmr.msra.gmra.mrb[34].mxu0 %vm3073_vm6, %v3596_v34 }
0x4ecf   :  { %4558 = vmatpush3.bf16.msra.mxu0 %v5304_v38  ;;  %4433 = vmatprep.mubr.msk.f32.mxu0 %vm4828_vm1, %v4829_v8 }
0x4ed0   :  { %4559 = vmatprep.subr.bf16.mxu0 %v4827_v6 }
0x4ed3   :  { %4561 = vmatpush3.bf16.msra.mxu0 %v5317_v44 }
0x4fa1   :  { %v3665_v35 = vpop.f32.mrb[34].mxu0 }
0x4fa2   :  { %v3677_v36 = vadd.f32 %v3665_v35, %v5344_v54  ;;  %v4413_v37 = vpop.f32.mrb[35].mxu0  ;;  %v3670_v41 = vadd.f32 %v3669_v40, %v3665_v35 }
0x4fa4   :  { %3679 = vrot.lane.b32.xlu1 %v3677_v36, %s4833_s15  ;;  %v4021_v42 = vmul.f32 -1.442695, %v3670_v41 }
0x4fa6   :  { %4746 = vpow2.f32 %v4021_v42 }
0x4fb0   :  { %v4747_v43 = vpop.eup %4746 }
0x4fb1   :  { %v3674_v7 = vadd.f32 1.0, %v4747_v43 }
0x4fb3   :  { %4748 = vrcp.f32 %v3674_v7 }
0x4fbd   :  { %v4749_v38 = vpop.eup %4748 }
0x4fbe   :  { %v3689_v46 = vsub.f32 1.0, %v4749_v38  ;;  %v3695_v48 = vmul.f32 %v4749_v38, %v3593_v33 }
0x5016   :  { %v3680_v45 = vpop.permute.xlu1 %3679 }
0x5017   :  { %v3682_v8 = vmul.f32 %v4749_v38, %v3680_v45 }
0x5019   :  { %3684 = vrot.lane.b32.xlu0 %v3682_v8, %s4833_s15 }
0x508b   :  { %v3685_v6 = vpop.permute.xlu0 %3684 }
0x508c   :  { %v3687_v44 = vadd.f32 %v3685_v6, %v3669_v40 }
0x508e   :  { %4750 = vtanh.f32 %v3687_v44 }
0x5098   :  { %v4751_v39 = vpop.eup %4750 }
0x5099   :  { %3691 = vrot.lane.b32.xlu1 %v4751_v39, %s4831_s1 }
0x510b   :  { %v3692_v47 = vpop.permute.xlu1 %3691 }
0x510c   :  { %v3694_v49 = vmul.f32 %v3692_v47, %v3689_v46 }
0x510e   :  { %v3696_v50 = vadd.f32 %v3695_v48, %v3694_v49 }
0x5110   :  { %3698 = vrot.lane.b32.xlu0 %v3696_v50, %s4831_s1 }
0x5182   :  { %v3699_v51 = vpop.permute.xlu0 %3698 }
0x5183   :  { %4423 = vmatmul.mubr.msk.f32.vlgmr.msra.gmra.mrb[34].mxu1 %vm3073_vm6, %v3699_v51 }
0x5256   :  { %v3768_v52 = vpop.f32.mrb[34].mxu1 }
0x5257   :  { %v3780_v53 = vadd.f32 %v3768_v52, %v5344_v54  ;;  %v4424_v55 = vpop.f32.mrb[35].mxu1  ;;  %v3773_v58 = vadd.f32 %v3772_v57, %v3768_v52 }
0x5259   :  { %3782 = vrot.lane.b32.xlu1 %v3780_v53, %s4833_s15  ;;  %v4023_v59 = vmul.f32 -1.442695, %v3773_v58 }
0x525b   :  { %4752 = vpow2.f32 %v4023_v59 }
0x5265   :  { %v4753_v60 = vpop.eup %4752 }
0x5266   :  { %v3777_v61 = vadd.f32 1.0, %v4753_v60 }
0x5268   :  { %4754 = vrcp.f32 %v3777_v61 }
0x5272   :  { %v4755_v62 = vpop.eup %4754 }
0x5273   :  { %v3792_v4 = vsub.f32 1.0, %v4755_v62  ;;  %v3798_v9 = vmul.f32 %v4755_v62, %v3696_v50 }
0x52cb   :  { %v3783_v63 = vpop.permute.xlu1 %3782 }
0x52cc   :  { %v3785_v0 = vmul.f32 %v4755_v62, %v3783_v63 }
0x52ce   :  { %3787 = vrot.lane.b32.xlu0 %v3785_v0, %s4833_s15 }
0x5340   :  { %v3788_v1 = vpop.permute.xlu0 %3787 }
0x5341   :  { %v3790_v2 = vadd.f32 %v3788_v1, %v3772_v57 }
0x5343   :  { %4756 = vtanh.f32 %v3790_v2 }
0x534d   :  { %v4757_v3 = vpop.eup %4756 }
0x534e   :  { %3794 = vrot.lane.b32.xlu1 %v4757_v3, %s4831_s1 }
0x53c0   :  { %v3795_v5 = vpop.permute.xlu1 %3794 }
0x53c1   :  { %v3797_v10 = vmul.f32 %v3795_v5, %v3792_v4 }
0x53c3   :  { %v3799_v11 = vadd.f32 %v3798_v9, %v3797_v10 }
0x53c5   :  { %3801 = vrot.lane.b32.xlu0 %v3799_v11, %s4831_s1 }
0x5437   :  { %v3802_v12 = vpop.permute.xlu0 %3801 }
0x5438   :  { %4434 = vmatmul.mubr.msk.f32.vlgmr.msra.gmra.mrb[36].mxu0 %vm3073_vm6, %v3802_v12 }
0x550b   :  { %v3871_v13 = vpop.f32.mrb[36].mxu0 }
0x550c   :  { %v3883_v15 = vadd.f32 %v3871_v13, %v5344_v54  ;;  %v4435_v16 = vpop.f32.mrb[37].mxu0  ;;  %v3876_v18 = vadd.f32 %v3875_v17, %v3871_v13 }
0x550e   :  { %3885 = vrot.lane.b32.xlu1 %v3883_v15, %s4833_s15  ;;  %v4025_v19 = vmul.f32 -1.442695, %v3876_v18 }
0x5510   :  { %4758 = vpow2.f32 %v4025_v19 }
0x551a   :  { %v4759_v20 = vpop.eup %4758 }
0x551b   :  { %v3880_v21 = vadd.f32 1.0, %v4759_v20 }
0x551d   :  { %4760 = vrcp.f32 %v3880_v21 }
0x5527   :  { %v4761_v22 = vpop.eup %4760 }
0x5580   :  { %v3886_v23 = vpop.permute.xlu1 %3885 }
0x5581   :  { %v3888_v24 = vmul.f32 %v4761_v22, %v3886_v23 }
0x5583   :  { %3890 = vrot.lane.b32.xlu0 %v3888_v24, %s4833_s15 }
0x55f5   :  { %v3891_v25 = vpop.permute.xlu0 %3890 }
0x55f6   :  { %v3893_v26 = vadd.f32 %v3891_v25, %v3875_v17 }
0x55f8   :  { %4762 = vtanh.f32 %v3893_v26 }
0x5602   :  { %v4763_v27 = vpop.eup %4762 }
0x5603   :  { %3897 = vrot.lane.b32.xlu1 %v4763_v27, %s4831_s1 }
0x5604   :  { %4787 = shalt.err (!%p4784_p9)
}
0x5605   :  { %s4788_s11 = scalar_lea.hbm %s5463_s18, 16 }
0x5606   :  { %p4789_p10 = scmp.ne.s32.totalorder %s5463_s18, %s4788_s11  ;;  %p4792_p11 = scmp.lt.u32.totalorder %s4788_s11, %s5463_s18 }
0x5608   :  { %p4794_p12 = pnand %p4792_p11, %p4789_p10 }
0x560a   :  { %4797 = shalt.err (!%p4794_p12)
}
0x560b   :  { %3918 = dma.vmem_to_hbm [thread:$0]  %s3916_s28, 16, %s5463_s18, [#allocation9]   ;;  %v3895_v54 = vsub.f32 1.0, %v4761_v22  ;;  %v3901_v28 = vmul.f32 %v4761_v22, %v3799_v11  ;;  %vm3907_vm7 = vcmask 253952  }
0x560c   :  { %s4835_s21 = smov [#allocation12]  }
0x560d   :  { %s3925_s22 = sshll.u32 %s4835_s21, 4  ;;  %s3926_s22 = int_to_ptr.vmem [resolvable:$true] %s3925_s22 }
0x560e   :  { %s4798_s2 = scalar_lea.vmem %s3926_s22, 16  ;;  %s4802_s14 = scalar_lea.vmem %s3926_s22, 32 }
0x560f   :  { %p4799_p13 = scmp.ne.s32.totalorder %s3926_s22, %s4798_s2  ;;  %p4803_p0 = scmp.lt.s32.totalorder %s3926_s22, %s3926_s22 }
0x5610   :  { %p4804_p1 = scmp.lt.s32.totalorder %s4802_s14, %s4798_s2 }
0x5612   :  { %p4805_p2 = por %p4804_p1, %p4803_p0 }
0x5614   :  { %p4806_p3 = pnand %p4805_p2, %p4799_p13 }
0x5675   :  { %v3898_v14 = vpop.permute.xlu1 %3897 }
0x5676   :  { %v3900_v29 = vmul.f32 %v3898_v14, %v3895_v54 }
0x5678   :  { %v3902_v56 = vadd.f32 %v3901_v28, %v3900_v29 }
0x567a   :  { %3904 = vrot.lane.b32.xlu0 %v3902_v56, %s4831_s1 }
0x56ec   :  { %v3905_v30 = vpop.permute.xlu0 %3904 }
0x56ed   :  { %3908 = vst.msk [vmem:[#allocation12] sm:$0x1] %vm3907_vm7, %v3905_v30 }
0x56ee   :  { %4809 = shalt.err (!%p4806_p3)
}
0x56ef   :  { %s4810_s13 = scalar_lea.hbm %s5464_s19, 16 }
0x56f0   :  { %p4811_p4 = scmp.ne.s32.totalorder %s5464_s19, %s4810_s13  ;;  %p4814_p5 = scmp.lt.u32.totalorder %s4810_s13, %s5464_s19 }
0x56f2   :  { %p4816_p6 = pnand %p4814_p5, %p4811_p4 }
0x56f4   :  { %4819 = shalt.err (!%p4816_p6)
}
0x56f5   :  { %3928 = dma.vmem_to_hbm [thread:$0]  %s3926_s22, 16, %s5464_s19, [#allocation13]  }
0x56f6   :  { %4822 = dma.done.wait [#allocation9], 16  }
0x56f7   :  { %4823 = vsyncadd [#allocation9], 4294967280 }
0x56f8   :  { %4824 = dma.done.wait [#allocation13], 16  }
0x56f9   :  { %4825 = vsyncadd [#allocation13], 4294967280 }
0x56fa   :  { %3935 = vsyncpa [#allocation9], 1 }
0x56fb   :  { %3936 = vsyncpa [#allocation13], 1 }
0x56fc   :  { %3937 = vsyncpa [#allocation10], 1 }

</bundles_post_ra>
